<compile_context>
chip_gen: v5e
topology: v5e:2x2
jax: 0.10.0
libtpu: 0.0.40
codegen_flags: <defaults>
</compile_context>

<pallas_src>
import functools

import jax
import jax.numpy as jnp
from jax import lax
from jax.experimental import pallas as pl
from jax.experimental.pallas import tpu as pltpu


# ----------------------------- Pallas kernel ------------------------------- #
def _bigru_kernel(x_ref, wi_ref, bi_ref,
                  wh_f_ref, bhn_f_ref, wh_b_ref, bhn_b_ref,
                  wfc_f_ref, wfc_b_ref, bfc_ref,
                  out_ref, hid_ref,
                  gi_scr, of_scr, ob_scr,
                  *, seq_len, batch, hid_dim):
    T, B, H = seq_len, batch, hid_dim
    f32 = jnp.float32

    # ---- pre-phase: hoist the input-side projection out of the recurrence ----
    # One (T*B, E) @ (E, 6H) matmul replaces 2*T tiny per-step matmuls.
    # bi_ref already has b_ih (+ folded b_hr, b_hz) for both directions.
    x2 = x_ref[...].reshape(T * B, -1)
    gi_all = jnp.dot(x2, wi_ref[...], preferred_element_type=f32) + bi_ref[...]
    # Split once into per-gate, per-direction slabs (gate order:
    # 0..2 = fwd [r, z, n], 3..5 = bwd [r, z, n]).
    for g in range(6):
        gi_scr[g] = gi_all[:, g * H:(g + 1) * H].reshape(T, B, H)

    # Split recurrent weights per gate ONCE, outside the time loop, so the
    # loop body has no cross-lane slicing.
    wh_f = wh_f_ref[...]
    wh_b = wh_b_ref[...]
    whr_f, whz_f, whn_f = wh_f[:, :H], wh_f[:, H:2 * H], wh_f[:, 2 * H:]
    whr_b, whz_b, whn_b = wh_b[:, :H], wh_b[:, H:2 * H], wh_b[:, 2 * H:]
    bhn_f = bhn_f_ref[...]
    bhn_b = bhn_b_ref[...]

    def gru_cell(h, gi_r, gi_z, gi_n, whr, whz, whn, bhn):
        # PyTorch GRU cell. b_ir+b_hr / b_iz+b_hz are already folded into gi;
        # b_hn must stay inside r * (W_hn h + b_hn).
        gh_r = jnp.dot(h, whr, preferred_element_type=f32)
        gh_z = jnp.dot(h, whz, preferred_element_type=f32)
        gh_n = jnp.dot(h, whn, preferred_element_type=f32) + bhn
        r = jax.nn.sigmoid(gi_r + gh_r)
        z = jax.nn.sigmoid(gi_z + gh_z)
        n = jnp.tanh(gi_n + r * gh_n)
        return (1.0 - z) * n + z * h

    def step(s, carry):
        hf, hb = carry
        sb = T - 1 - s
        hf = gru_cell(hf, gi_scr[0, s], gi_scr[1, s], gi_scr[2, s],
                      whr_f, whz_f, whn_f, bhn_f)
        hb = gru_cell(hb, gi_scr[3, sb], gi_scr[4, sb], gi_scr[5, sb],
                      whr_b, whz_b, whn_b, bhn_b)
        of_scr[s] = hf
        ob_scr[sb] = hb
        return hf, hb

    h0 = jnp.zeros((B, H), f32)
    hf_fin, hb_fin = lax.fori_loop(0, T, step, (h0, h0), unroll=True)

    # Single lane-dense output slab, written once (no wrapper concat pass).
    out_ref[...] = jnp.concatenate([of_scr[...], ob_scr[...]], axis=-1)

    # Final fc + tanh: wfc is pre-split so no lane-offset concat is needed.
    hid_ref[...] = jnp.tanh(
        jnp.dot(hf_fin, wfc_f_ref[...], preferred_element_type=f32)
        + jnp.dot(hb_fin, wfc_b_ref[...], preferred_element_type=f32)
        + bfc_ref[...])


# ------------------------------ JAX wrapper -------------------------------- #
def encoder_forward(src, params):
    """src: (T, B) int32. Returns (outputs (T, B, 2H), hidden (B, D))."""
    x = jnp.take(params["embedding"], src, axis=0)  # (T, B, E) embedding gather
    # dropout: eval-mode identity.
    T, B, E = x.shape
    H = params["wh_f"].shape[0]
    D = params["wfc"].shape[1]

    # Combine both directions' input projections into one matmul operand and
    # fold the time-invariant recurrent biases for r/z into the input bias.
    wi_all = jnp.concatenate([params["wi_f"], params["wi_b"]], axis=1)   # (E, 6H)
    bi_f_eff = params["bi_f"].at[:, :2 * H].add(params["bh_f"][:, :2 * H])
    bi_b_eff = params["bi_b"].at[:, :2 * H].add(params["bh_b"][:, :2 * H])
    bi_all = jnp.concatenate([bi_f_eff, bi_b_eff], axis=1)               # (1, 6H)
    bhn_f = params["bh_f"][:, 2 * H:]   # (1, H) -- stays inside r * (.)
    bhn_b = params["bh_b"][:, 2 * H:]   # (1, H)
    wfc_f = params["wfc"][:H]           # (H, D)
    wfc_b = params["wfc"][H:]           # (H, D)

    vmem = pl.BlockSpec(memory_space=pltpu.MemorySpace.VMEM)
    kernel = functools.partial(_bigru_kernel, seq_len=T, batch=B, hid_dim=H)

    outputs, hidden = pl.pallas_call(
        kernel,
        out_shape=(
            jax.ShapeDtypeStruct((T, B, 2 * H), jnp.float32),
            jax.ShapeDtypeStruct((B, D), jnp.float32),
        ),
        in_specs=[vmem] * 10,
        out_specs=(vmem, vmem),
        scratch_shapes=[
            pltpu.VMEM((6, T, B, H), jnp.float32),  # hoisted per-gate input proj
            pltpu.VMEM((T, B, H), jnp.float32),     # forward-direction outputs
            pltpu.VMEM((T, B, H), jnp.float32),     # backward-direction outputs
        ],
    )(x, wi_all, bi_all,
      params["wh_f"], bhn_f, params["wh_b"], bhn_b,
      wfc_f, wfc_b, params["bfc"])

    return outputs, hidden


# --------------------------- pure-JAX reference ----------------------------- #
def encoder_reference(src, params):
    x = jnp.take(params["embedding"], src, axis=0)
    T, B, E = x.shape
    H = params["wh_f"].shape[0]

    def gru_step(x_t, h, wi, wh, bi, bh):
        gi = x_t @ wi + bi
        gh = h @ wh + bh
        r = jax.nn.sigmoid(gi[:, :H] + gh[:, :H])
        z = jax.nn.sigmoid(gi[:, H:2 * H] + gh[:, H:2 * H])
        n = jnp.tanh(gi[:, 2 * H:] + r * gh[:, 2 * H:])
        return (1.0 - z) * n + z * h

    def scan_dir(xs, wi, wh, bi, bh):
        def f(h, x_t):
            h_new = gru_step(x_t, h, wi, wh, bi, bh)
            return h_new, h_new
        return lax.scan(f, jnp.zeros((B, H), jnp.float32), xs)

    hf_final, out_f = scan_dir(x, params["wi_f"], params["wh_f"],
                               params["bi_f"], params["bh_f"])
    hb_final, out_b_rev = scan_dir(x[::-1], params["wi_b"], params["wh_b"],
                                   params["bi_b"], params["bh_b"])
    out_b = out_b_rev[::-1]
    outputs = jnp.concatenate([out_f, out_b], axis=-1)
    hidden = jnp.tanh(jnp.concatenate([hf_final, hb_final], axis=-1)
                      @ params["wfc"] + params["bfc"])
    return outputs, hidden


# ------------------------------ params / main ------------------------------- #
def make_params(key, input_dim, emb_dim, enc_hid_dim, dec_hid_dim):
    ks = jax.random.split(key, 12)
    n = lambda k, shape: (0.1 * jax.random.normal(k, shape)).astype(jnp.float32)
    H, E, D = enc_hid_dim, emb_dim, dec_hid_dim
    return {
        "embedding": n(ks[0], (input_dim, E)),
        # weights stored transposed: (in, 3H) so kernel computes x @ W
        "wi_f": n(ks[1], (E, 3 * H)), "wh_f": n(ks[2], (H, 3 * H)),
        "bi_f": n(ks[3], (1, 3 * H)), "bh_f": n(ks[4], (1, 3 * H)),
        "wi_b": n(ks[5], (E, 3 * H)), "wh_b": n(ks[6], (H, 3 * H)),
        "bi_b": n(ks[7], (1, 3 * H)), "bh_b": n(ks[8], (1, 3 * H)),
        "wfc": n(ks[9], (2 * H, D)), "bfc": n(ks[10], (1, D)),
    }


if __name__ == "__main__":
    INPUT_DIM, EMB_DIM, ENC_HID, DEC_HID = 20, 16, 32, 32
    T, B = 8, 4

    root = jax.random.PRNGKey(0)
    k_param, k_src = jax.random.split(root)
    params = make_params(k_param, INPUT_DIM, EMB_DIM, ENC_HID, DEC_HID)
    src = jax.random.randint(k_src, (T, B), 0, INPUT_DIM, dtype=jnp.int32)

    outputs, hidden = jax.block_until_ready(encoder_forward(src, params))
    ref_out, ref_hid = jax.block_until_ready(encoder_reference(src, params))

    assert outputs.shape == (T, B, 2 * ENC_HID) and hidden.shape == (B, DEC_HID)
    assert jnp.allclose(outputs, ref_out, atol=2e-2, rtol=2e-2)
    assert jnp.allclose(hidden, ref_hid, atol=2e-2, rtol=2e-2)

    print("KERNEL_OK")
</pallas_src>

<mosaic_0001>
module attributes {stable_mosaic.version = 11 : i64} {
  func.func @_bigru_kernel(%arg0: memref<8x4x16xf32, #tpu.memory_space<vmem>>, %arg1: memref<16x192xf32, #tpu.memory_space<vmem>>, %arg2: memref<1x192xf32, #tpu.memory_space<vmem>>, %arg3: memref<32x96xf32, #tpu.memory_space<vmem>>, %arg4: memref<1x32xf32, #tpu.memory_space<vmem>>, %arg5: memref<32x96xf32, #tpu.memory_space<vmem>>, %arg6: memref<1x32xf32, #tpu.memory_space<vmem>>, %arg7: memref<32x32xf32, #tpu.memory_space<vmem>>, %arg8: memref<32x32xf32, #tpu.memory_space<vmem>>, %arg9: memref<1x32xf32, #tpu.memory_space<vmem>>, %arg10: memref<8x4x64xf32, #tpu.memory_space<vmem>>, %arg11: memref<4x32xf32, #tpu.memory_space<vmem>>, %arg12: memref<6x8x4x32xf32, #tpu.memory_space<vmem>>, %arg13: memref<8x4x32xf32, #tpu.memory_space<vmem>>, %arg14: memref<8x4x32xf32, #tpu.memory_space<vmem>>) attributes {dimension_semantics = [], scalar_prefetch = 0 : i64, scratch_operands = 3 : i64, tpu.core_type = #tpu.core_type<tc>} {
    %c0 = arith.constant 0 : index
    %c0_0 = arith.constant 0 : index
    %c0_1 = arith.constant 0 : index
    %0 = vector.load %arg0[%c0, %c0_0, %c0_1] : memref<8x4x16xf32, #tpu.memory_space<vmem>>, vector<8x4x16xf32>
    %1 = vector.shape_cast %0 : vector<8x4x16xf32> to vector<32x16xf32>
    %c0_2 = arith.constant 0 : index
    %c0_3 = arith.constant 0 : index
    %2 = vector.load %arg1[%c0_2, %c0_3] : memref<16x192xf32, #tpu.memory_space<vmem>>, vector<16x192xf32>
    %cst = arith.constant dense<0.000000e+00> : vector<32x192xf32>
    %3 = tpu.matmul %1, %2, %cst {dimension_numbers = #tpu.dot_dimension_numbers<[1], [0], [0], [1], [0, 0, 1, 1], [], []>} : vector<32x16xf32>, vector<16x192xf32>, vector<32x192xf32> -> vector<32x192xf32>
    %c0_4 = arith.constant 0 : index
    %c0_5 = arith.constant 0 : index
    %4 = vector.load %arg2[%c0_4, %c0_5] : memref<1x192xf32, #tpu.memory_space<vmem>>, vector<1x192xf32>
    %5 = vector.broadcast %4 : vector<1x192xf32> to vector<32x192xf32>
    %6 = arith.addf %3, %5 : vector<32x192xf32>
    %7 = vector.extract_strided_slice %6 {offsets = [0, 0], sizes = [32, 32], strides = [1, 1]} : vector<32x192xf32> to vector<32x32xf32>
    %8 = vector.shape_cast %7 : vector<32x32xf32> to vector<8x4x32xf32>
    %c0_6 = arith.constant 0 : index
    %c0_7 = arith.constant 0 : index
    %c0_8 = arith.constant 0 : index
    %c0_9 = arith.constant 0 : index
    %9 = vector.load %arg12[%c0_6, %c0_7, %c0_8, %c0_9] : memref<6x8x4x32xf32, #tpu.memory_space<vmem>>, vector<1x8x4x32xf32>
    %10 = vector.shape_cast %9 : vector<1x8x4x32xf32> to vector<8x4x32xf32>
    %11 = vector.shape_cast %8 : vector<8x4x32xf32> to vector<1x8x4x32xf32>
    tpu.vector_store %arg12[%c0_6, %c0_7, %c0_8, %c0_9], %11 {strides = array<i32>} : memref<6x8x4x32xf32, #tpu.memory_space<vmem>>, vector<1x8x4x32xf32>,
    %12 = vector.extract_strided_slice %6 {offsets = [0, 32], sizes = [32, 32], strides = [1, 1]} : vector<32x192xf32> to vector<32x32xf32>
    %13 = vector.shape_cast %12 : vector<32x32xf32> to vector<8x4x32xf32>
    %c1 = arith.constant 1 : index
    %c0_10 = arith.constant 0 : index
    %c0_11 = arith.constant 0 : index
    %c0_12 = arith.constant 0 : index
    %14 = vector.load %arg12[%c1, %c0_10, %c0_11, %c0_12] : memref<6x8x4x32xf32, #tpu.memory_space<vmem>>, vector<1x8x4x32xf32>
    %15 = vector.shape_cast %14 : vector<1x8x4x32xf32> to vector<8x4x32xf32>
    %16 = vector.shape_cast %13 : vector<8x4x32xf32> to vector<1x8x4x32xf32>
    tpu.vector_store %arg12[%c1, %c0_10, %c0_11, %c0_12], %16 {strides = array<i32>} : memref<6x8x4x32xf32, #tpu.memory_space<vmem>>, vector<1x8x4x32xf32>,
    %17 = vector.extract_strided_slice %6 {offsets = [0, 64], sizes = [32, 32], strides = [1, 1]} : vector<32x192xf32> to vector<32x32xf32>
    %18 = vector.shape_cast %17 : vector<32x32xf32> to vector<8x4x32xf32>
    %c2 = arith.constant 2 : index
    %c0_13 = arith.constant 0 : index
    %c0_14 = arith.constant 0 : index
    %c0_15 = arith.constant 0 : index
    %19 = vector.load %arg12[%c2, %c0_13, %c0_14, %c0_15] : memref<6x8x4x32xf32, #tpu.memory_space<vmem>>, vector<1x8x4x32xf32>
    %20 = vector.shape_cast %19 : vector<1x8x4x32xf32> to vector<8x4x32xf32>
    %21 = vector.shape_cast %18 : vector<8x4x32xf32> to vector<1x8x4x32xf32>
    tpu.vector_store %arg12[%c2, %c0_13, %c0_14, %c0_15], %21 {strides = array<i32>} : memref<6x8x4x32xf32, #tpu.memory_space<vmem>>, vector<1x8x4x32xf32>,
    %22 = vector.extract_strided_slice %6 {offsets = [0, 96], sizes = [32, 32], strides = [1, 1]} : vector<32x192xf32> to vector<32x32xf32>
    %23 = vector.shape_cast %22 : vector<32x32xf32> to vector<8x4x32xf32>
    %c3 = arith.constant 3 : index
    %c0_16 = arith.constant 0 : index
    %c0_17 = arith.constant 0 : index
    %c0_18 = arith.constant 0 : index
    %24 = vector.load %arg12[%c3, %c0_16, %c0_17, %c0_18] : memref<6x8x4x32xf32, #tpu.memory_space<vmem>>, vector<1x8x4x32xf32>
    %25 = vector.shape_cast %24 : vector<1x8x4x32xf32> to vector<8x4x32xf32>
    %26 = vector.shape_cast %23 : vector<8x4x32xf32> to vector<1x8x4x32xf32>
    tpu.vector_store %arg12[%c3, %c0_16, %c0_17, %c0_18], %26 {strides = array<i32>} : memref<6x8x4x32xf32, #tpu.memory_space<vmem>>, vector<1x8x4x32xf32>,
    %27 = vector.extract_strided_slice %6 {offsets = [0, 128], sizes = [32, 32], strides = [1, 1]} : vector<32x192xf32> to vector<32x32xf32>
    %28 = vector.shape_cast %27 : vector<32x32xf32> to vector<8x4x32xf32>
    %c4 = arith.constant 4 : index
    %c0_19 = arith.constant 0 : index
    %c0_20 = arith.constant 0 : index
    %c0_21 = arith.constant 0 : index
    %29 = vector.load %arg12[%c4, %c0_19, %c0_20, %c0_21] : memref<6x8x4x32xf32, #tpu.memory_space<vmem>>, vector<1x8x4x32xf32>
    %30 = vector.shape_cast %29 : vector<1x8x4x32xf32> to vector<8x4x32xf32>
    %31 = vector.shape_cast %28 : vector<8x4x32xf32> to vector<1x8x4x32xf32>
    tpu.vector_store %arg12[%c4, %c0_19, %c0_20, %c0_21], %31 {strides = array<i32>} : memref<6x8x4x32xf32, #tpu.memory_space<vmem>>, vector<1x8x4x32xf32>,
    %32 = vector.extract_strided_slice %6 {offsets = [0, 160], sizes = [32, 32], strides = [1, 1]} : vector<32x192xf32> to vector<32x32xf32>
    %33 = vector.shape_cast %32 : vector<32x32xf32> to vector<8x4x32xf32>
    %c5 = arith.constant 5 : index
    %c0_22 = arith.constant 0 : index
    %c0_23 = arith.constant 0 : index
    %c0_24 = arith.constant 0 : index
    %34 = vector.load %arg12[%c5, %c0_22, %c0_23, %c0_24] : memref<6x8x4x32xf32, #tpu.memory_space<vmem>>, vector<1x8x4x32xf32>
    %35 = vector.shape_cast %34 : vector<1x8x4x32xf32> to vector<8x4x32xf32>
    %36 = vector.shape_cast %33 : vector<8x4x32xf32> to vector<1x8x4x32xf32>
    tpu.vector_store %arg12[%c5, %c0_22, %c0_23, %c0_24], %36 {strides = array<i32>} : memref<6x8x4x32xf32, #tpu.memory_space<vmem>>, vector<1x8x4x32xf32>,
    %c0_25 = arith.constant 0 : index
    %c0_26 = arith.constant 0 : index
    %37 = vector.load %arg3[%c0_25, %c0_26] : memref<32x96xf32, #tpu.memory_space<vmem>>, vector<32x96xf32>
    %c0_27 = arith.constant 0 : index
    %c0_28 = arith.constant 0 : index
    %38 = vector.load %arg5[%c0_27, %c0_28] : memref<32x96xf32, #tpu.memory_space<vmem>>, vector<32x96xf32>
    %39 = vector.extract_strided_slice %37 {offsets = [0, 0], sizes = [32, 32], strides = [1, 1]} : vector<32x96xf32> to vector<32x32xf32>
    %40 = vector.extract_strided_slice %37 {offsets = [0, 32], sizes = [32, 32], strides = [1, 1]} : vector<32x96xf32> to vector<32x32xf32>
    %41 = vector.extract_strided_slice %37 {offsets = [0, 64], sizes = [32, 32], strides = [1, 1]} : vector<32x96xf32> to vector<32x32xf32>
    %42 = vector.extract_strided_slice %38 {offsets = [0, 0], sizes = [32, 32], strides = [1, 1]} : vector<32x96xf32> to vector<32x32xf32>
    %43 = vector.extract_strided_slice %38 {offsets = [0, 32], sizes = [32, 32], strides = [1, 1]} : vector<32x96xf32> to vector<32x32xf32>
    %44 = vector.extract_strided_slice %38 {offsets = [0, 64], sizes = [32, 32], strides = [1, 1]} : vector<32x96xf32> to vector<32x32xf32>
    %c0_29 = arith.constant 0 : index
    %c0_30 = arith.constant 0 : index
    %45 = vector.load %arg4[%c0_29, %c0_30] : memref<1x32xf32, #tpu.memory_space<vmem>>, vector<1x32xf32>
    %c0_31 = arith.constant 0 : index
    %c0_32 = arith.constant 0 : index
    %46 = vector.load %arg6[%c0_31, %c0_32] : memref<1x32xf32, #tpu.memory_space<vmem>>, vector<1x32xf32>
    %cst_33 = arith.constant 0.000000e+00 : f32
    %47 = vector.broadcast %cst_33 : f32 to vector<4x32xf32>
    %c0_i32 = arith.constant 0 : i32
    %c7_i32 = arith.constant 7 : i32
    %48 = arith.subi %c7_i32, %c0_i32 : i32
    %c0_34 = arith.constant 0 : index
    %49 = arith.index_cast %c0_i32 : i32 to index
    %c0_35 = arith.constant 0 : index
    %c0_36 = arith.constant 0 : index
    %50 = vector.load %arg12[%c0_34, %49, %c0_35, %c0_36] : memref<6x8x4x32xf32, #tpu.memory_space<vmem>>, vector<1x1x4x32xf32>
    %51 = vector.shape_cast %50 : vector<1x1x4x32xf32> to vector<4x32xf32>
    %c1_37 = arith.constant 1 : index
    %52 = arith.index_cast %c0_i32 : i32 to index
    %c0_38 = arith.constant 0 : index
    %c0_39 = arith.constant 0 : index
    %53 = vector.load %arg12[%c1_37, %52, %c0_38, %c0_39] : memref<6x8x4x32xf32, #tpu.memory_space<vmem>>, vector<1x1x4x32xf32>
    %54 = vector.shape_cast %53 : vector<1x1x4x32xf32> to vector<4x32xf32>
    %c2_40 = arith.constant 2 : index
    %55 = arith.index_cast %c0_i32 : i32 to index
    %c0_41 = arith.constant 0 : index
    %c0_42 = arith.constant 0 : index
    %56 = vector.load %arg12[%c2_40, %55, %c0_41, %c0_42] : memref<6x8x4x32xf32, #tpu.memory_space<vmem>>, vector<1x1x4x32xf32>
    %57 = vector.shape_cast %56 : vector<1x1x4x32xf32> to vector<4x32xf32>
    %cst_43 = arith.constant dense<0.000000e+00> : vector<4x32xf32>
    %58 = tpu.matmul %47, %39, %cst_43 {dimension_numbers = #tpu.dot_dimension_numbers<[1], [0], [0], [1], [0, 0, 1, 1], [], []>} : vector<4x32xf32>, vector<32x32xf32>, vector<4x32xf32> -> vector<4x32xf32>
    %cst_44 = arith.constant dense<0.000000e+00> : vector<4x32xf32>
    %59 = tpu.matmul %47, %40, %cst_44 {dimension_numbers = #tpu.dot_dimension_numbers<[1], [0], [0], [1], [0, 0, 1, 1], [], []>} : vector<4x32xf32>, vector<32x32xf32>, vector<4x32xf32> -> vector<4x32xf32>
    %cst_45 = arith.constant dense<0.000000e+00> : vector<4x32xf32>
    %60 = tpu.matmul %47, %41, %cst_45 {dimension_numbers = #tpu.dot_dimension_numbers<[1], [0], [0], [1], [0, 0, 1, 1], [], []>} : vector<4x32xf32>, vector<32x32xf32>, vector<4x32xf32> -> vector<4x32xf32>
    %61 = vector.broadcast %45 : vector<1x32xf32> to vector<4x32xf32>
    %62 = arith.addf %60, %61 : vector<4x32xf32>
    %63 = arith.addf %51, %58 : vector<4x32xf32>
    %64 = arith.negf %63 : vector<4x32xf32>
    %65 = math.exp %64 : vector<4x32xf32>
    %cst_46 = arith.constant 1.000000e+00 : f32
    %66 = vector.broadcast %cst_46 : f32 to vector<4x32xf32>
    %67 = arith.addf %66, %65 : vector<4x32xf32>
    %68 = arith.divf %66, %67 : vector<4x32xf32>
    %69 = arith.addf %54, %59 : vector<4x32xf32>
    %70 = arith.negf %69 : vector<4x32xf32>
    %71 = math.exp %70 : vector<4x32xf32>
    %cst_47 = arith.constant 1.000000e+00 : f32
    %72 = vector.broadcast %cst_47 : f32 to vector<4x32xf32>
    %73 = arith.addf %72, %71 : vector<4x32xf32>
    %74 = arith.divf %72, %73 : vector<4x32xf32>
    %75 = arith.mulf %68, %62 : vector<4x32xf32>
    %76 = arith.addf %57, %75 : vector<4x32xf32>
    %77 = math.tanh %76 : vector<4x32xf32>
    %cst_48 = arith.constant 1.000000e+00 : f32
    %78 = vector.broadcast %cst_48 : f32 to vector<4x32xf32>
    %79 = arith.subf %78, %74 : vector<4x32xf32>
    %80 = arith.mulf %79, %77 : vector<4x32xf32>
    %81 = arith.mulf %74, %47 : vector<4x32xf32>
    %82 = arith.addf %80, %81 : vector<4x32xf32>
    %c3_49 = arith.constant 3 : index
    %83 = arith.index_cast %48 : i32 to index
    %c0_50 = arith.constant 0 : index
    %c0_51 = arith.constant 0 : index
    %84 = vector.load %arg12[%c3_49, %83, %c0_50, %c0_51] : memref<6x8x4x32xf32, #tpu.memory_space<vmem>>, vector<1x1x4x32xf32>
    %85 = vector.shape_cast %84 : vector<1x1x4x32xf32> to vector<4x32xf32>
    %c4_52 = arith.constant 4 : index
    %86 = arith.index_cast %48 : i32 to index
    %c0_53 = arith.constant 0 : index
    %c0_54 = arith.constant 0 : index
    %87 = vector.load %arg12[%c4_52, %86, %c0_53, %c0_54] : memref<6x8x4x32xf32, #tpu.memory_space<vmem>>, vector<1x1x4x32xf32>
    %88 = vector.shape_cast %87 : vector<1x1x4x32xf32> to vector<4x32xf32>
    %c5_55 = arith.constant 5 : index
    %89 = arith.index_cast %48 : i32 to index
    %c0_56 = arith.constant 0 : index
    %c0_57 = arith.constant 0 : index
    %90 = vector.load %arg12[%c5_55, %89, %c0_56, %c0_57] : memref<6x8x4x32xf32, #tpu.memory_space<vmem>>, vector<1x1x4x32xf32>
    %91 = vector.shape_cast %90 : vector<1x1x4x32xf32> to vector<4x32xf32>
    %cst_58 = arith.constant dense<0.000000e+00> : vector<4x32xf32>
    %92 = tpu.matmul %47, %42, %cst_58 {dimension_numbers = #tpu.dot_dimension_numbers<[1], [0], [0], [1], [0, 0, 1, 1], [], []>} : vector<4x32xf32>, vector<32x32xf32>, vector<4x32xf32> -> vector<4x32xf32>
    %cst_59 = arith.constant dense<0.000000e+00> : vector<4x32xf32>
    %93 = tpu.matmul %47, %43, %cst_59 {dimension_numbers = #tpu.dot_dimension_numbers<[1], [0], [0], [1], [0, 0, 1, 1], [], []>} : vector<4x32xf32>, vector<32x32xf32>, vector<4x32xf32> -> vector<4x32xf32>
    %cst_60 = arith.constant dense<0.000000e+00> : vector<4x32xf32>
    %94 = tpu.matmul %47, %44, %cst_60 {dimension_numbers = #tpu.dot_dimension_numbers<[1], [0], [0], [1], [0, 0, 1, 1], [], []>} : vector<4x32xf32>, vector<32x32xf32>, vector<4x32xf32> -> vector<4x32xf32>
    %95 = vector.broadcast %46 : vector<1x32xf32> to vector<4x32xf32>
    %96 = arith.addf %94, %95 : vector<4x32xf32>
    %97 = arith.addf %85, %92 : vector<4x32xf32>
    %98 = arith.negf %97 : vector<4x32xf32>
    %99 = math.exp %98 : vector<4x32xf32>
    %cst_61 = arith.constant 1.000000e+00 : f32
    %100 = vector.broadcast %cst_61 : f32 to vector<4x32xf32>
    %101 = arith.addf %100, %99 : vector<4x32xf32>
    %102 = arith.divf %100, %101 : vector<4x32xf32>
    %103 = arith.addf %88, %93 : vector<4x32xf32>
    %104 = arith.negf %103 : vector<4x32xf32>
    %105 = math.exp %104 : vector<4x32xf32>
    %cst_62 = arith.constant 1.000000e+00 : f32
    %106 = vector.broadcast %cst_62 : f32 to vector<4x32xf32>
    %107 = arith.addf %106, %105 : vector<4x32xf32>
    %108 = arith.divf %106, %107 : vector<4x32xf32>
    %109 = arith.mulf %102, %96 : vector<4x32xf32>
    %110 = arith.addf %91, %109 : vector<4x32xf32>
    %111 = math.tanh %110 : vector<4x32xf32>
    %cst_63 = arith.constant 1.000000e+00 : f32
    %112 = vector.broadcast %cst_63 : f32 to vector<4x32xf32>
    %113 = arith.subf %112, %108 : vector<4x32xf32>
    %114 = arith.mulf %113, %111 : vector<4x32xf32>
    %115 = arith.mulf %108, %47 : vector<4x32xf32>
    %116 = arith.addf %114, %115 : vector<4x32xf32>
    %117 = arith.index_cast %c0_i32 : i32 to index
    %c0_64 = arith.constant 0 : index
    %c0_65 = arith.constant 0 : index
    %118 = vector.load %arg13[%117, %c0_64, %c0_65] : memref<8x4x32xf32, #tpu.memory_space<vmem>>, vector<1x4x32xf32>
    %119 = vector.shape_cast %118 : vector<1x4x32xf32> to vector<4x32xf32>
    %120 = vector.shape_cast %82 : vector<4x32xf32> to vector<1x4x32xf32>
    tpu.vector_store %arg13[%117, %c0_64, %c0_65], %120 {strides = array<i32>} : memref<8x4x32xf32, #tpu.memory_space<vmem>>, vector<1x4x32xf32>,
    %121 = arith.index_cast %48 : i32 to index
    %c0_66 = arith.constant 0 : index
    %c0_67 = arith.constant 0 : index
    %122 = vector.load %arg14[%121, %c0_66, %c0_67] : memref<8x4x32xf32, #tpu.memory_space<vmem>>, vector<1x4x32xf32>
    %123 = vector.shape_cast %122 : vector<1x4x32xf32> to vector<4x32xf32>
    %124 = vector.shape_cast %116 : vector<4x32xf32> to vector<1x4x32xf32>
    tpu.vector_store %arg14[%121, %c0_66, %c0_67], %124 {strides = array<i32>} : memref<8x4x32xf32, #tpu.memory_space<vmem>>, vector<1x4x32xf32>,
    %c1_i32 = arith.constant 1 : i32
    %c7_i32_68 = arith.constant 7 : i32
    %125 = arith.subi %c7_i32_68, %c1_i32 : i32
    %c0_69 = arith.constant 0 : index
    %126 = arith.index_cast %c1_i32 : i32 to index
    %c0_70 = arith.constant 0 : index
    %c0_71 = arith.constant 0 : index
    %127 = vector.load %arg12[%c0_69, %126, %c0_70, %c0_71] : memref<6x8x4x32xf32, #tpu.memory_space<vmem>>, vector<1x1x4x32xf32>
    %128 = vector.shape_cast %127 : vector<1x1x4x32xf32> to vector<4x32xf32>
    %c1_72 = arith.constant 1 : index
    %129 = arith.index_cast %c1_i32 : i32 to index
    %c0_73 = arith.constant 0 : index
    %c0_74 = arith.constant 0 : index
    %130 = vector.load %arg12[%c1_72, %129, %c0_73, %c0_74] : memref<6x8x4x32xf32, #tpu.memory_space<vmem>>, vector<1x1x4x32xf32>
    %131 = vector.shape_cast %130 : vector<1x1x4x32xf32> to vector<4x32xf32>
    %c2_75 = arith.constant 2 : index
    %132 = arith.index_cast %c1_i32 : i32 to index
    %c0_76 = arith.constant 0 : index
    %c0_77 = arith.constant 0 : index
    %133 = vector.load %arg12[%c2_75, %132, %c0_76, %c0_77] : memref<6x8x4x32xf32, #tpu.memory_space<vmem>>, vector<1x1x4x32xf32>
    %134 = vector.shape_cast %133 : vector<1x1x4x32xf32> to vector<4x32xf32>
    %cst_78 = arith.constant dense<0.000000e+00> : vector<4x32xf32>
    %135 = tpu.matmul %82, %39, %cst_78 {dimension_numbers = #tpu.dot_dimension_numbers<[1], [0], [0], [1], [0, 0, 1, 1], [], []>} : vector<4x32xf32>, vector<32x32xf32>, vector<4x32xf32> -> vector<4x32xf32>
    %cst_79 = arith.constant dense<0.000000e+00> : vector<4x32xf32>
    %136 = tpu.matmul %82, %40, %cst_79 {dimension_numbers = #tpu.dot_dimension_numbers<[1], [0], [0], [1], [0, 0, 1, 1], [], []>} : vector<4x32xf32>, vector<32x32xf32>, vector<4x32xf32> -> vector<4x32xf32>
    %cst_80 = arith.constant dense<0.000000e+00> : vector<4x32xf32>
    %137 = tpu.matmul %82, %41, %cst_80 {dimension_numbers = #tpu.dot_dimension_numbers<[1], [0], [0], [1], [0, 0, 1, 1], [], []>} : vector<4x32xf32>, vector<32x32xf32>, vector<4x32xf32> -> vector<4x32xf32>
    %138 = vector.broadcast %45 : vector<1x32xf32> to vector<4x32xf32>
    %139 = arith.addf %137, %138 : vector<4x32xf32>
    %140 = arith.addf %128, %135 : vector<4x32xf32>
    %141 = arith.negf %140 : vector<4x32xf32>
    %142 = math.exp %141 : vector<4x32xf32>
    %cst_81 = arith.constant 1.000000e+00 : f32
    %143 = vector.broadcast %cst_81 : f32 to vector<4x32xf32>
    %144 = arith.addf %143, %142 : vector<4x32xf32>
    %145 = arith.divf %143, %144 : vector<4x32xf32>
    %146 = arith.addf %131, %136 : vector<4x32xf32>
    %147 = arith.negf %146 : vector<4x32xf32>
    %148 = math.exp %147 : vector<4x32xf32>
    %cst_82 = arith.constant 1.000000e+00 : f32
    %149 = vector.broadcast %cst_82 : f32 to vector<4x32xf32>
    %150 = arith.addf %149, %148 : vector<4x32xf32>
    %151 = arith.divf %149, %150 : vector<4x32xf32>
    %152 = arith.mulf %145, %139 : vector<4x32xf32>
    %153 = arith.addf %134, %152 : vector<4x32xf32>
    %154 = math.tanh %153 : vector<4x32xf32>
    %cst_83 = arith.constant 1.000000e+00 : f32
    %155 = vector.broadcast %cst_83 : f32 to vector<4x32xf32>
    %156 = arith.subf %155, %151 : vector<4x32xf32>
    %157 = arith.mulf %156, %154 : vector<4x32xf32>
    %158 = arith.mulf %151, %82 : vector<4x32xf32>
    %159 = arith.addf %157, %158 : vector<4x32xf32>
    %c3_84 = arith.constant 3 : index
    %160 = arith.index_cast %125 : i32 to index
    %c0_85 = arith.constant 0 : index
    %c0_86 = arith.constant 0 : index
    %161 = vector.load %arg12[%c3_84, %160, %c0_85, %c0_86] : memref<6x8x4x32xf32, #tpu.memory_space<vmem>>, vector<1x1x4x32xf32>
    %162 = vector.shape_cast %161 : vector<1x1x4x32xf32> to vector<4x32xf32>
    %c4_87 = arith.constant 4 : index
    %163 = arith.index_cast %125 : i32 to index
    %c0_88 = arith.constant 0 : index
    %c0_89 = arith.constant 0 : index
    %164 = vector.load %arg12[%c4_87, %163, %c0_88, %c0_89] : memref<6x8x4x32xf32, #tpu.memory_space<vmem>>, vector<1x1x4x32xf32>
    %165 = vector.shape_cast %164 : vector<1x1x4x32xf32> to vector<4x32xf32>
    %c5_90 = arith.constant 5 : index
    %166 = arith.index_cast %125 : i32 to index
    %c0_91 = arith.constant 0 : index
    %c0_92 = arith.constant 0 : index
    %167 = vector.load %arg12[%c5_90, %166, %c0_91, %c0_92] : memref<6x8x4x32xf32, #tpu.memory_space<vmem>>, vector<1x1x4x32xf32>
    %168 = vector.shape_cast %167 : vector<1x1x4x32xf32> to vector<4x32xf32>
    %cst_93 = arith.constant dense<0.000000e+00> : vector<4x32xf32>
    %169 = tpu.matmul %116, %42, %cst_93 {dimension_numbers = #tpu.dot_dimension_numbers<[1], [0], [0], [1], [0, 0, 1, 1], [], []>} : vector<4x32xf32>, vector<32x32xf32>, vector<4x32xf32> -> vector<4x32xf32>
    %cst_94 = arith.constant dense<0.000000e+00> : vector<4x32xf32>
    %170 = tpu.matmul %116, %43, %cst_94 {dimension_numbers = #tpu.dot_dimension_numbers<[1], [0], [0], [1], [0, 0, 1, 1], [], []>} : vector<4x32xf32>, vector<32x32xf32>, vector<4x32xf32> -> vector<4x32xf32>
    %cst_95 = arith.constant dense<0.000000e+00> : vector<4x32xf32>
    %171 = tpu.matmul %116, %44, %cst_95 {dimension_numbers = #tpu.dot_dimension_numbers<[1], [0], [0], [1], [0, 0, 1, 1], [], []>} : vector<4x32xf32>, vector<32x32xf32>, vector<4x32xf32> -> vector<4x32xf32>
    %172 = vector.broadcast %46 : vector<1x32xf32> to vector<4x32xf32>
    %173 = arith.addf %171, %172 : vector<4x32xf32>
    %174 = arith.addf %162, %169 : vector<4x32xf32>
    %175 = arith.negf %174 : vector<4x32xf32>
    %176 = math.exp %175 : vector<4x32xf32>
    %cst_96 = arith.constant 1.000000e+00 : f32
    %177 = vector.broadcast %cst_96 : f32 to vector<4x32xf32>
    %178 = arith.addf %177, %176 : vector<4x32xf32>
    %179 = arith.divf %177, %178 : vector<4x32xf32>
    %180 = arith.addf %165, %170 : vector<4x32xf32>
    %181 = arith.negf %180 : vector<4x32xf32>
    %182 = math.exp %181 : vector<4x32xf32>
    %cst_97 = arith.constant 1.000000e+00 : f32
    %183 = vector.broadcast %cst_97 : f32 to vector<4x32xf32>
    %184 = arith.addf %183, %182 : vector<4x32xf32>
    %185 = arith.divf %183, %184 : vector<4x32xf32>
    %186 = arith.mulf %179, %173 : vector<4x32xf32>
    %187 = arith.addf %168, %186 : vector<4x32xf32>
    %188 = math.tanh %187 : vector<4x32xf32>
    %cst_98 = arith.constant 1.000000e+00 : f32
    %189 = vector.broadcast %cst_98 : f32 to vector<4x32xf32>
    %190 = arith.subf %189, %185 : vector<4x32xf32>
    %191 = arith.mulf %190, %188 : vector<4x32xf32>
    %192 = arith.mulf %185, %116 : vector<4x32xf32>
    %193 = arith.addf %191, %192 : vector<4x32xf32>
    %194 = arith.index_cast %c1_i32 : i32 to index
    %c0_99 = arith.constant 0 : index
    %c0_100 = arith.constant 0 : index
    %195 = vector.load %arg13[%194, %c0_99, %c0_100] : memref<8x4x32xf32, #tpu.memory_space<vmem>>, vector<1x4x32xf32>
    %196 = vector.shape_cast %195 : vector<1x4x32xf32> to vector<4x32xf32>
    %197 = vector.shape_cast %159 : vector<4x32xf32> to vector<1x4x32xf32>
    tpu.vector_store %arg13[%194, %c0_99, %c0_100], %197 {strides = array<i32>} : memref<8x4x32xf32, #tpu.memory_space<vmem>>, vector<1x4x32xf32>,
    %198 = arith.index_cast %125 : i32 to index
    %c0_101 = arith.constant 0 : index
    %c0_102 = arith.constant 0 : index
    %199 = vector.load %arg14[%198, %c0_101, %c0_102] : memref<8x4x32xf32, #tpu.memory_space<vmem>>, vector<1x4x32xf32>
    %200 = vector.shape_cast %199 : vector<1x4x32xf32> to vector<4x32xf32>
    %201 = vector.shape_cast %193 : vector<4x32xf32> to vector<1x4x32xf32>
    tpu.vector_store %arg14[%198, %c0_101, %c0_102], %201 {strides = array<i32>} : memref<8x4x32xf32, #tpu.memory_space<vmem>>, vector<1x4x32xf32>,
    %c2_i32 = arith.constant 2 : i32
    %c7_i32_103 = arith.constant 7 : i32
    %202 = arith.subi %c7_i32_103, %c2_i32 : i32
    %c0_104 = arith.constant 0 : index
    %203 = arith.index_cast %c2_i32 : i32 to index
    %c0_105 = arith.constant 0 : index
    %c0_106 = arith.constant 0 : index
    %204 = vector.load %arg12[%c0_104, %203, %c0_105, %c0_106] : memref<6x8x4x32xf32, #tpu.memory_space<vmem>>, vector<1x1x4x32xf32>
    %205 = vector.shape_cast %204 : vector<1x1x4x32xf32> to vector<4x32xf32>
    %c1_107 = arith.constant 1 : index
    %206 = arith.index_cast %c2_i32 : i32 to index
    %c0_108 = arith.constant 0 : index
    %c0_109 = arith.constant 0 : index
    %207 = vector.load %arg12[%c1_107, %206, %c0_108, %c0_109] : memref<6x8x4x32xf32, #tpu.memory_space<vmem>>, vector<1x1x4x32xf32>
    %208 = vector.shape_cast %207 : vector<1x1x4x32xf32> to vector<4x32xf32>
    %c2_110 = arith.constant 2 : index
    %209 = arith.index_cast %c2_i32 : i32 to index
    %c0_111 = arith.constant 0 : index
    %c0_112 = arith.constant 0 : index
    %210 = vector.load %arg12[%c2_110, %209, %c0_111, %c0_112] : memref<6x8x4x32xf32, #tpu.memory_space<vmem>>, vector<1x1x4x32xf32>
    %211 = vector.shape_cast %210 : vector<1x1x4x32xf32> to vector<4x32xf32>
    %cst_113 = arith.constant dense<0.000000e+00> : vector<4x32xf32>
    %212 = tpu.matmul %159, %39, %cst_113 {dimension_numbers = #tpu.dot_dimension_numbers<[1], [0], [0], [1], [0, 0, 1, 1], [], []>} : vector<4x32xf32>, vector<32x32xf32>, vector<4x32xf32> -> vector<4x32xf32>
    %cst_114 = arith.constant dense<0.000000e+00> : vector<4x32xf32>
    %213 = tpu.matmul %159, %40, %cst_114 {dimension_numbers = #tpu.dot_dimension_numbers<[1], [0], [0], [1], [0, 0, 1, 1], [], []>} : vector<4x32xf32>, vector<32x32xf32>, vector<4x32xf32> -> vector<4x32xf32>
    %cst_115 = arith.constant dense<0.000000e+00> : vector<4x32xf32>
    %214 = tpu.matmul %159, %41, %cst_115 {dimension_numbers = #tpu.dot_dimension_numbers<[1], [0], [0], [1], [0, 0, 1, 1], [], []>} : vector<4x32xf32>, vector<32x32xf32>, vector<4x32xf32> -> vector<4x32xf32>
    %215 = vector.broadcast %45 : vector<1x32xf32> to vector<4x32xf32>
    %216 = arith.addf %214, %215 : vector<4x32xf32>
    %217 = arith.addf %205, %212 : vector<4x32xf32>
    %218 = arith.negf %217 : vector<4x32xf32>
    %219 = math.exp %218 : vector<4x32xf32>
    %cst_116 = arith.constant 1.000000e+00 : f32
    %220 = vector.broadcast %cst_116 : f32 to vector<4x32xf32>
    %221 = arith.addf %220, %219 : vector<4x32xf32>
    %222 = arith.divf %220, %221 : vector<4x32xf32>
    %223 = arith.addf %208, %213 : vector<4x32xf32>
    %224 = arith.negf %223 : vector<4x32xf32>
    %225 = math.exp %224 : vector<4x32xf32>
    %cst_117 = arith.constant 1.000000e+00 : f32
    %226 = vector.broadcast %cst_117 : f32 to vector<4x32xf32>
    %227 = arith.addf %226, %225 : vector<4x32xf32>
    %228 = arith.divf %226, %227 : vector<4x32xf32>
    %229 = arith.mulf %222, %216 : vector<4x32xf32>
    %230 = arith.addf %211, %229 : vector<4x32xf32>
    %231 = math.tanh %230 : vector<4x32xf32>
    %cst_118 = arith.constant 1.000000e+00 : f32
    %232 = vector.broadcast %cst_118 : f32 to vector<4x32xf32>
    %233 = arith.subf %232, %228 : vector<4x32xf32>
    %234 = arith.mulf %233, %231 : vector<4x32xf32>
    %235 = arith.mulf %228, %159 : vector<4x32xf32>
    %236 = arith.addf %234, %235 : vector<4x32xf32>
    %c3_119 = arith.constant 3 : index
    %237 = arith.index_cast %202 : i32 to index
    %c0_120 = arith.constant 0 : index
    %c0_121 = arith.constant 0 : index
    %238 = vector.load %arg12[%c3_119, %237, %c0_120, %c0_121] : memref<6x8x4x32xf32, #tpu.memory_space<vmem>>, vector<1x1x4x32xf32>
    %239 = vector.shape_cast %238 : vector<1x1x4x32xf32> to vector<4x32xf32>
    %c4_122 = arith.constant 4 : index
    %240 = arith.index_cast %202 : i32 to index
    %c0_123 = arith.constant 0 : index
    %c0_124 = arith.constant 0 : index
    %241 = vector.load %arg12[%c4_122, %240, %c0_123, %c0_124] : memref<6x8x4x32xf32, #tpu.memory_space<vmem>>, vector<1x1x4x32xf32>
    %242 = vector.shape_cast %241 : vector<1x1x4x32xf32> to vector<4x32xf32>
    %c5_125 = arith.constant 5 : index
    %243 = arith.index_cast %202 : i32 to index
    %c0_126 = arith.constant 0 : index
    %c0_127 = arith.constant 0 : index
    %244 = vector.load %arg12[%c5_125, %243, %c0_126, %c0_127] : memref<6x8x4x32xf32, #tpu.memory_space<vmem>>, vector<1x1x4x32xf32>
    %245 = vector.shape_cast %244 : vector<1x1x4x32xf32> to vector<4x32xf32>
    %cst_128 = arith.constant dense<0.000000e+00> : vector<4x32xf32>
    %246 = tpu.matmul %193, %42, %cst_128 {dimension_numbers = #tpu.dot_dimension_numbers<[1], [0], [0], [1], [0, 0, 1, 1], [], []>} : vector<4x32xf32>, vector<32x32xf32>, vector<4x32xf32> -> vector<4x32xf32>
    %cst_129 = arith.constant dense<0.000000e+00> : vector<4x32xf32>
    %247 = tpu.matmul %193, %43, %cst_129 {dimension_numbers = #tpu.dot_dimension_numbers<[1], [0], [0], [1], [0, 0, 1, 1], [], []>} : vector<4x32xf32>, vector<32x32xf32>, vector<4x32xf32> -> vector<4x32xf32>
    %cst_130 = arith.constant dense<0.000000e+00> : vector<4x32xf32>
    %248 = tpu.matmul %193, %44, %cst_130 {dimension_numbers = #tpu.dot_dimension_numbers<[1], [0], [0], [1], [0, 0, 1, 1], [], []>} : vector<4x32xf32>, vector<32x32xf32>, vector<4x32xf32> -> vector<4x32xf32>
    %249 = vector.broadcast %46 : vector<1x32xf32> to vector<4x32xf32>
    %250 = arith.addf %248, %249 : vector<4x32xf32>
    %251 = arith.addf %239, %246 : vector<4x32xf32>
    %252 = arith.negf %251 : vector<4x32xf32>
    %253 = math.exp %252 : vector<4x32xf32>
    %cst_131 = arith.constant 1.000000e+00 : f32
    %254 = vector.broadcast %cst_131 : f32 to vector<4x32xf32>
    %255 = arith.addf %254, %253 : vector<4x32xf32>
    %256 = arith.divf %254, %255 : vector<4x32xf32>
    %257 = arith.addf %242, %247 : vector<4x32xf32>
    %258 = arith.negf %257 : vector<4x32xf32>
    %259 = math.exp %258 : vector<4x32xf32>
    %cst_132 = arith.constant 1.000000e+00 : f32
    %260 = vector.broadcast %cst_132 : f32 to vector<4x32xf32>
    %261 = arith.addf %260, %259 : vector<4x32xf32>
    %262 = arith.divf %260, %261 : vector<4x32xf32>
    %263 = arith.mulf %256, %250 : vector<4x32xf32>
    %264 = arith.addf %245, %263 : vector<4x32xf32>
    %265 = math.tanh %264 : vector<4x32xf32>
    %cst_133 = arith.constant 1.000000e+00 : f32
    %266 = vector.broadcast %cst_133 : f32 to vector<4x32xf32>
    %267 = arith.subf %266, %262 : vector<4x32xf32>
    %268 = arith.mulf %267, %265 : vector<4x32xf32>
    %269 = arith.mulf %262, %193 : vector<4x32xf32>
    %270 = arith.addf %268, %269 : vector<4x32xf32>
    %271 = arith.index_cast %c2_i32 : i32 to index
    %c0_134 = arith.constant 0 : index
    %c0_135 = arith.constant 0 : index
    %272 = vector.load %arg13[%271, %c0_134, %c0_135] : memref<8x4x32xf32, #tpu.memory_space<vmem>>, vector<1x4x32xf32>
    %273 = vector.shape_cast %272 : vector<1x4x32xf32> to vector<4x32xf32>
    %274 = vector.shape_cast %236 : vector<4x32xf32> to vector<1x4x32xf32>
    tpu.vector_store %arg13[%271, %c0_134, %c0_135], %274 {strides = array<i32>} : memref<8x4x32xf32, #tpu.memory_space<vmem>>, vector<1x4x32xf32>,
    %275 = arith.index_cast %202 : i32 to index
    %c0_136 = arith.constant 0 : index
    %c0_137 = arith.constant 0 : index
    %276 = vector.load %arg14[%275, %c0_136, %c0_137] : memref<8x4x32xf32, #tpu.memory_space<vmem>>, vector<1x4x32xf32>
    %277 = vector.shape_cast %276 : vector<1x4x32xf32> to vector<4x32xf32>
    %278 = vector.shape_cast %270 : vector<4x32xf32> to vector<1x4x32xf32>
    tpu.vector_store %arg14[%275, %c0_136, %c0_137], %278 {strides = array<i32>} : memref<8x4x32xf32, #tpu.memory_space<vmem>>, vector<1x4x32xf32>,
    %c3_i32 = arith.constant 3 : i32
    %c7_i32_138 = arith.constant 7 : i32
    %279 = arith.subi %c7_i32_138, %c3_i32 : i32
    %c0_139 = arith.constant 0 : index
    %280 = arith.index_cast %c3_i32 : i32 to index
    %c0_140 = arith.constant 0 : index
    %c0_141 = arith.constant 0 : index
    %281 = vector.load %arg12[%c0_139, %280, %c0_140, %c0_141] : memref<6x8x4x32xf32, #tpu.memory_space<vmem>>, vector<1x1x4x32xf32>
    %282 = vector.shape_cast %281 : vector<1x1x4x32xf32> to vector<4x32xf32>
    %c1_142 = arith.constant 1 : index
    %283 = arith.index_cast %c3_i32 : i32 to index
    %c0_143 = arith.constant 0 : index
    %c0_144 = arith.constant 0 : index
    %284 = vector.load %arg12[%c1_142, %283, %c0_143, %c0_144] : memref<6x8x4x32xf32, #tpu.memory_space<vmem>>, vector<1x1x4x32xf32>
    %285 = vector.shape_cast %284 : vector<1x1x4x32xf32> to vector<4x32xf32>
    %c2_145 = arith.constant 2 : index
    %286 = arith.index_cast %c3_i32 : i32 to index
    %c0_146 = arith.constant 0 : index
    %c0_147 = arith.constant 0 : index
    %287 = vector.load %arg12[%c2_145, %286, %c0_146, %c0_147] : memref<6x8x4x32xf32, #tpu.memory_space<vmem>>, vector<1x1x4x32xf32>
    %288 = vector.shape_cast %287 : vector<1x1x4x32xf32> to vector<4x32xf32>
    %cst_148 = arith.constant dense<0.000000e+00> : vector<4x32xf32>
    %289 = tpu.matmul %236, %39, %cst_148 {dimension_numbers = #tpu.dot_dimension_numbers<[1], [0], [0], [1], [0, 0, 1, 1], [], []>} : vector<4x32xf32>, vector<32x32xf32>, vector<4x32xf32> -> vector<4x32xf32>
    %cst_149 = arith.constant dense<0.000000e+00> : vector<4x32xf32>
    %290 = tpu.matmul %236, %40, %cst_149 {dimension_numbers = #tpu.dot_dimension_numbers<[1], [0], [0], [1], [0, 0, 1, 1], [], []>} : vector<4x32xf32>, vector<32x32xf32>, vector<4x32xf32> -> vector<4x32xf32>
    %cst_150 = arith.constant dense<0.000000e+00> : vector<4x32xf32>
    %291 = tpu.matmul %236, %41, %cst_150 {dimension_numbers = #tpu.dot_dimension_numbers<[1], [0], [0], [1], [0, 0, 1, 1], [], []>} : vector<4x32xf32>, vector<32x32xf32>, vector<4x32xf32> -> vector<4x32xf32>
    %292 = vector.broadcast %45 : vector<1x32xf32> to vector<4x32xf32>
    %293 = arith.addf %291, %292 : vector<4x32xf32>
    %294 = arith.addf %282, %289 : vector<4x32xf32>
    %295 = arith.negf %294 : vector<4x32xf32>
    %296 = math.exp %295 : vector<4x32xf32>
    %cst_151 = arith.constant 1.000000e+00 : f32
    %297 = vector.broadcast %cst_151 : f32 to vector<4x32xf32>
    %298 = arith.addf %297, %296 : vector<4x32xf32>
    %299 = arith.divf %297, %298 : vector<4x32xf32>
    %300 = arith.addf %285, %290 : vector<4x32xf32>
    %301 = arith.negf %300 : vector<4x32xf32>
    %302 = math.exp %301 : vector<4x32xf32>
    %cst_152 = arith.constant 1.000000e+00 : f32
    %303 = vector.broadcast %cst_152 : f32 to vector<4x32xf32>
    %304 = arith.addf %303, %302 : vector<4x32xf32>
    %305 = arith.divf %303, %304 : vector<4x32xf32>
    %306 = arith.mulf %299, %293 : vector<4x32xf32>
    %307 = arith.addf %288, %306 : vector<4x32xf32>
    %308 = math.tanh %307 : vector<4x32xf32>
    %cst_153 = arith.constant 1.000000e+00 : f32
    %309 = vector.broadcast %cst_153 : f32 to vector<4x32xf32>
    %310 = arith.subf %309, %305 : vector<4x32xf32>
    %311 = arith.mulf %310, %308 : vector<4x32xf32>
    %312 = arith.mulf %305, %236 : vector<4x32xf32>
    %313 = arith.addf %311, %312 : vector<4x32xf32>
    %c3_154 = arith.constant 3 : index
    %314 = arith.index_cast %279 : i32 to index
    %c0_155 = arith.constant 0 : index
    %c0_156 = arith.constant 0 : index
    %315 = vector.load %arg12[%c3_154, %314, %c0_155, %c0_156] : memref<6x8x4x32xf32, #tpu.memory_space<vmem>>, vector<1x1x4x32xf32>
    %316 = vector.shape_cast %315 : vector<1x1x4x32xf32> to vector<4x32xf32>
    %c4_157 = arith.constant 4 : index
    %317 = arith.index_cast %279 : i32 to index
    %c0_158 = arith.constant 0 : index
    %c0_159 = arith.constant 0 : index
    %318 = vector.load %arg12[%c4_157, %317, %c0_158, %c0_159] : memref<6x8x4x32xf32, #tpu.memory_space<vmem>>, vector<1x1x4x32xf32>
    %319 = vector.shape_cast %318 : vector<1x1x4x32xf32> to vector<4x32xf32>
    %c5_160 = arith.constant 5 : index
    %320 = arith.index_cast %279 : i32 to index
    %c0_161 = arith.constant 0 : index
    %c0_162 = arith.constant 0 : index
    %321 = vector.load %arg12[%c5_160, %320, %c0_161, %c0_162] : memref<6x8x4x32xf32, #tpu.memory_space<vmem>>, vector<1x1x4x32xf32>
    %322 = vector.shape_cast %321 : vector<1x1x4x32xf32> to vector<4x32xf32>
    %cst_163 = arith.constant dense<0.000000e+00> : vector<4x32xf32>
    %323 = tpu.matmul %270, %42, %cst_163 {dimension_numbers = #tpu.dot_dimension_numbers<[1], [0], [0], [1], [0, 0, 1, 1], [], []>} : vector<4x32xf32>, vector<32x32xf32>, vector<4x32xf32> -> vector<4x32xf32>
    %cst_164 = arith.constant dense<0.000000e+00> : vector<4x32xf32>
    %324 = tpu.matmul %270, %43, %cst_164 {dimension_numbers = #tpu.dot_dimension_numbers<[1], [0], [0], [1], [0, 0, 1, 1], [], []>} : vector<4x32xf32>, vector<32x32xf32>, vector<4x32xf32> -> vector<4x32xf32>
    %cst_165 = arith.constant dense<0.000000e+00> : vector<4x32xf32>
    %325 = tpu.matmul %270, %44, %cst_165 {dimension_numbers = #tpu.dot_dimension_numbers<[1], [0], [0], [1], [0, 0, 1, 1], [], []>} : vector<4x32xf32>, vector<32x32xf32>, vector<4x32xf32> -> vector<4x32xf32>
    %326 = vector.broadcast %46 : vector<1x32xf32> to vector<4x32xf32>
    %327 = arith.addf %325, %326 : vector<4x32xf32>
    %328 = arith.addf %316, %323 : vector<4x32xf32>
    %329 = arith.negf %328 : vector<4x32xf32>
    %330 = math.exp %329 : vector<4x32xf32>
    %cst_166 = arith.constant 1.000000e+00 : f32
    %331 = vector.broadcast %cst_166 : f32 to vector<4x32xf32>
    %332 = arith.addf %331, %330 : vector<4x32xf32>
    %333 = arith.divf %331, %332 : vector<4x32xf32>
    %334 = arith.addf %319, %324 : vector<4x32xf32>
    %335 = arith.negf %334 : vector<4x32xf32>
    %336 = math.exp %335 : vector<4x32xf32>
    %cst_167 = arith.constant 1.000000e+00 : f32
    %337 = vector.broadcast %cst_167 : f32 to vector<4x32xf32>
    %338 = arith.addf %337, %336 : vector<4x32xf32>
    %339 = arith.divf %337, %338 : vector<4x32xf32>
    %340 = arith.mulf %333, %327 : vector<4x32xf32>
    %341 = arith.addf %322, %340 : vector<4x32xf32>
    %342 = math.tanh %341 : vector<4x32xf32>
    %cst_168 = arith.constant 1.000000e+00 : f32
    %343 = vector.broadcast %cst_168 : f32 to vector<4x32xf32>
    %344 = arith.subf %343, %339 : vector<4x32xf32>
    %345 = arith.mulf %344, %342 : vector<4x32xf32>
    %346 = arith.mulf %339, %270 : vector<4x32xf32>
    %347 = arith.addf %345, %346 : vector<4x32xf32>
    %348 = arith.index_cast %c3_i32 : i32 to index
    %c0_169 = arith.constant 0 : index
    %c0_170 = arith.constant 0 : index
    %349 = vector.load %arg13[%348, %c0_169, %c0_170] : memref<8x4x32xf32, #tpu.memory_space<vmem>>, vector<1x4x32xf32>
    %350 = vector.shape_cast %349 : vector<1x4x32xf32> to vector<4x32xf32>
    %351 = vector.shape_cast %313 : vector<4x32xf32> to vector<1x4x32xf32>
    tpu.vector_store %arg13[%348, %c0_169, %c0_170], %351 {strides = array<i32>} : memref<8x4x32xf32, #tpu.memory_space<vmem>>, vector<1x4x32xf32>,
    %352 = arith.index_cast %279 : i32 to index
    %c0_171 = arith.constant 0 : index
    %c0_172 = arith.constant 0 : index
    %353 = vector.load %arg14[%352, %c0_171, %c0_172] : memref<8x4x32xf32, #tpu.memory_space<vmem>>, vector<1x4x32xf32>
    %354 = vector.shape_cast %353 : vector<1x4x32xf32> to vector<4x32xf32>
    %355 = vector.shape_cast %347 : vector<4x32xf32> to vector<1x4x32xf32>
    tpu.vector_store %arg14[%352, %c0_171, %c0_172], %355 {strides = array<i32>} : memref<8x4x32xf32, #tpu.memory_space<vmem>>, vector<1x4x32xf32>,
    %c4_i32 = arith.constant 4 : i32
    %c7_i32_173 = arith.constant 7 : i32
    %356 = arith.subi %c7_i32_173, %c4_i32 : i32
    %c0_174 = arith.constant 0 : index
    %357 = arith.index_cast %c4_i32 : i32 to index
    %c0_175 = arith.constant 0 : index
    %c0_176 = arith.constant 0 : index
    %358 = vector.load %arg12[%c0_174, %357, %c0_175, %c0_176] : memref<6x8x4x32xf32, #tpu.memory_space<vmem>>, vector<1x1x4x32xf32>
    %359 = vector.shape_cast %358 : vector<1x1x4x32xf32> to vector<4x32xf32>
    %c1_177 = arith.constant 1 : index
    %360 = arith.index_cast %c4_i32 : i32 to index
    %c0_178 = arith.constant 0 : index
    %c0_179 = arith.constant 0 : index
    %361 = vector.load %arg12[%c1_177, %360, %c0_178, %c0_179] : memref<6x8x4x32xf32, #tpu.memory_space<vmem>>, vector<1x1x4x32xf32>
    %362 = vector.shape_cast %361 : vector<1x1x4x32xf32> to vector<4x32xf32>
    %c2_180 = arith.constant 2 : index
    %363 = arith.index_cast %c4_i32 : i32 to index
    %c0_181 = arith.constant 0 : index
    %c0_182 = arith.constant 0 : index
    %364 = vector.load %arg12[%c2_180, %363, %c0_181, %c0_182] : memref<6x8x4x32xf32, #tpu.memory_space<vmem>>, vector<1x1x4x32xf32>
    %365 = vector.shape_cast %364 : vector<1x1x4x32xf32> to vector<4x32xf32>
    %cst_183 = arith.constant dense<0.000000e+00> : vector<4x32xf32>
    %366 = tpu.matmul %313, %39, %cst_183 {dimension_numbers = #tpu.dot_dimension_numbers<[1], [0], [0], [1], [0, 0, 1, 1], [], []>} : vector<4x32xf32>, vector<32x32xf32>, vector<4x32xf32> -> vector<4x32xf32>
    %cst_184 = arith.constant dense<0.000000e+00> : vector<4x32xf32>
    %367 = tpu.matmul %313, %40, %cst_184 {dimension_numbers = #tpu.dot_dimension_numbers<[1], [0], [0], [1], [0, 0, 1, 1], [], []>} : vector<4x32xf32>, vector<32x32xf32>, vector<4x32xf32> -> vector<4x32xf32>
    %cst_185 = arith.constant dense<0.000000e+00> : vector<4x32xf32>
    %368 = tpu.matmul %313, %41, %cst_185 {dimension_numbers = #tpu.dot_dimension_numbers<[1], [0], [0], [1], [0, 0, 1, 1], [], []>} : vector<4x32xf32>, vector<32x32xf32>, vector<4x32xf32> -> vector<4x32xf32>
    %369 = vector.broadcast %45 : vector<1x32xf32> to vector<4x32xf32>
    %370 = arith.addf %368, %369 : vector<4x32xf32>
    %371 = arith.addf %359, %366 : vector<4x32xf32>
    %372 = arith.negf %371 : vector<4x32xf32>
    %373 = math.exp %372 : vector<4x32xf32>
    %cst_186 = arith.constant 1.000000e+00 : f32
    %374 = vector.broadcast %cst_186 : f32 to vector<4x32xf32>
    %375 = arith.addf %374, %373 : vector<4x32xf32>
    %376 = arith.divf %374, %375 : vector<4x32xf32>
    %377 = arith.addf %362, %367 : vector<4x32xf32>
    %378 = arith.negf %377 : vector<4x32xf32>
    %379 = math.exp %378 : vector<4x32xf32>
    %cst_187 = arith.constant 1.000000e+00 : f32
    %380 = vector.broadcast %cst_187 : f32 to vector<4x32xf32>
    %381 = arith.addf %380, %379 : vector<4x32xf32>
    %382 = arith.divf %380, %381 : vector<4x32xf32>
    %383 = arith.mulf %376, %370 : vector<4x32xf32>
    %384 = arith.addf %365, %383 : vector<4x32xf32>
    %385 = math.tanh %384 : vector<4x32xf32>
    %cst_188 = arith.constant 1.000000e+00 : f32
    %386 = vector.broadcast %cst_188 : f32 to vector<4x32xf32>
    %387 = arith.subf %386, %382 : vector<4x32xf32>
    %388 = arith.mulf %387, %385 : vector<4x32xf32>
    %389 = arith.mulf %382, %313 : vector<4x32xf32>
    %390 = arith.addf %388, %389 : vector<4x32xf32>
    %c3_189 = arith.constant 3 : index
    %391 = arith.index_cast %356 : i32 to index
    %c0_190 = arith.constant 0 : index
    %c0_191 = arith.constant 0 : index
    %392 = vector.load %arg12[%c3_189, %391, %c0_190, %c0_191] : memref<6x8x4x32xf32, #tpu.memory_space<vmem>>, vector<1x1x4x32xf32>
    %393 = vector.shape_cast %392 : vector<1x1x4x32xf32> to vector<4x32xf32>
    %c4_192 = arith.constant 4 : index
    %394 = arith.index_cast %356 : i32 to index
    %c0_193 = arith.constant 0 : index
    %c0_194 = arith.constant 0 : index
    %395 = vector.load %arg12[%c4_192, %394, %c0_193, %c0_194] : memref<6x8x4x32xf32, #tpu.memory_space<vmem>>, vector<1x1x4x32xf32>
    %396 = vector.shape_cast %395 : vector<1x1x4x32xf32> to vector<4x32xf32>
    %c5_195 = arith.constant 5 : index
    %397 = arith.index_cast %356 : i32 to index
    %c0_196 = arith.constant 0 : index
    %c0_197 = arith.constant 0 : index
    %398 = vector.load %arg12[%c5_195, %397, %c0_196, %c0_197] : memref<6x8x4x32xf32, #tpu.memory_space<vmem>>, vector<1x1x4x32xf32>
    %399 = vector.shape_cast %398 : vector<1x1x4x32xf32> to vector<4x32xf32>
    %cst_198 = arith.constant dense<0.000000e+00> : vector<4x32xf32>
    %400 = tpu.matmul %347, %42, %cst_198 {dimension_numbers = #tpu.dot_dimension_numbers<[1], [0], [0], [1], [0, 0, 1, 1], [], []>} : vector<4x32xf32>, vector<32x32xf32>, vector<4x32xf32> -> vector<4x32xf32>
    %cst_199 = arith.constant dense<0.000000e+00> : vector<4x32xf32>
    %401 = tpu.matmul %347, %43, %cst_199 {dimension_numbers = #tpu.dot_dimension_numbers<[1], [0], [0], [1], [0, 0, 1, 1], [], []>} : vector<4x32xf32>, vector<32x32xf32>, vector<4x32xf32> -> vector<4x32xf32>
    %cst_200 = arith.constant dense<0.000000e+00> : vector<4x32xf32>
    %402 = tpu.matmul %347, %44, %cst_200 {dimension_numbers = #tpu.dot_dimension_numbers<[1], [0], [0], [1], [0, 0, 1, 1], [], []>} : vector<4x32xf32>, vector<32x32xf32>, vector<4x32xf32> -> vector<4x32xf32>
    %403 = vector.broadcast %46 : vector<1x32xf32> to vector<4x32xf32>
    %404 = arith.addf %402, %403 : vector<4x32xf32>
    %405 = arith.addf %393, %400 : vector<4x32xf32>
    %406 = arith.negf %405 : vector<4x32xf32>
    %407 = math.exp %406 : vector<4x32xf32>
    %cst_201 = arith.constant 1.000000e+00 : f32
    %408 = vector.broadcast %cst_201 : f32 to vector<4x32xf32>
    %409 = arith.addf %408, %407 : vector<4x32xf32>
    %410 = arith.divf %408, %409 : vector<4x32xf32>
    %411 = arith.addf %396, %401 : vector<4x32xf32>
    %412 = arith.negf %411 : vector<4x32xf32>
    %413 = math.exp %412 : vector<4x32xf32>
    %cst_202 = arith.constant 1.000000e+00 : f32
    %414 = vector.broadcast %cst_202 : f32 to vector<4x32xf32>
    %415 = arith.addf %414, %413 : vector<4x32xf32>
    %416 = arith.divf %414, %415 : vector<4x32xf32>
    %417 = arith.mulf %410, %404 : vector<4x32xf32>
    %418 = arith.addf %399, %417 : vector<4x32xf32>
    %419 = math.tanh %418 : vector<4x32xf32>
    %cst_203 = arith.constant 1.000000e+00 : f32
    %420 = vector.broadcast %cst_203 : f32 to vector<4x32xf32>
    %421 = arith.subf %420, %416 : vector<4x32xf32>
    %422 = arith.mulf %421, %419 : vector<4x32xf32>
    %423 = arith.mulf %416, %347 : vector<4x32xf32>
    %424 = arith.addf %422, %423 : vector<4x32xf32>
    %425 = arith.index_cast %c4_i32 : i32 to index
    %c0_204 = arith.constant 0 : index
    %c0_205 = arith.constant 0 : index
    %426 = vector.load %arg13[%425, %c0_204, %c0_205] : memref<8x4x32xf32, #tpu.memory_space<vmem>>, vector<1x4x32xf32>
    %427 = vector.shape_cast %426 : vector<1x4x32xf32> to vector<4x32xf32>
    %428 = vector.shape_cast %390 : vector<4x32xf32> to vector<1x4x32xf32>
    tpu.vector_store %arg13[%425, %c0_204, %c0_205], %428 {strides = array<i32>} : memref<8x4x32xf32, #tpu.memory_space<vmem>>, vector<1x4x32xf32>,
    %429 = arith.index_cast %356 : i32 to index
    %c0_206 = arith.constant 0 : index
    %c0_207 = arith.constant 0 : index
    %430 = vector.load %arg14[%429, %c0_206, %c0_207] : memref<8x4x32xf32, #tpu.memory_space<vmem>>, vector<1x4x32xf32>
    %431 = vector.shape_cast %430 : vector<1x4x32xf32> to vector<4x32xf32>
    %432 = vector.shape_cast %424 : vector<4x32xf32> to vector<1x4x32xf32>
    tpu.vector_store %arg14[%429, %c0_206, %c0_207], %432 {strides = array<i32>} : memref<8x4x32xf32, #tpu.memory_space<vmem>>, vector<1x4x32xf32>,
    %c5_i32 = arith.constant 5 : i32
    %c7_i32_208 = arith.constant 7 : i32
    %433 = arith.subi %c7_i32_208, %c5_i32 : i32
    %c0_209 = arith.constant 0 : index
    %434 = arith.index_cast %c5_i32 : i32 to index
    %c0_210 = arith.constant 0 : index
    %c0_211 = arith.constant 0 : index
    %435 = vector.load %arg12[%c0_209, %434, %c0_210, %c0_211] : memref<6x8x4x32xf32, #tpu.memory_space<vmem>>, vector<1x1x4x32xf32>
    %436 = vector.shape_cast %435 : vector<1x1x4x32xf32> to vector<4x32xf32>
    %c1_212 = arith.constant 1 : index
    %437 = arith.index_cast %c5_i32 : i32 to index
    %c0_213 = arith.constant 0 : index
    %c0_214 = arith.constant 0 : index
    %438 = vector.load %arg12[%c1_212, %437, %c0_213, %c0_214] : memref<6x8x4x32xf32, #tpu.memory_space<vmem>>, vector<1x1x4x32xf32>
    %439 = vector.shape_cast %438 : vector<1x1x4x32xf32> to vector<4x32xf32>
    %c2_215 = arith.constant 2 : index
    %440 = arith.index_cast %c5_i32 : i32 to index
    %c0_216 = arith.constant 0 : index
    %c0_217 = arith.constant 0 : index
    %441 = vector.load %arg12[%c2_215, %440, %c0_216, %c0_217] : memref<6x8x4x32xf32, #tpu.memory_space<vmem>>, vector<1x1x4x32xf32>
    %442 = vector.shape_cast %441 : vector<1x1x4x32xf32> to vector<4x32xf32>
    %cst_218 = arith.constant dense<0.000000e+00> : vector<4x32xf32>
    %443 = tpu.matmul %390, %39, %cst_218 {dimension_numbers = #tpu.dot_dimension_numbers<[1], [0], [0], [1], [0, 0, 1, 1], [], []>} : vector<4x32xf32>, vector<32x32xf32>, vector<4x32xf32> -> vector<4x32xf32>
    %cst_219 = arith.constant dense<0.000000e+00> : vector<4x32xf32>
    %444 = tpu.matmul %390, %40, %cst_219 {dimension_numbers = #tpu.dot_dimension_numbers<[1], [0], [0], [1], [0, 0, 1, 1], [], []>} : vector<4x32xf32>, vector<32x32xf32>, vector<4x32xf32> -> vector<4x32xf32>
    %cst_220 = arith.constant dense<0.000000e+00> : vector<4x32xf32>
    %445 = tpu.matmul %390, %41, %cst_220 {dimension_numbers = #tpu.dot_dimension_numbers<[1], [0], [0], [1], [0, 0, 1, 1], [], []>} : vector<4x32xf32>, vector<32x32xf32>, vector<4x32xf32> -> vector<4x32xf32>
    %446 = vector.broadcast %45 : vector<1x32xf32> to vector<4x32xf32>
    %447 = arith.addf %445, %446 : vector<4x32xf32>
    %448 = arith.addf %436, %443 : vector<4x32xf32>
    %449 = arith.negf %448 : vector<4x32xf32>
    %450 = math.exp %449 : vector<4x32xf32>
    %cst_221 = arith.constant 1.000000e+00 : f32
    %451 = vector.broadcast %cst_221 : f32 to vector<4x32xf32>
    %452 = arith.addf %451, %450 : vector<4x32xf32>
    %453 = arith.divf %451, %452 : vector<4x32xf32>
    %454 = arith.addf %439, %444 : vector<4x32xf32>
    %455 = arith.negf %454 : vector<4x32xf32>
    %456 = math.exp %455 : vector<4x32xf32>
    %cst_222 = arith.constant 1.000000e+00 : f32
    %457 = vector.broadcast %cst_222 : f32 to vector<4x32xf32>
    %458 = arith.addf %457, %456 : vector<4x32xf32>
    %459 = arith.divf %457, %458 : vector<4x32xf32>
    %460 = arith.mulf %453, %447 : vector<4x32xf32>
    %461 = arith.addf %442, %460 : vector<4x32xf32>
    %462 = math.tanh %461 : vector<4x32xf32>
    %cst_223 = arith.constant 1.000000e+00 : f32
    %463 = vector.broadcast %cst_223 : f32 to vector<4x32xf32>
    %464 = arith.subf %463, %459 : vector<4x32xf32>
    %465 = arith.mulf %464, %462 : vector<4x32xf32>
    %466 = arith.mulf %459, %390 : vector<4x32xf32>
    %467 = arith.addf %465, %466 : vector<4x32xf32>
    %c3_224 = arith.constant 3 : index
    %468 = arith.index_cast %433 : i32 to index
    %c0_225 = arith.constant 0 : index
    %c0_226 = arith.constant 0 : index
    %469 = vector.load %arg12[%c3_224, %468, %c0_225, %c0_226] : memref<6x8x4x32xf32, #tpu.memory_space<vmem>>, vector<1x1x4x32xf32>
    %470 = vector.shape_cast %469 : vector<1x1x4x32xf32> to vector<4x32xf32>
    %c4_227 = arith.constant 4 : index
    %471 = arith.index_cast %433 : i32 to index
    %c0_228 = arith.constant 0 : index
    %c0_229 = arith.constant 0 : index
    %472 = vector.load %arg12[%c4_227, %471, %c0_228, %c0_229] : memref<6x8x4x32xf32, #tpu.memory_space<vmem>>, vector<1x1x4x32xf32>
    %473 = vector.shape_cast %472 : vector<1x1x4x32xf32> to vector<4x32xf32>
    %c5_230 = arith.constant 5 : index
    %474 = arith.index_cast %433 : i32 to index
    %c0_231 = arith.constant 0 : index
    %c0_232 = arith.constant 0 : index
    %475 = vector.load %arg12[%c5_230, %474, %c0_231, %c0_232] : memref<6x8x4x32xf32, #tpu.memory_space<vmem>>, vector<1x1x4x32xf32>
    %476 = vector.shape_cast %475 : vector<1x1x4x32xf32> to vector<4x32xf32>
    %cst_233 = arith.constant dense<0.000000e+00> : vector<4x32xf32>
    %477 = tpu.matmul %424, %42, %cst_233 {dimension_numbers = #tpu.dot_dimension_numbers<[1], [0], [0], [1], [0, 0, 1, 1], [], []>} : vector<4x32xf32>, vector<32x32xf32>, vector<4x32xf32> -> vector<4x32xf32>
    %cst_234 = arith.constant dense<0.000000e+00> : vector<4x32xf32>
    %478 = tpu.matmul %424, %43, %cst_234 {dimension_numbers = #tpu.dot_dimension_numbers<[1], [0], [0], [1], [0, 0, 1, 1], [], []>} : vector<4x32xf32>, vector<32x32xf32>, vector<4x32xf32> -> vector<4x32xf32>
    %cst_235 = arith.constant dense<0.000000e+00> : vector<4x32xf32>
    %479 = tpu.matmul %424, %44, %cst_235 {dimension_numbers = #tpu.dot_dimension_numbers<[1], [0], [0], [1], [0, 0, 1, 1], [], []>} : vector<4x32xf32>, vector<32x32xf32>, vector<4x32xf32> -> vector<4x32xf32>
    %480 = vector.broadcast %46 : vector<1x32xf32> to vector<4x32xf32>
    %481 = arith.addf %479, %480 : vector<4x32xf32>
    %482 = arith.addf %470, %477 : vector<4x32xf32>
    %483 = arith.negf %482 : vector<4x32xf32>
    %484 = math.exp %483 : vector<4x32xf32>
    %cst_236 = arith.constant 1.000000e+00 : f32
    %485 = vector.broadcast %cst_236 : f32 to vector<4x32xf32>
    %486 = arith.addf %485, %484 : vector<4x32xf32>
    %487 = arith.divf %485, %486 : vector<4x32xf32>
    %488 = arith.addf %473, %478 : vector<4x32xf32>
    %489 = arith.negf %488 : vector<4x32xf32>
    %490 = math.exp %489 : vector<4x32xf32>
    %cst_237 = arith.constant 1.000000e+00 : f32
    %491 = vector.broadcast %cst_237 : f32 to vector<4x32xf32>
    %492 = arith.addf %491, %490 : vector<4x32xf32>
    %493 = arith.divf %491, %492 : vector<4x32xf32>
    %494 = arith.mulf %487, %481 : vector<4x32xf32>
    %495 = arith.addf %476, %494 : vector<4x32xf32>
    %496 = math.tanh %495 : vector<4x32xf32>
    %cst_238 = arith.constant 1.000000e+00 : f32
    %497 = vector.broadcast %cst_238 : f32 to vector<4x32xf32>
    %498 = arith.subf %497, %493 : vector<4x32xf32>
    %499 = arith.mulf %498, %496 : vector<4x32xf32>
    %500 = arith.mulf %493, %424 : vector<4x32xf32>
    %501 = arith.addf %499, %500 : vector<4x32xf32>
    %502 = arith.index_cast %c5_i32 : i32 to index
    %c0_239 = arith.constant 0 : index
    %c0_240 = arith.constant 0 : index
    %503 = vector.load %arg13[%502, %c0_239, %c0_240] : memref<8x4x32xf32, #tpu.memory_space<vmem>>, vector<1x4x32xf32>
    %504 = vector.shape_cast %503 : vector<1x4x32xf32> to vector<4x32xf32>
    %505 = vector.shape_cast %467 : vector<4x32xf32> to vector<1x4x32xf32>
    tpu.vector_store %arg13[%502, %c0_239, %c0_240], %505 {strides = array<i32>} : memref<8x4x32xf32, #tpu.memory_space<vmem>>, vector<1x4x32xf32>,
    %506 = arith.index_cast %433 : i32 to index
    %c0_241 = arith.constant 0 : index
    %c0_242 = arith.constant 0 : index
    %507 = vector.load %arg14[%506, %c0_241, %c0_242] : memref<8x4x32xf32, #tpu.memory_space<vmem>>, vector<1x4x32xf32>
    %508 = vector.shape_cast %507 : vector<1x4x32xf32> to vector<4x32xf32>
    %509 = vector.shape_cast %501 : vector<4x32xf32> to vector<1x4x32xf32>
    tpu.vector_store %arg14[%506, %c0_241, %c0_242], %509 {strides = array<i32>} : memref<8x4x32xf32, #tpu.memory_space<vmem>>, vector<1x4x32xf32>,
    %c6_i32 = arith.constant 6 : i32
    %c7_i32_243 = arith.constant 7 : i32
    %510 = arith.subi %c7_i32_243, %c6_i32 : i32
    %c0_244 = arith.constant 0 : index
    %511 = arith.index_cast %c6_i32 : i32 to index
    %c0_245 = arith.constant 0 : index
    %c0_246 = arith.constant 0 : index
    %512 = vector.load %arg12[%c0_244, %511, %c0_245, %c0_246] : memref<6x8x4x32xf32, #tpu.memory_space<vmem>>, vector<1x1x4x32xf32>
    %513 = vector.shape_cast %512 : vector<1x1x4x32xf32> to vector<4x32xf32>
    %c1_247 = arith.constant 1 : index
    %514 = arith.index_cast %c6_i32 : i32 to index
    %c0_248 = arith.constant 0 : index
    %c0_249 = arith.constant 0 : index
    %515 = vector.load %arg12[%c1_247, %514, %c0_248, %c0_249] : memref<6x8x4x32xf32, #tpu.memory_space<vmem>>, vector<1x1x4x32xf32>
    %516 = vector.shape_cast %515 : vector<1x1x4x32xf32> to vector<4x32xf32>
    %c2_250 = arith.constant 2 : index
    %517 = arith.index_cast %c6_i32 : i32 to index
    %c0_251 = arith.constant 0 : index
    %c0_252 = arith.constant 0 : index
    %518 = vector.load %arg12[%c2_250, %517, %c0_251, %c0_252] : memref<6x8x4x32xf32, #tpu.memory_space<vmem>>, vector<1x1x4x32xf32>
    %519 = vector.shape_cast %518 : vector<1x1x4x32xf32> to vector<4x32xf32>
    %cst_253 = arith.constant dense<0.000000e+00> : vector<4x32xf32>
    %520 = tpu.matmul %467, %39, %cst_253 {dimension_numbers = #tpu.dot_dimension_numbers<[1], [0], [0], [1], [0, 0, 1, 1], [], []>} : vector<4x32xf32>, vector<32x32xf32>, vector<4x32xf32> -> vector<4x32xf32>
    %cst_254 = arith.constant dense<0.000000e+00> : vector<4x32xf32>
    %521 = tpu.matmul %467, %40, %cst_254 {dimension_numbers = #tpu.dot_dimension_numbers<[1], [0], [0], [1], [0, 0, 1, 1], [], []>} : vector<4x32xf32>, vector<32x32xf32>, vector<4x32xf32> -> vector<4x32xf32>
    %cst_255 = arith.constant dense<0.000000e+00> : vector<4x32xf32>
    %522 = tpu.matmul %467, %41, %cst_255 {dimension_numbers = #tpu.dot_dimension_numbers<[1], [0], [0], [1], [0, 0, 1, 1], [], []>} : vector<4x32xf32>, vector<32x32xf32>, vector<4x32xf32> -> vector<4x32xf32>
    %523 = vector.broadcast %45 : vector<1x32xf32> to vector<4x32xf32>
    %524 = arith.addf %522, %523 : vector<4x32xf32>
    %525 = arith.addf %513, %520 : vector<4x32xf32>
    %526 = arith.negf %525 : vector<4x32xf32>
    %527 = math.exp %526 : vector<4x32xf32>
    %cst_256 = arith.constant 1.000000e+00 : f32
    %528 = vector.broadcast %cst_256 : f32 to vector<4x32xf32>
    %529 = arith.addf %528, %527 : vector<4x32xf32>
    %530 = arith.divf %528, %529 : vector<4x32xf32>
    %531 = arith.addf %516, %521 : vector<4x32xf32>
    %532 = arith.negf %531 : vector<4x32xf32>
    %533 = math.exp %532 : vector<4x32xf32>
    %cst_257 = arith.constant 1.000000e+00 : f32
    %534 = vector.broadcast %cst_257 : f32 to vector<4x32xf32>
    %535 = arith.addf %534, %533 : vector<4x32xf32>
    %536 = arith.divf %534, %535 : vector<4x32xf32>
    %537 = arith.mulf %530, %524 : vector<4x32xf32>
    %538 = arith.addf %519, %537 : vector<4x32xf32>
    %539 = math.tanh %538 : vector<4x32xf32>
    %cst_258 = arith.constant 1.000000e+00 : f32
    %540 = vector.broadcast %cst_258 : f32 to vector<4x32xf32>
    %541 = arith.subf %540, %536 : vector<4x32xf32>
    %542 = arith.mulf %541, %539 : vector<4x32xf32>
    %543 = arith.mulf %536, %467 : vector<4x32xf32>
    %544 = arith.addf %542, %543 : vector<4x32xf32>
    %c3_259 = arith.constant 3 : index
    %545 = arith.index_cast %510 : i32 to index
    %c0_260 = arith.constant 0 : index
    %c0_261 = arith.constant 0 : index
    %546 = vector.load %arg12[%c3_259, %545, %c0_260, %c0_261] : memref<6x8x4x32xf32, #tpu.memory_space<vmem>>, vector<1x1x4x32xf32>
    %547 = vector.shape_cast %546 : vector<1x1x4x32xf32> to vector<4x32xf32>
    %c4_262 = arith.constant 4 : index
    %548 = arith.index_cast %510 : i32 to index
    %c0_263 = arith.constant 0 : index
    %c0_264 = arith.constant 0 : index
    %549 = vector.load %arg12[%c4_262, %548, %c0_263, %c0_264] : memref<6x8x4x32xf32, #tpu.memory_space<vmem>>, vector<1x1x4x32xf32>
    %550 = vector.shape_cast %549 : vector<1x1x4x32xf32> to vector<4x32xf32>
    %c5_265 = arith.constant 5 : index
    %551 = arith.index_cast %510 : i32 to index
    %c0_266 = arith.constant 0 : index
    %c0_267 = arith.constant 0 : index
    %552 = vector.load %arg12[%c5_265, %551, %c0_266, %c0_267] : memref<6x8x4x32xf32, #tpu.memory_space<vmem>>, vector<1x1x4x32xf32>
    %553 = vector.shape_cast %552 : vector<1x1x4x32xf32> to vector<4x32xf32>
    %cst_268 = arith.constant dense<0.000000e+00> : vector<4x32xf32>
    %554 = tpu.matmul %501, %42, %cst_268 {dimension_numbers = #tpu.dot_dimension_numbers<[1], [0], [0], [1], [0, 0, 1, 1], [], []>} : vector<4x32xf32>, vector<32x32xf32>, vector<4x32xf32> -> vector<4x32xf32>
    %cst_269 = arith.constant dense<0.000000e+00> : vector<4x32xf32>
    %555 = tpu.matmul %501, %43, %cst_269 {dimension_numbers = #tpu.dot_dimension_numbers<[1], [0], [0], [1], [0, 0, 1, 1], [], []>} : vector<4x32xf32>, vector<32x32xf32>, vector<4x32xf32> -> vector<4x32xf32>
    %cst_270 = arith.constant dense<0.000000e+00> : vector<4x32xf32>
    %556 = tpu.matmul %501, %44, %cst_270 {dimension_numbers = #tpu.dot_dimension_numbers<[1], [0], [0], [1], [0, 0, 1, 1], [], []>} : vector<4x32xf32>, vector<32x32xf32>, vector<4x32xf32> -> vector<4x32xf32>
    %557 = vector.broadcast %46 : vector<1x32xf32> to vector<4x32xf32>
    %558 = arith.addf %556, %557 : vector<4x32xf32>
    %559 = arith.addf %547, %554 : vector<4x32xf32>
    %560 = arith.negf %559 : vector<4x32xf32>
    %561 = math.exp %560 : vector<4x32xf32>
    %cst_271 = arith.constant 1.000000e+00 : f32
    %562 = vector.broadcast %cst_271 : f32 to vector<4x32xf32>
    %563 = arith.addf %562, %561 : vector<4x32xf32>
    %564 = arith.divf %562, %563 : vector<4x32xf32>
    %565 = arith.addf %550, %555 : vector<4x32xf32>
    %566 = arith.negf %565 : vector<4x32xf32>
    %567 = math.exp %566 : vector<4x32xf32>
    %cst_272 = arith.constant 1.000000e+00 : f32
    %568 = vector.broadcast %cst_272 : f32 to vector<4x32xf32>
    %569 = arith.addf %568, %567 : vector<4x32xf32>
    %570 = arith.divf %568, %569 : vector<4x32xf32>
    %571 = arith.mulf %564, %558 : vector<4x32xf32>
    %572 = arith.addf %553, %571 : vector<4x32xf32>
    %573 = math.tanh %572 : vector<4x32xf32>
    %cst_273 = arith.constant 1.000000e+00 : f32
    %574 = vector.broadcast %cst_273 : f32 to vector<4x32xf32>
    %575 = arith.subf %574, %570 : vector<4x32xf32>
    %576 = arith.mulf %575, %573 : vector<4x32xf32>
    %577 = arith.mulf %570, %501 : vector<4x32xf32>
    %578 = arith.addf %576, %577 : vector<4x32xf32>
    %579 = arith.index_cast %c6_i32 : i32 to index
    %c0_274 = arith.constant 0 : index
    %c0_275 = arith.constant 0 : index
    %580 = vector.load %arg13[%579, %c0_274, %c0_275] : memref<8x4x32xf32, #tpu.memory_space<vmem>>, vector<1x4x32xf32>
    %581 = vector.shape_cast %580 : vector<1x4x32xf32> to vector<4x32xf32>
    %582 = vector.shape_cast %544 : vector<4x32xf32> to vector<1x4x32xf32>
    tpu.vector_store %arg13[%579, %c0_274, %c0_275], %582 {strides = array<i32>} : memref<8x4x32xf32, #tpu.memory_space<vmem>>, vector<1x4x32xf32>,
    %583 = arith.index_cast %510 : i32 to index
    %c0_276 = arith.constant 0 : index
    %c0_277 = arith.constant 0 : index
    %584 = vector.load %arg14[%583, %c0_276, %c0_277] : memref<8x4x32xf32, #tpu.memory_space<vmem>>, vector<1x4x32xf32>
    %585 = vector.shape_cast %584 : vector<1x4x32xf32> to vector<4x32xf32>
    %586 = vector.shape_cast %578 : vector<4x32xf32> to vector<1x4x32xf32>
    tpu.vector_store %arg14[%583, %c0_276, %c0_277], %586 {strides = array<i32>} : memref<8x4x32xf32, #tpu.memory_space<vmem>>, vector<1x4x32xf32>,
    %c7_i32_278 = arith.constant 7 : i32
    %c7_i32_279 = arith.constant 7 : i32
    %587 = arith.subi %c7_i32_279, %c7_i32_278 : i32
    %c0_280 = arith.constant 0 : index
    %588 = arith.index_cast %c7_i32_278 : i32 to index
    %c0_281 = arith.constant 0 : index
    %c0_282 = arith.constant 0 : index
    %589 = vector.load %arg12[%c0_280, %588, %c0_281, %c0_282] : memref<6x8x4x32xf32, #tpu.memory_space<vmem>>, vector<1x1x4x32xf32>
    %590 = vector.shape_cast %589 : vector<1x1x4x32xf32> to vector<4x32xf32>
    %c1_283 = arith.constant 1 : index
    %591 = arith.index_cast %c7_i32_278 : i32 to index
    %c0_284 = arith.constant 0 : index
    %c0_285 = arith.constant 0 : index
    %592 = vector.load %arg12[%c1_283, %591, %c0_284, %c0_285] : memref<6x8x4x32xf32, #tpu.memory_space<vmem>>, vector<1x1x4x32xf32>
    %593 = vector.shape_cast %592 : vector<1x1x4x32xf32> to vector<4x32xf32>
    %c2_286 = arith.constant 2 : index
    %594 = arith.index_cast %c7_i32_278 : i32 to index
    %c0_287 = arith.constant 0 : index
    %c0_288 = arith.constant 0 : index
    %595 = vector.load %arg12[%c2_286, %594, %c0_287, %c0_288] : memref<6x8x4x32xf32, #tpu.memory_space<vmem>>, vector<1x1x4x32xf32>
    %596 = vector.shape_cast %595 : vector<1x1x4x32xf32> to vector<4x32xf32>
    %cst_289 = arith.constant dense<0.000000e+00> : vector<4x32xf32>
    %597 = tpu.matmul %544, %39, %cst_289 {dimension_numbers = #tpu.dot_dimension_numbers<[1], [0], [0], [1], [0, 0, 1, 1], [], []>} : vector<4x32xf32>, vector<32x32xf32>, vector<4x32xf32> -> vector<4x32xf32>
    %cst_290 = arith.constant dense<0.000000e+00> : vector<4x32xf32>
    %598 = tpu.matmul %544, %40, %cst_290 {dimension_numbers = #tpu.dot_dimension_numbers<[1], [0], [0], [1], [0, 0, 1, 1], [], []>} : vector<4x32xf32>, vector<32x32xf32>, vector<4x32xf32> -> vector<4x32xf32>
    %cst_291 = arith.constant dense<0.000000e+00> : vector<4x32xf32>
    %599 = tpu.matmul %544, %41, %cst_291 {dimension_numbers = #tpu.dot_dimension_numbers<[1], [0], [0], [1], [0, 0, 1, 1], [], []>} : vector<4x32xf32>, vector<32x32xf32>, vector<4x32xf32> -> vector<4x32xf32>
    %600 = vector.broadcast %45 : vector<1x32xf32> to vector<4x32xf32>
    %601 = arith.addf %599, %600 : vector<4x32xf32>
    %602 = arith.addf %590, %597 : vector<4x32xf32>
    %603 = arith.negf %602 : vector<4x32xf32>
    %604 = math.exp %603 : vector<4x32xf32>
    %cst_292 = arith.constant 1.000000e+00 : f32
    %605 = vector.broadcast %cst_292 : f32 to vector<4x32xf32>
    %606 = arith.addf %605, %604 : vector<4x32xf32>
    %607 = arith.divf %605, %606 : vector<4x32xf32>
    %608 = arith.addf %593, %598 : vector<4x32xf32>
    %609 = arith.negf %608 : vector<4x32xf32>
    %610 = math.exp %609 : vector<4x32xf32>
    %cst_293 = arith.constant 1.000000e+00 : f32
    %611 = vector.broadcast %cst_293 : f32 to vector<4x32xf32>
    %612 = arith.addf %611, %610 : vector<4x32xf32>
    %613 = arith.divf %611, %612 : vector<4x32xf32>
    %614 = arith.mulf %607, %601 : vector<4x32xf32>
    %615 = arith.addf %596, %614 : vector<4x32xf32>
    %616 = math.tanh %615 : vector<4x32xf32>
    %cst_294 = arith.constant 1.000000e+00 : f32
    %617 = vector.broadcast %cst_294 : f32 to vector<4x32xf32>
    %618 = arith.subf %617, %613 : vector<4x32xf32>
    %619 = arith.mulf %618, %616 : vector<4x32xf32>
    %620 = arith.mulf %613, %544 : vector<4x32xf32>
    %621 = arith.addf %619, %620 : vector<4x32xf32>
    %c3_295 = arith.constant 3 : index
    %622 = arith.index_cast %587 : i32 to index
    %c0_296 = arith.constant 0 : index
    %c0_297 = arith.constant 0 : index
    %623 = vector.load %arg12[%c3_295, %622, %c0_296, %c0_297] : memref<6x8x4x32xf32, #tpu.memory_space<vmem>>, vector<1x1x4x32xf32>
    %624 = vector.shape_cast %623 : vector<1x1x4x32xf32> to vector<4x32xf32>
    %c4_298 = arith.constant 4 : index
    %625 = arith.index_cast %587 : i32 to index
    %c0_299 = arith.constant 0 : index
    %c0_300 = arith.constant 0 : index
    %626 = vector.load %arg12[%c4_298, %625, %c0_299, %c0_300] : memref<6x8x4x32xf32, #tpu.memory_space<vmem>>, vector<1x1x4x32xf32>
    %627 = vector.shape_cast %626 : vector<1x1x4x32xf32> to vector<4x32xf32>
    %c5_301 = arith.constant 5 : index
    %628 = arith.index_cast %587 : i32 to index
    %c0_302 = arith.constant 0 : index
    %c0_303 = arith.constant 0 : index
    %629 = vector.load %arg12[%c5_301, %628, %c0_302, %c0_303] : memref<6x8x4x32xf32, #tpu.memory_space<vmem>>, vector<1x1x4x32xf32>
    %630 = vector.shape_cast %629 : vector<1x1x4x32xf32> to vector<4x32xf32>
    %cst_304 = arith.constant dense<0.000000e+00> : vector<4x32xf32>
    %631 = tpu.matmul %578, %42, %cst_304 {dimension_numbers = #tpu.dot_dimension_numbers<[1], [0], [0], [1], [0, 0, 1, 1], [], []>} : vector<4x32xf32>, vector<32x32xf32>, vector<4x32xf32> -> vector<4x32xf32>
    %cst_305 = arith.constant dense<0.000000e+00> : vector<4x32xf32>
    %632 = tpu.matmul %578, %43, %cst_305 {dimension_numbers = #tpu.dot_dimension_numbers<[1], [0], [0], [1], [0, 0, 1, 1], [], []>} : vector<4x32xf32>, vector<32x32xf32>, vector<4x32xf32> -> vector<4x32xf32>
    %cst_306 = arith.constant dense<0.000000e+00> : vector<4x32xf32>
    %633 = tpu.matmul %578, %44, %cst_306 {dimension_numbers = #tpu.dot_dimension_numbers<[1], [0], [0], [1], [0, 0, 1, 1], [], []>} : vector<4x32xf32>, vector<32x32xf32>, vector<4x32xf32> -> vector<4x32xf32>
    %634 = vector.broadcast %46 : vector<1x32xf32> to vector<4x32xf32>
    %635 = arith.addf %633, %634 : vector<4x32xf32>
    %636 = arith.addf %624, %631 : vector<4x32xf32>
    %637 = arith.negf %636 : vector<4x32xf32>
    %638 = math.exp %637 : vector<4x32xf32>
    %cst_307 = arith.constant 1.000000e+00 : f32
    %639 = vector.broadcast %cst_307 : f32 to vector<4x32xf32>
    %640 = arith.addf %639, %638 : vector<4x32xf32>
    %641 = arith.divf %639, %640 : vector<4x32xf32>
    %642 = arith.addf %627, %632 : vector<4x32xf32>
    %643 = arith.negf %642 : vector<4x32xf32>
    %644 = math.exp %643 : vector<4x32xf32>
    %cst_308 = arith.constant 1.000000e+00 : f32
    %645 = vector.broadcast %cst_308 : f32 to vector<4x32xf32>
    %646 = arith.addf %645, %644 : vector<4x32xf32>
    %647 = arith.divf %645, %646 : vector<4x32xf32>
    %648 = arith.mulf %641, %635 : vector<4x32xf32>
    %649 = arith.addf %630, %648 : vector<4x32xf32>
    %650 = math.tanh %649 : vector<4x32xf32>
    %cst_309 = arith.constant 1.000000e+00 : f32
    %651 = vector.broadcast %cst_309 : f32 to vector<4x32xf32>
    %652 = arith.subf %651, %647 : vector<4x32xf32>
    %653 = arith.mulf %652, %650 : vector<4x32xf32>
    %654 = arith.mulf %647, %578 : vector<4x32xf32>
    %655 = arith.addf %653, %654 : vector<4x32xf32>
    %656 = arith.index_cast %c7_i32_278 : i32 to index
    %c0_310 = arith.constant 0 : index
    %c0_311 = arith.constant 0 : index
    %657 = vector.load %arg13[%656, %c0_310, %c0_311] : memref<8x4x32xf32, #tpu.memory_space<vmem>>, vector<1x4x32xf32>
    %658 = vector.shape_cast %657 : vector<1x4x32xf32> to vector<4x32xf32>
    %659 = vector.shape_cast %621 : vector<4x32xf32> to vector<1x4x32xf32>
    tpu.vector_store %arg13[%656, %c0_310, %c0_311], %659 {strides = array<i32>} : memref<8x4x32xf32, #tpu.memory_space<vmem>>, vector<1x4x32xf32>,
    %660 = arith.index_cast %587 : i32 to index
    %c0_312 = arith.constant 0 : index
    %c0_313 = arith.constant 0 : index
    %661 = vector.load %arg14[%660, %c0_312, %c0_313] : memref<8x4x32xf32, #tpu.memory_space<vmem>>, vector<1x4x32xf32>
    %662 = vector.shape_cast %661 : vector<1x4x32xf32> to vector<4x32xf32>
    %663 = vector.shape_cast %655 : vector<4x32xf32> to vector<1x4x32xf32>
    tpu.vector_store %arg14[%660, %c0_312, %c0_313], %663 {strides = array<i32>} : memref<8x4x32xf32, #tpu.memory_space<vmem>>, vector<1x4x32xf32>,
    %c8_i32 = arith.constant 8 : i32
    %c0_314 = arith.constant 0 : index
    %c0_315 = arith.constant 0 : index
    %c0_316 = arith.constant 0 : index
    %664 = vector.load %arg13[%c0_314, %c0_315, %c0_316] : memref<8x4x32xf32, #tpu.memory_space<vmem>>, vector<8x4x32xf32>
    %c0_317 = arith.constant 0 : index
    %c0_318 = arith.constant 0 : index
    %c0_319 = arith.constant 0 : index
    %665 = vector.load %arg14[%c0_317, %c0_318, %c0_319] : memref<8x4x32xf32, #tpu.memory_space<vmem>>, vector<8x4x32xf32>
    %666 = tpu.concatenate %664, %665 in 2 : vector<8x4x32xf32>, vector<8x4x32xf32> -> vector<8x4x64xf32>
    %c0_320 = arith.constant 0 : index
    %c0_321 = arith.constant 0 : index
    %c0_322 = arith.constant 0 : index
    %667 = vector.load %arg10[%c0_320, %c0_321, %c0_322] : memref<8x4x64xf32, #tpu.memory_space<vmem>>, vector<8x4x64xf32>
    tpu.vector_store %arg10[%c0_320, %c0_321, %c0_322], %666 {strides = array<i32>} : memref<8x4x64xf32, #tpu.memory_space<vmem>>, vector<8x4x64xf32>,
    %c0_323 = arith.constant 0 : index
    %c0_324 = arith.constant 0 : index
    %668 = vector.load %arg7[%c0_323, %c0_324] : memref<32x32xf32, #tpu.memory_space<vmem>>, vector<32x32xf32>
    %cst_325 = arith.constant dense<0.000000e+00> : vector<4x32xf32>
    %669 = tpu.matmul %621, %668, %cst_325 {dimension_numbers = #tpu.dot_dimension_numbers<[1], [0], [0], [1], [0, 0, 1, 1], [], []>} : vector<4x32xf32>, vector<32x32xf32>, vector<4x32xf32> -> vector<4x32xf32>
    %c0_326 = arith.constant 0 : index
    %c0_327 = arith.constant 0 : index
    %670 = vector.load %arg8[%c0_326, %c0_327] : memref<32x32xf32, #tpu.memory_space<vmem>>, vector<32x32xf32>
    %cst_328 = arith.constant dense<0.000000e+00> : vector<4x32xf32>
    %671 = tpu.matmul %655, %670, %cst_328 {dimension_numbers = #tpu.dot_dimension_numbers<[1], [0], [0], [1], [0, 0, 1, 1], [], []>} : vector<4x32xf32>, vector<32x32xf32>, vector<4x32xf32> -> vector<4x32xf32>
    %672 = arith.addf %669, %671 : vector<4x32xf32>
    %c0_329 = arith.constant 0 : index
    %c0_330 = arith.constant 0 : index
    %673 = vector.load %arg9[%c0_329, %c0_330] : memref<1x32xf32, #tpu.memory_space<vmem>>, vector<1x32xf32>
    %674 = vector.broadcast %673 : vector<1x32xf32> to vector<4x32xf32>
    %675 = arith.addf %672, %674 : vector<4x32xf32>
    %676 = math.tanh %675 : vector<4x32xf32>
    %c0_331 = arith.constant 0 : index
    %c0_332 = arith.constant 0 : index
    %677 = vector.load %arg11[%c0_331, %c0_332] : memref<4x32xf32, #tpu.memory_space<vmem>>, vector<4x32xf32>
    tpu.vector_store %arg11[%c0_331, %c0_332], %676 {strides = array<i32>} : memref<4x32xf32, #tpu.memory_space<vmem>>, vector<4x32xf32>,
    return
  }
}

</mosaic_0001>

<bundles_post_ra>
// kernel: tpu_custom_call.1
= control target key start
LH: loop header
LB: loop body
LE: loop exit
PB: predicated region body
PF: predicated region fallthrough
CT: control target
= control target key end

     0   :  { %17 = vsyncpa [#allocation6], 0  ;;  %s3983_s0 = inlined_call_operand.hbm [shape: f32[8,4,16], index: 0, kind: input, shape index: {}]   ;;  %s3984_s1 = inlined_call_operand.hbm [shape: f32[16,192], index: 1, kind: input, shape index: {}]   ;;  %s3985_s2 = inlined_call_operand.hbm [shape: f32[1,192], index: 2, kind: input, shape index: {}]   ;;  %s3986_s3 = inlined_call_operand.hbm [shape: f32[32,96], index: 3, kind: input, shape index: {}]   ;;  %s3987_s4 = inlined_call_operand.vmem [shape: f32[1,32], index: 4, kind: input, shape index: {}]   ;;  %s3988_s5 = inlined_call_operand.hbm [shape: f32[32,96], index: 5, kind: input, shape index: {}]   ;;  %s3989_s6 = inlined_call_operand.vmem [shape: f32[1,32], index: 6, kind: input, shape index: {}]   ;;  %s3990_s7 = inlined_call_operand.hbm [shape: f32[32,32], index: 7, kind: input, shape index: {}]   ;;  %s3991_s8 = inlined_call_operand.hbm [shape: f32[32,32], index: 8, kind: input, shape index: {}]   ;;  %s3992_s9 = inlined_call_operand.vmem [shape: f32[1,32], index: 9, kind: input, shape index: {}]   ;;  %s3993_s10 = inlined_call_operand.hbm [shape: f32[8,4,64], index: 10, kind: output, shape index: {0}]   ;;  %s3994_s11 = inlined_call_operand.hbm [shape: f32[4,32], index: 11, kind: output, shape index: {1}]  }
   0x1   :  { %18 = vsyncpa [#allocation9], 0 }
   0x2   :  { %19 = vsyncpa [#allocation12], 0 }
   0x3   :  { %20 = vsyncpa [#allocation15], 0 }
   0x4   :  { %21 = vsyncpa [#allocation7], 0  ;;  %s40_s19 = sshll.u32 %s3984_s1, 4  ;;  %s41_s19 = int_to_ptr.hbm [resolvable:$true] %s40_s19 }
   0x5   :  { %22 = vsyncpa [#allocation19], 0  ;;  %s3171_s20 = smov [#allocation8]   ;;  %s64_s24 = sshll.u32 %s3986_s3, 4  ;;  %s65_s24 = int_to_ptr.hbm [resolvable:$true] %s64_s24 }
   0x6   :  { %s42_s21 = sshll.u32 %s3171_s20, 4  ;;  %s3172_s25 = smov 256   ;;  %s43_s21 = int_to_ptr.vmem [resolvable:$true] %s42_s21 }
   0x7   :  { %s3173_s26 = smov 16   ;;  %s3174_s27 = smov [#allocation11]  }
   0x8   :  { %48 = dma.hbm_to_vmem [thread:$0]  %s41_s19, 512, %s43_s21, [#allocation9], %s3172_s25, %s3172_s25, %s3173_s26  }
   0x9   :  { %s66_s28 = sshll.u32 %s3174_s27, 4  ;;  %s3175_s29 = smov 128   ;;  %s67_s28 = int_to_ptr.vmem [resolvable:$true] %s66_s28 }
   0xa   :  { %s3176_s30 = smov 8   ;;  %s94_s13 = sshll.u32 %s3990_s7, 4  ;;  %s95_s13 = int_to_ptr.hbm [resolvable:$true] %s94_s13 }
   0xb   :  { %72 = dma.hbm_to_vmem [thread:$0]  %s65_s24, 512, %s67_s28, [#allocation12], %s3175_s29, %s3175_s29, %s3176_s30  }
   0xc   :  { %s3177_s14 = smov [#allocation14]   ;;  %s27_s17 = sshll.u32 %s3983_s0, 4  ;;  %s28_s17 = int_to_ptr.hbm [resolvable:$true] %s27_s17 }
   0xd   :  { %s96_s3 = sshll.u32 %s3177_s14, 4  ;;  %s3178_s18 = smov [#allocation5]   ;;  %s97_s3 = int_to_ptr.vmem [resolvable:$true] %s96_s3 }
   0xe   :  { %102 = dma.hbm_to_vmem [thread:$0]  %s95_s13, 512, %s97_s3, [#allocation15], %s3175_s29, %s3175_s29, %s3176_s30  }
   0xf   :  { %s29_s19 = sshll.u32 %s3178_s18, 4  ;;  %s3179_s20 = smov 64   ;;  %s30_s19 = int_to_ptr.vmem [resolvable:$true] %s29_s19 }
  0x10   :  { %s3180_s21 = smov 4   ;;  %s54_s23 = sshll.u32 %s3985_s2, 4  ;;  %s55_s23 = int_to_ptr.hbm [resolvable:$true] %s54_s23 }
  0x11   :  { %35 = dma.hbm_to_vmem [thread:$0]  %s28_s17, 512, %s30_s19, [#allocation6], %s3179_s20, %s3179_s20, %s3180_s21  }
  0x12   :  { %s3181_s0 = smov [#allocation10]   ;;  %s79_s27 = sshll.u32 %s3988_s5, 4  ;;  %s80_s27 = int_to_ptr.hbm [resolvable:$true] %s79_s27 }
  0x13   :  { %s56_s24 = sshll.u32 %s3181_s0, 4  ;;  %s3182_s28 = smov [#allocation13]   ;;  %s57_s24 = int_to_ptr.vmem [resolvable:$true] %s56_s24 }
  0x14   :  { %59 = dma.hbm_to_vmem [thread:$0]  %s55_s23, 32, %s57_s24, [#allocation9]  }
  0x15   :  { %s81_s1 = sshll.u32 %s3182_s28, 4  ;;  %s107_s14 = sshll.u32 %s3991_s8, 4  ;;  %s82_s1 = int_to_ptr.vmem [resolvable:$true] %s81_s1  ;;  %s108_s14 = int_to_ptr.hbm [resolvable:$true] %s107_s14 }
  0x16   :  { %87 = dma.hbm_to_vmem [thread:$0]  %s80_s27, 512, %s82_s1, [#allocation12], %s3175_s29, %s3175_s29, %s3176_s30  }
  0x17   :  { %s3183_s2 = smov [#allocation16]  }
  0x18   :  { %s109_s3 = sshll.u32 %s3183_s2, 4  ;;  %s110_s3 = int_to_ptr.vmem [resolvable:$true] %s109_s3 }
  0x19   :  { %115 = dma.hbm_to_vmem [thread:$0]  %s108_s14, 512, %s110_s3, [#allocation15], %s3175_s29, %s3175_s29, %s3176_s30  }
  0x1a   :  { %3159 = dma.done.wait [#allocation6], 512  }
  0x1b   :  { %3160 = vsyncadd [#allocation6], 4294966784 }
  0x1c   :  { %3161 = dma.done.wait [#allocation9], 544  }
  0x1d   :  { %3162 = vsyncadd [#allocation9], 4294966752 }
  0x1e   :  { %3163 = dma.done.wait [#allocation12], 1024  }
  0x1f   :  { %3164 = vsyncadd [#allocation12], 4294966272 }
  0x20   :  { %3165 = dma.done.wait [#allocation15], 1024  }
  0x21   :  { %3166 = vsyncadd [#allocation15], 4294966272  ;;  %v3285_v0 = vld [vmem:[#allocation11 + $0x10] sm:$0xff]  ;;  %v3287_v1 = vld [vmem:[#allocation11 + $0x18] sm:$0xff]  ;;  %s3184_s5 = smov 96   ;;  %vm191_vm0 = vcmask 130048  }
  0x22   :  { %v156_v2 = vld [vmem:[#allocation8 + $0x10] sm:$0xff]  ;;  %v2734_v3 = vpack.i.bf16 %v3285_v0, %v3287_v1  ;;  %537 = vmatpush.msra.mxu2 %v3287_v1  ;;  %v154_v4 = vld [vmem:[#allocation8] sm:$0xff]  ;;  %v148_v9 = vld [vmem:[#allocation5 + $0x8] sm:$0xf]  ;;  %v3185_v21 = vmov 0.0   ;;  %vm270_vm1 = vcmask 257024  }
  0x23   :  { %214 = vmatpush.msra.mxu0 %v156_v2  ;;  %v146_v5 = vld [vmem:[#allocation5] sm:$0xf]  ;;  %v147_v6 = vld [vmem:[#allocation5 + $0x4] sm:$0xf]  ;;  %v3292_v7 = vld [vmem:[#allocation11 + $0x8] sm:$0xff]  ;;  %s3186_s8 = smov 32  }
  0x24   :  { %172 = vst [vmem:[#allocation1] ss:$2 sm:$0xff] %v146_v5  ;;  %v3294_v8 = vld [vmem:[#allocation11] sm:$0xff]  ;;  %2735 = vrot.lane.b32.xlu1 %v2734_v3, %s3179_s20  ;;  %2725 = vrot.lane.b32.xlu0 %v2734_v3, %s3184_s5  ;;  %v149_v10 = vld [vmem:[#allocation5 + $0xc] sm:$0xf]  ;;  %v3298_v11 = vld [vmem:[#allocation13 + $0x10] sm:$0xff] }
  0x25   :  { %174 = vst [vmem:[#allocation1 + $0x1] ss:$2 sm:$0xff] %v147_v6  ;;  %v3300_v12 = vld [vmem:[#allocation13 + $0x18] sm:$0xff]  ;;  %215 = vmatpush.msra.mxu0 %v154_v4  ;;  %538 = vmatpush.msra.mxu2 %v3285_v0  ;;  %v150_v13 = vld [vmem:[#allocation5 + $0x10] sm:$0xf]  ;;  %v155_v19 = vld [vmem:[#allocation8 + $0x8] sm:$0xff]  ;;  %v2739_v20 = vpack.i.bf16 %v3294_v8, %v3292_v7 }
  0x26   :  { %176 = vst [vmem:[#allocation1 + $0x10] ss:$2 sm:$0xff] %v148_v9  ;;  %v151_v14 = vld [vmem:[#allocation5 + $0x14] sm:$0xf]  ;;  %v2744_v15 = vpack.i.bf16 %v3298_v11, %v3300_v12  ;;  %v152_v16 = vld [vmem:[#allocation5 + $0x18] sm:$0xf] }
  0x27   :  { %178 = vst [vmem:[#allocation1 + $0x11] ss:$2 sm:$0xff] %v149_v10  ;;  %539 = vmatpush.msra.mxu2 %v3292_v7  ;;  %v153_v17 = vld [vmem:[#allocation5 + $0x1c] sm:$0xf]  ;;  %v3311_v22 = vld [vmem:[#allocation13] sm:$0xff]  ;;  %v3313_v23 = vld [vmem:[#allocation13 + $0x8] sm:$0xff] }
  0x28   :  { %180 = vst [vmem:[#allocation1 + $0x20] ss:$2 sm:$0xff] %v150_v13  ;;  %2745 = vrot.lane.b32.xlu2 %v2744_v15, %s3184_s5  ;;  %v157_v18 = vld [vmem:[#allocation8 + $0x18] sm:$0xff]  ;;  %v2749_v25 = vpack.i.bf16 %v3311_v22, %v3313_v23  ;;  %v3367_v45 = vld [vmem:[#allocation10] sm:$0x3]  ;;  %vm521_vm10 = vcmask 261120  }
  0x29   :  { %182 = vst [vmem:[#allocation1 + $0x21] ss:$2 sm:$0xff] %v151_v14  ;;  %243 = vmatpush.msra.mxu1 %v157_v18  ;;  %540 = vmatpush.msra.mxu2 %v3294_v8  ;;  %v3377_v47 = vperm.slane %v3367_v45, 0  ;;  %v161_v5 = vperm.slane %v3367_v45, 1  ;;  %s3187_s22 = smov [#allocation17]   ;;  %s2590_s25 = sshll.u32 %s3993_s10, 4  ;;  %s2591_s25 = int_to_ptr.hbm [resolvable:$true] %s2590_s25 }
  0x2a   :  { %184 = vst [vmem:[#allocation1 + $0x30] ss:$2 sm:$0xff] %v152_v16  ;;  %541 = vmatmul.f32.vlgmr.msra.gmra.mxu2 %v3185_v21  ;;  %s2588_s23 = sshll.u32 %s3187_s22, 4  ;;  %s2604_s1 = sshll.u32 %s3994_s11, 4  ;;  %s2589_s23 = int_to_ptr.vmem [resolvable:$true] %s2588_s23  ;;  %s2605_s1 = int_to_ptr.hbm [resolvable:$true] %s2604_s1 }
  0x2b   :  { %186 = vst [vmem:[#allocation1 + $0x31] ss:$2 sm:$0xff] %v153_v17  ;;  %244 = vmatpush.msra.mxu1 %v155_v19 }
  0x2c   :  { %v187_v24 = vld.sshfl [vmem:[#allocation1] sm:$0xff pattern:$0x75316420]  ;;  %2740 = vrot.lane.b32.xlu1 %v2739_v20, %s3179_s20  ;;  %2730 = vrot.lane.b32.xlu0 %v2739_v20, %s3184_s5 }
  0x2d   :  { %947 = vmatpush.msrb.mxu1 %v3300_v12  ;;  %2622 = vmatmul.msk.f32.vlgmr.msra.gmra.mxu0 %vm191_vm0, %v187_v24 }
  0x2e   :  { %2626 = vmatmul.msk.f32.vlgmr.msra.gmra.mxu1 %vm191_vm0, %v187_v24  ;;  %v188_v26 = vld.sshfl [vmem:[#allocation1 + $0x10] sm:$0xff pattern:$0x75316420] }
  0x2f   :  { %948 = vmatpush.msrb.mxu1 %v3298_v11 }
  0x30   :  { %2750 = vrot.lane.b32.xlu2 %v2749_v25, %s3184_s5  ;;  %v189_v27 = vld.sshfl [vmem:[#allocation1 + $0x20] sm:$0xff pattern:$0x75316420] }
  0x31   :  { %949 = vmatpush.msrb.mxu1 %v3313_v23 }
  0x32   :  { %v190_v28 = vld.sshfl [vmem:[#allocation1 + $0x30] sm:$0xff pattern:$0x75316420] }
  0x33   :  { %950 = vmatpush.msrb.mxu1 %v3311_v22 }
  0x34   :  { %2760 = vrot.lane.b32.xlu1 %v2749_v25, %s3179_s20  ;;  %2755 = vrot.lane.b32.xlu0 %v2744_v15, %s3179_s20 }
  0x35   :  { %2623 = vmatmul.msk.f32.gmra.mxu0 %vm191_vm0, %v188_v26 }
  0x36   :  { %2627 = vmatmul.msk.f32.gmra.mxu1 %vm191_vm0, %v188_v26 }
  0x3d   :  { %2624 = vmatmul.msk.f32.gmra.mxu0 %vm191_vm0, %v189_v27 }
  0x3e   :  { %2628 = vmatmul.msk.f32.gmra.mxu1 %vm191_vm0, %v189_v27 }
  0x45   :  { %2625 = vmatmul.msk.f32.gmra.mxu0 %vm191_vm0, %v190_v28 }
  0x46   :  { %2629 = vmatmul.msk.f32.gmra.mxu1 %vm191_vm0, %v190_v28 }
  0x82   :  { %v2746_v35 = vpop.permute.xlu2 %2745 }
  0x83   :  { %v3358_v42 = vunpack.i.l.bf16 %v2746_v35  ;;  %v3364_v44 = vunpack.i.h.bf16 %v2746_v35 }
  0x8a   :  { %v2751_v43 = vpop.permute.xlu2 %2750 }
  0x8b   :  { %v3373_v46 = vunpack.i.l.bf16 %v2751_v43  ;;  %v3381_v48 = vunpack.i.h.bf16 %v2751_v43 }
  0x96   :  { %v2736_v29 = vpop.permute.xlu1 %2735  ;;  %v2726_v30 = vpop.permute.xlu0 %2725 }
  0x97   :  { %v3334_v31 = vunpack.i.h.bf16 %v2736_v29  ;;  %v3336_v32 = vunpack.i.l.bf16 %v2736_v29  ;;  %v3338_v33 = vunpack.i.h.bf16 %v2726_v30  ;;  %v3340_v34 = vunpack.i.l.bf16 %v2726_v30 }
  0x99   :  { %608 = vmatpush.msrb.mxu2 %v3336_v32  ;;  %573 = vmatpush.msra.mxu3 %v3340_v34 }
  0x9a   :  { %1087 = vmatpush.msra.mxu1 %v3340_v34  ;;  %871 = vmatpush.msrb.mxu0 %v3336_v32 }
  0x9b   :  { %609 = vmatpush.msrb.mxu2 %v3334_v31  ;;  %574 = vmatpush.msra.mxu3 %v3338_v33 }
  0x9c   :  { %1088 = vmatpush.msra.mxu1 %v3338_v33  ;;  %872 = vmatpush.msrb.mxu0 %v3334_v31 }
  0x9e   :  { %v2741_v36 = vpop.permute.xlu1 %2740  ;;  %v2731_v39 = vpop.permute.xlu0 %2730 }
  0x9f   :  { %v3350_v37 = vunpack.i.h.bf16 %v2741_v36  ;;  %v3352_v38 = vunpack.i.l.bf16 %v2741_v36  ;;  %v3354_v40 = vunpack.i.h.bf16 %v2731_v39  ;;  %v3356_v41 = vunpack.i.l.bf16 %v2731_v39 }
  0xa1   :  { %610 = vmatpush.msrb.mxu2 %v3352_v38  ;;  %873 = vmatpush.msrb.mxu0 %v3352_v38 }
  0xa2   :  { %575 = vmatpush.msra.mxu3 %v3356_v41  ;;  %1089 = vmatpush.msra.mxu1 %v3356_v41 }
  0xa3   :  { %611 = vmatpush.msrb.mxu2 %v3350_v37  ;;  %874 = vmatpush.msrb.mxu0 %v3350_v37 }
  0xa4   :  { %612 = vmatmul.f32.vlgmr.msrb.gmra.mxu2 %v3185_v21  ;;  %576 = vmatpush.msra.mxu3 %v3354_v40 }
  0xa5   :  { %717 = vmatpush.msra.mxu2 %v3358_v42  ;;  %577 = vmatmul.f32.vlgmr.msra.gmra.mxu3 %v3185_v21 }
  0xa6   :  { %681 = vmatpush.msrb.mxu3 %v3300_v12  ;;  %1090 = vmatpush.msra.mxu1 %v3354_v40  ;;  %v2756_v49 = vpop.permute.xlu0 %2755  ;;  %v2761_v52 = vpop.permute.xlu1 %2760 }
  0xa7   :  { %718 = vmatpush.msra.mxu2 %v3364_v44  ;;  %v3385_v50 = vunpack.i.l.bf16 %v2756_v49  ;;  %1067 = vmatpush.msra.mxu0 %v3287_v1  ;;  %v3393_v54 = vunpack.i.h.bf16 %v2756_v49  ;;  %v3405_v56 = vunpack.i.l.bf16 %v2761_v52  ;;  %v3412_v57 = vunpack.i.h.bf16 %v2761_v52 }
  0xa8   :  { %682 = vmatpush.msrb.mxu3 %v3298_v11 }
  0xa9   :  { %719 = vmatpush.msra.mxu2 %v3373_v46  ;;  %1068 = vmatpush.msra.mxu0 %v3285_v0 }
  0xaa   :  { %v217_v51 = vpop.f32.mrf.mxu0  ;;  %683 = vmatpush.msrb.mxu3 %v3313_v23 }
  0xab   :  { %v3391_v53 = vadd.f32 %v217_v51, %v3377_v47  ;;  %720 = vmatpush.msra.mxu2 %v3381_v48  ;;  %1069 = vmatpush.msra.mxu0 %v3292_v7  ;;  %v246_v3 = vpop.f32.mrf.mxu1 }
  0xac   :  { %684 = vmatpush.msrb.mxu3 %v3311_v22  ;;  %721 = vmatmul.f32.vlgmr.msra.gmra.mxu2 %v3185_v21  ;;  %v3462_v9 = vadd.f32 %v246_v3, %v161_v5 }
  0xad   :  { %v3399_v55 = vrot.slane %v3391_v53, 4  ;;  %271 = vst.msk [vmem:[#allocation2] sm:$0xf] %vm270_vm1, %v3391_v53  ;;  %831 = vmatpush.msrb.mxu2 %v3287_v1  ;;  %685 = vmatmul.f32.vlgmr.msrb.gmra.mxu3 %v3185_v21 }
  0xae   :  { %752 = vmatpush.msra.mxu3 %v3385_v50  ;;  %279 = vst [vmem:[#allocation1] ss:$2 sm:$0xff] %v3391_v53  ;;  %1070 = vmatpush.msra.mxu0 %v3294_v8  ;;  %v439_v20 = vrot.slane %v3462_v9, 4 }
  0xaf   :  { %272 = vst.msk [vmem:[#allocation2 + $0x4] sm:$0xf] %vm270_vm1, %v3399_v55  ;;  %832 = vmatpush.msrb.mxu2 %v3285_v0 }
  0xb0   :  { %753 = vmatpush.msra.mxu3 %v3393_v54  ;;  %282 = vst [vmem:[#allocation1 + $0x10] ss:$2 sm:$0xff] %v3399_v55 }
  0xb1   :  { %833 = vmatpush.msrb.mxu2 %v3292_v7  ;;  %448 = vst.msk [vmem:[#allocation2 + $0x80] sm:$0xf] %vm270_vm1, %v3462_v9 }
  0xb2   :  { %754 = vmatpush.msra.mxu3 %v3405_v56  ;;  %v220_v58 = vpop.f32.mrf.mxu0  ;;  %449 = vst.msk [vmem:[#allocation2 + $0x84] sm:$0xf] %vm270_vm1, %v439_v20 }
  0xb3   :  { %v3422_v59 = vadd.f32 %v220_v58, %v3377_v47  ;;  %834 = vmatpush.msrb.mxu2 %v3294_v8  ;;  %v249_v15 = vpop.f32.mrf.mxu1 }
  0xb4   :  { %755 = vmatpush.msra.mxu3 %v3412_v57  ;;  %v3476_v18 = vadd.f32 %v249_v15, %v161_v5  ;;  %v542_v15 = vpop.f32.mrf.mxu2 }
  0xb5   :  { %v3428_v60 = vrot.slane %v3422_v59, 4  ;;  %273 = vst.msk [vmem:[#allocation2 + $0x8] sm:$0xf] %vm270_vm1, %v3422_v59  ;;  %v280_v61 = vld.sshfl [vmem:[#allocation1] sm:$0xff pattern:$0x75316420]  ;;  %967 = vmatpush.msra.mxu2 %v3358_v42  ;;  %756 = vmatmul.f32.vlgmr.msra.gmra.mxu3 %v3185_v21 }
  0xb6   :  { %851 = vmatpush.msrb.mxu3 %v3340_v34  ;;  %285 = vst [vmem:[#allocation1 + $0x20] ss:$2 sm:$0xff] %v3422_v59  ;;  %298 = vrot.lane.b32.xlu0 %v280_v61, %s3184_s5  ;;  %v440_v21 = vrot.slane %v3476_v18, 4 }
  0xb7   :  { %274 = vst.msk [vmem:[#allocation2 + $0xc] sm:$0xf] %vm270_vm1, %v3428_v60  ;;  %968 = vmatpush.msra.mxu2 %v3364_v44  ;;  %v283_v4 = vld.sshfl [vmem:[#allocation1 + $0x10] sm:$0xff pattern:$0x75316420] }
  0xb8   :  { %852 = vmatpush.msrb.mxu3 %v3338_v33  ;;  %288 = vst [vmem:[#allocation1 + $0x30] ss:$2 sm:$0xff] %v3428_v60 }
  0xb9   :  { %969 = vmatpush.msra.mxu2 %v3373_v46  ;;  %450 = vst.msk [vmem:[#allocation2 + $0x88] sm:$0xf] %vm270_vm1, %v3476_v18 }
  0xba   :  { %853 = vmatpush.msrb.mxu3 %v3356_v41  ;;  %v223_v62 = vpop.f32.mrf.mxu0  ;;  %451 = vst.msk [vmem:[#allocation2 + $0x8c] sm:$0xf] %vm270_vm1, %v440_v21 }
  0xbb   :  { %v3445_v63 = vadd.f32 %v223_v62, %v3377_v47  ;;  %970 = vmatpush.msra.mxu2 %v3381_v48  ;;  %v252_v25 = vpop.f32.mrf.mxu1 }
  0xbc   :  { %854 = vmatpush.msrb.mxu3 %v3354_v40  ;;  %v253_v26 = vadd.f32 %v252_v25, %v161_v5 }
  0xbd   :  { %v3450_v2 = vrot.slane %v3445_v63, 4  ;;  %275 = vst.msk [vmem:[#allocation2 + $0x10] sm:$0xf] %vm270_vm1, %v3445_v63  ;;  %v3471_v16 = vld.sshfl [vmem:[#allocation1 + $0x20] sm:$0xff pattern:$0x75316420] }
  0xbe   :  { %987 = vmatpush.msra.mxu3 %v3385_v50  ;;  %290 = vst [vmem:[#allocation1] ss:$2 sm:$0xff] %v3445_v63  ;;  %v441_v30 = vrot.slane %v253_v26, 4 }
  0xbf   :  { %276 = vst.msk [vmem:[#allocation2 + $0x14] sm:$0xf] %vm270_vm1, %v3450_v2  ;;  %v3478_v19 = vld.sshfl [vmem:[#allocation1 + $0x30] sm:$0xff pattern:$0x75316420] }
  0xc0   :  { %988 = vmatpush.msra.mxu3 %v3393_v54  ;;  %292 = vst [vmem:[#allocation1 + $0x10] ss:$2 sm:$0xff] %v3450_v2 }
  0xc1   :  { %452 = vst.msk [vmem:[#allocation2 + $0x90] sm:$0xf] %vm270_vm1, %v253_v26 }
  0xc2   :  { %989 = vmatpush.msra.mxu3 %v3405_v56  ;;  %v226_v6 = vpop.f32.mrf.mxu0  ;;  %453 = vst.msk [vmem:[#allocation2 + $0x94] sm:$0xf] %vm270_vm1, %v441_v30 }
  0xc3   :  { %v227_v10 = vadd.f32 %v226_v6, %v3377_v47  ;;  %v255_v36 = vpop.f32.mrf.mxu1 }
  0xc4   :  { %990 = vmatpush.msra.mxu3 %v3412_v57  ;;  %v256_v39 = vadd.f32 %v255_v36, %v161_v5 }
  0xc5   :  { %v3467_v13 = vld.sshfl [vmem:[#allocation1] sm:$0xff pattern:$0x75316420]  ;;  %v265_v14 = vrot.slane %v227_v10, 4  ;;  %277 = vst.msk [vmem:[#allocation2 + $0x18] sm:$0xf] %vm270_vm1, %v227_v10 }
  0xc6   :  { %331 = vst [vmem:[#allocation1] ss:$2 sm:$0xff] %v3391_v53  ;;  %v442_v49 = vrot.slane %v256_v39, 4 }
  0xc7   :  { %278 = vst.msk [vmem:[#allocation2 + $0x1c] sm:$0xf] %vm270_vm1, %v265_v14  ;;  %v3474_v17 = vld.sshfl [vmem:[#allocation1 + $0x10] sm:$0xff pattern:$0x75316420] }
  0xc8   :  { %294 = vst [vmem:[#allocation1 + $0x20] ss:$2 sm:$0xff] %v227_v10 }
  0xc9   :  { %296 = vst [vmem:[#allocation1 + $0x30] ss:$2 sm:$0xff] %v265_v14 }
  0xca   :  { %334 = vst [vmem:[#allocation1 + $0x10] ss:$2 sm:$0xff] %v3399_v55 }
  0xcb   :  { %454 = vst.msk [vmem:[#allocation2 + $0x98] sm:$0xf] %vm270_vm1, %v256_v39 }
  0xcc   :  { %455 = vst.msk [vmem:[#allocation2 + $0x9c] sm:$0xf] %vm270_vm1, %v442_v49 }
  0xcd   :  { %v332_v24 = vld.sshfl [vmem:[#allocation1] sm:$0xff pattern:$0x75316420] }
  0xce   :  { %350 = vrot.lane.b32.xlu1 %v332_v24, %s3179_s20  ;;  %342 = vst [vmem:[#allocation1] ss:$2 sm:$0xff] %v3445_v63 }
  0xcf   :  { %v3489_v27 = vld.sshfl [vmem:[#allocation1 + $0x20] sm:$0xff pattern:$0x75316420] }
  0xd0   :  { %v3491_v28 = vld.sshfl [vmem:[#allocation1 + $0x30] sm:$0xff pattern:$0x75316420]  ;;  %337 = vst [vmem:[#allocation1 + $0x20] ss:$2 sm:$0xff] %v3422_v59 }
  0xd1   :  { %340 = vst [vmem:[#allocation1 + $0x30] ss:$2 sm:$0xff] %v3428_v60  ;;  %v335_v29 = vld.sshfl [vmem:[#allocation1 + $0x10] sm:$0xff pattern:$0x75316420] }
  0xd2   :  { %344 = vst [vmem:[#allocation1 + $0x10] ss:$2 sm:$0xff] %v3450_v2 }
  0xd5   :  { %v3498_v35 = vld.sshfl [vmem:[#allocation1] sm:$0xff pattern:$0x75316420] }
  0xd6   :  { %383 = vst [vmem:[#allocation1] ss:$2 sm:$0xff] %v3391_v53  ;;  %300 = vrot.lane.b32.xlu1 %v283_v4, %s3184_s5 }
  0xd7   :  { %v338_v43 = vld.sshfl [vmem:[#allocation1 + $0x20] sm:$0xff pattern:$0x75316420] }
  0xd8   :  { %v341_v45 = vld.sshfl [vmem:[#allocation1 + $0x30] sm:$0xff pattern:$0x75316420]  ;;  %346 = vst [vmem:[#allocation1 + $0x20] ss:$2 sm:$0xff] %v227_v10 }
  0xd9   :  { %348 = vst [vmem:[#allocation1 + $0x30] ss:$2 sm:$0xff] %v265_v14  ;;  %v3502_v47 = vld.sshfl [vmem:[#allocation1 + $0x10] sm:$0xff pattern:$0x75316420] }
  0xda   :  { %386 = vst [vmem:[#allocation1 + $0x10] ss:$2 sm:$0xff] %v3399_v55 }
  0xdd   :  { %v3507_v51 = vld.sshfl [vmem:[#allocation1] sm:$0xff pattern:$0x75316420] }
  0xde   :  { %394 = vst [vmem:[#allocation1] ss:$2 sm:$0xff] %v3445_v63 }
  0xdf   :  { %v347_v52 = vld.sshfl [vmem:[#allocation1 + $0x20] sm:$0xff pattern:$0x75316420] }
  0xe0   :  { %389 = vst [vmem:[#allocation1 + $0x20] ss:$2 sm:$0xff] %v3422_v59  ;;  %v3511_v53 = vld.sshfl [vmem:[#allocation1 + $0x30] sm:$0xff pattern:$0x75316420] }
  0xe1   :  { %v3513_v58 = vld.sshfl [vmem:[#allocation1 + $0x10] sm:$0xff pattern:$0x75316420]  ;;  %392 = vst [vmem:[#allocation1 + $0x30] ss:$2 sm:$0xff] %v3428_v60 }
  0xe2   :  { %396 = vst [vmem:[#allocation1 + $0x10] ss:$2 sm:$0xff] %v3450_v2 }
  0xe5   :  { %v395_v55 = vld.sshfl [vmem:[#allocation1] sm:$0xff pattern:$0x75316420] }
  0xe6   :  { %456 = vst [vmem:[#allocation1] ss:$2 sm:$0xff] %v3462_v9 }
  0xe7   :  { %v390_v61 = vld.sshfl [vmem:[#allocation1 + $0x20] sm:$0xff pattern:$0x75316420] }
  0xe8   :  { %398 = vst [vmem:[#allocation1 + $0x20] ss:$2 sm:$0xff] %v227_v10  ;;  %v393_v62 = vld.sshfl [vmem:[#allocation1 + $0x30] sm:$0xff pattern:$0x75316420] }
  0xe9   :  { %v397_v3 = vld.sshfl [vmem:[#allocation1 + $0x10] sm:$0xff pattern:$0x75316420]  ;;  %400 = vst [vmem:[#allocation1 + $0x30] ss:$2 sm:$0xff] %v265_v14 }
  0xea   :  { %412 = vrot.lane.b32.xlu1 %v397_v3, %s3186_s8  ;;  %459 = vst [vmem:[#allocation1 + $0x10] ss:$2 sm:$0xff] %v439_v20  ;;  %v518_v14 = vld [vmem:[#allocation2] sm:$0xf] }
  0xed   :  { %v3519_v59 = vld.sshfl [vmem:[#allocation1] sm:$0xff pattern:$0x75316420] }
  0xee   :  { %467 = vst [vmem:[#allocation1] ss:$2 sm:$0xff] %v253_v26 }
  0xef   :  { %v399_v63 = vld.sshfl [vmem:[#allocation1 + $0x20] sm:$0xff pattern:$0x75316420] }
  0xf0   :  { %462 = vst [vmem:[#allocation1 + $0x20] ss:$2 sm:$0xff] %v3476_v18  ;;  %414 = vrot.lane.b32.xlu0 %v399_v63, %s3186_s8  ;;  %v401_v60 = vld.sshfl [vmem:[#allocation1 + $0x30] sm:$0xff pattern:$0x75316420]  ;;  %v616_v18 = vadd.f32 %v542_v15, %v518_v14 }
  0xf1   :  { %v3523_v2 = vld.sshfl [vmem:[#allocation1 + $0x10] sm:$0xff pattern:$0x75316420]  ;;  %416 = vrot.lane.b32.xlu2 %v401_v60, %s3186_s8  ;;  %465 = vst [vmem:[#allocation1 + $0x30] ss:$2 sm:$0xff] %v440_v21 }
  0xf2   :  { %469 = vst [vmem:[#allocation1 + $0x10] ss:$2 sm:$0xff] %v441_v30  ;;  %v2630_v20 = vmul.f32 -1.442695, %v616_v18  ;;  %v666_v60 = vld [vmem:[#allocation2 + $0x9c] sm:$0xf] }
  0xf4   :  { %2767 = vpow2.f32 %v2630_v20 }
  0xf7   :  { %v463_v4 = vld.sshfl [vmem:[#allocation1 + $0x20] sm:$0xff pattern:$0x75316420] }
  0xf8   :  { %v466_v5 = vld.sshfl [vmem:[#allocation1 + $0x30] sm:$0xff pattern:$0x75316420]  ;;  %471 = vst [vmem:[#allocation1 + $0x20] ss:$2 sm:$0xff] %v256_v39 }
  0xf9   :  { %473 = vst [vmem:[#allocation1 + $0x30] ss:$2 sm:$0xff] %v442_v49  ;;  %v470_v6 = vld.sshfl [vmem:[#allocation1 + $0x10] sm:$0xff pattern:$0x75316420] }
  0xfa   :  { %485 = vrot.lane.b32.xlu1 %v470_v6, %s3184_s5 }
  0xff   :  { %v472_v9 = vld.sshfl [vmem:[#allocation1 + $0x20] sm:$0xff pattern:$0x75316420] }
 0x100   :  { %487 = vrot.lane.b32.xlu0 %v472_v9, %s3184_s5  ;;  %v474_v10 = vld.sshfl [vmem:[#allocation1 + $0x30] sm:$0xff pattern:$0x75316420] }
 0x101   :  { %489 = vrot.lane.b32.xlu2 %v474_v10, %s3184_s5 }
 0x102   :  { %356 = vrot.lane.b32.xlu1 %v341_v45, %s3179_s20 }
 0x108   :  { %354 = vrot.lane.b32.xlu0 %v338_v43, %s3179_s20 }
 0x109   :  { %352 = vrot.lane.b32.xlu2 %v335_v29, %s3179_s20 }
 0x10a   :  { %306 = vrot.lane.b32.xlu1 %v3467_v13, %s3184_s5  ;;  %v468_v13 = vld.sshfl [vmem:[#allocation1] sm:$0xff pattern:$0x75316420] }
 0x110   :  { %304 = vrot.lane.b32.xlu0 %v3478_v19, %s3184_s5 }
 0x111   :  { %302 = vrot.lane.b32.xlu2 %v3471_v16, %s3184_s5  ;;  %v2768_v16 = vpop.eup %2767 }
 0x112   :  { %406 = vrot.lane.b32.xlu1 %v390_v61, %s3186_s8  ;;  %v620_v19 = vadd.f32 1.0, %v2768_v16 }
 0x114   :  { %2769 = vrcp.f32 %v620_v19  ;;  %vm626_vm3 = vweird.f32 %v620_v19 }
 0x118   :  { %408 = vrot.lane.b32.xlu0 %v393_v62, %s3186_s8 }
 0x119   :  { %410 = vrot.lane.b32.xlu2 %v395_v55, %s3186_s8 }
 0x11a   :  { %479 = vrot.lane.b32.xlu1 %v463_v4, %s3184_s5  ;;  %v2770_v25 = vpop.eup %2769 }
 0x11b   :  { %v622_v30 = vmul.f32 %v2770_v25, %v620_v19  ;;  %vm627_vm2 = vweird.f32 %v2770_v25 }
 0x11c   :  { %vm628_vm4 = vmor %vm626_vm3, %vm627_vm2 }
 0x11d   :  { %v623_v39 = vsub.f32 1.0, %v622_v30 }
 0x11f   :  { %v624_v43 = vmul.f32 %v2770_v25, %v623_v39 }
 0x120   :  { %481 = vrot.lane.b32.xlu0 %v466_v5, %s3184_s5 }
 0x121   :  { %483 = vrot.lane.b32.xlu2 %v468_v13, %s3184_s5 }
 0x122   :  { %362 = vrot.lane.b32.xlu1 %v347_v52, %s3179_s20 }
 0x128   :  { %360 = vrot.lane.b32.xlu0 %v3502_v47, %s3179_s20  ;;  %v299_v21 = vpop.permute.xlu0 %298  ;;  %v578_v24 = vpop.f32.mrf.mxu3  ;;  %v632_v47 = vand.u32 2147483648, %v620_v19 }
 0x129   :  { %323 = vst.msk [vmem:[#allocation2 + $0x20] sm:$0xf] %vm270_vm1, %v299_v21  ;;  %358 = vrot.lane.b32.xlu2 %v3498_v35, %s3179_s20 }
 0x12a   :  { %312 = vrot.lane.b32.xlu1 %v3491_v28, %s3184_s5  ;;  %v613_v28 = vpop.f32.mrf.mxu2  ;;  %v633_v61 = vor.u32 1.1754944e-38, %v632_v47 }
 0x130   :  { %310 = vrot.lane.b32.xlu0 %v3489_v27, %s3184_s5  ;;  %v519_v26 = vld [vmem:[#allocation2 + $0x20] sm:$0xf]  ;;  %v3563_v27 = vld [vmem:[%s3987_s4] ss:$0 sm:$0xff] }
 0x131   :  { %v636_v29 = vadd.f32 %v578_v24, %v519_v26  ;;  %308 = vrot.lane.b32.xlu2 %v3474_v17, %s3184_s5  ;;  %v625_v17 = vadd.f32 %v2770_v25, %v624_v43  ;;  %v614_v52 = vadd.f32 %v3563_v27, %v613_v28  ;;  %v686_v26 = vpop.f32.mrf.mxu3 }
 0x132   :  { %v722_v62 = vpop.f32.mrf.mxu2 }
 0x133   :  { %v2631_v36 = vmul.f32 -1.442695, %v636_v29  ;;  %v780_v5 = vadd.f32 %v722_v62, %v666_v60 }
 0x135   :  { %2771 = vpow2.f32 %v2631_v36  ;;  %v2633_v20 = vmul.f32 -1.442695, %v780_v5 }
 0x138   :  { %402 = vrot.lane.b32.xlu0 %v3507_v51, %s3186_s8  ;;  %v630_v51 = vand.u32 2147483647, %v620_v19 }
 0x139   :  { %404 = vrot.lane.b32.xlu2 %v3513_v58, %s3186_s8  ;;  %v629_v58 = vsel %vm628_vm4, %v2770_v25, %v625_v17 }
 0x13a   :  { %vm631_vm5 = vcmp.eq.f32.partialorder %v630_v51, 8.507059e+37 }
 0x13b   :  { %v2772_v35 = vpop.eup %2771  ;;  %v634_v63 = vsel %vm631_vm5, %v633_v61, %v629_v58  ;;  %v3608_v61 = vld [vmem:[%s3989_s6] ss:$0 sm:$0xff] }
 0x13c   :  { %v640_v45 = vadd.f32 1.0, %v2772_v35 }
 0x13e   :  { %2773 = vrcp.f32 %v640_v45  ;;  %v652_v6 = vand.u32 2147483648, %v640_v45  ;;  %vm646_vm7 = vweird.f32 %v640_v45 }
 0x140   :  { %475 = vrot.lane.b32.xlu0 %v3519_v59, %s3184_s5  ;;  %v351_v49 = vpop.permute.xlu1 %350  ;;  %v656_v59 = vmul.f32 %v634_v63, %v614_v52  ;;  %v653_v16 = vor.u32 1.1754944e-38, %v652_v6 }
 0x141   :  { %375 = vst.msk [vmem:[#allocation2 + $0x40] sm:$0xf] %vm270_vm1, %v351_v49  ;;  %477 = vrot.lane.b32.xlu2 %v3523_v2, %s3184_s5  ;;  %v650_v2 = vand.u32 2147483647, %v640_v45 }
 0x143   :  { %vm651_vm9 = vcmp.eq.f32.partialorder %v650_v2, 8.507059e+37 }
 0x144   :  { %v2774_v55 = vpop.eup %2773 }
 0x145   :  { %v642_v3 = vmul.f32 %v2774_v55, %v640_v45  ;;  %vm647_vm6 = vweird.f32 %v2774_v55 }
 0x146   :  { %vm648_vm8 = vmor %vm646_vm7, %vm647_vm6 }
 0x147   :  { %v643_v4 = vsub.f32 1.0, %v642_v3  ;;  %v757_v3 = vpop.f32.mrf.mxu3 }
 0x148   :  { %v301_v9 = vpop.permute.xlu1 %300  ;;  %v520_v10 = vld [vmem:[#allocation2 + $0x40] sm:$0xf]  ;;  %v758_v6 = vadd.f32 %v3608_v61, %v757_v3 }
 0x149   :  { %v644_v14 = vmul.f32 %v2774_v55, %v643_v4  ;;  %324 = vst.msk [vmem:[#allocation2 + $0x24] sm:$0xf] %vm270_vm1, %v301_v9  ;;  %364 = vrot.lane.b32.xlu2 %v3511_v53, %s3179_s20  ;;  %v657_v15 = vadd.f32 %v656_v59, %v520_v10 }
 0x14b   :  { %v645_v18 = vadd.f32 %v2774_v55, %v644_v14  ;;  %v417_v13 = vpop.permute.xlu2 %416  ;;  %2775 = vtanh.f32 %v657_v15 }
 0x14c   :  { %434 = vst.msk [vmem:[#allocation2 + $0x7c] sm:$0xf] %vm270_vm1, %v417_v13  ;;  %2777 = vpow2.f32 %v2633_v20 }
 0x14d   :  { %v649_v19 = vsel %vm648_vm8, %v2774_v55, %v645_v18 }
 0x14e   :  { %v654_v21 = vsel %vm651_vm9, %v653_v16, %v649_v19 }
 0x14f   :  { %v659_v24 = vsub.f32 1.0, %v654_v21  ;;  %v661_v30 = vmul.f32 0.0, %v654_v21 }
 0x151   :  { %v2776_v25 = vpop.eup %2775 }
 0x152   :  { %v660_v29 = vmul.f32 %v2776_v25, %v659_v24  ;;  %v2778_v28 = vpop.eup %2777 }
 0x153   :  { %v664_v53 = vld [vmem:[#allocation2 + $0x7c] sm:$0xf]  ;;  %v3586_v43 = vadd.f32 1.0, %v2778_v28 }
 0x154   :  { %v760_v36 = vadd.f32 %v686_v26, %v664_v53  ;;  %v3575_v39 = vadd.f32 %v661_v30, %v660_v29 }
 0x155   :  { %v796_v20 = vand.u32 2147483648, %v3586_v43  ;;  %vm790_vm0 = vweird.f32 %v3586_v43  ;;  %v794_v19 = vand.u32 2147483647, %v3586_v43 }
 0x156   :  { %v2632_v35 = vmul.f32 -1.442695, %v760_v36  ;;  %807 = vst.msk [vmem:[#allocation3] sm:$0xf] %vm270_vm1, %v3575_v39  ;;  %2634 = vmatmul.msk.f32.vlgmr.msrb.gmra.mxu2 %vm521_vm10, %v3575_v39  ;;  %2635 = vmatmul.msk.f32.vlgmr.msrb.gmra.mxu3 %vm521_vm10, %v3575_v39 }
 0x157   :  { %2636 = vmatmul.msk.f32.vlgmr.msrb.gmra.mxu0 %vm521_vm10, %v3575_v39  ;;  %1107 = vmatpush.msrb.mxu2 %v3336_v32  ;;  %v797_v29 = vor.u32 1.1754944e-38, %v796_v20  ;;  %vm795_vm3 = vcmp.eq.f32.partialorder %v794_v19, 8.507059e+37 }
 0x158   :  { %2779 = vpow2.f32 %v2632_v35  ;;  %1203 = vmatpush.msrb.mxu0 %v3358_v42  ;;  %1183 = vmatpush.msrb.mxu3 %v3300_v12 }
 0x159   :  { %1108 = vmatpush.msrb.mxu2 %v3334_v31  ;;  %2781 = vrcp.f32 %v3586_v43 }
 0x15a   :  { %1204 = vmatpush.msrb.mxu0 %v3364_v44  ;;  %1184 = vmatpush.msrb.mxu3 %v3298_v11 }
 0x15b   :  { %v490_v45 = vpop.permute.xlu2 %489  ;;  %1109 = vmatpush.msrb.mxu2 %v3352_v38 }
 0x15c   :  { %507 = vst.msk [vmem:[#allocation2 + $0xbc] sm:$0xf] %vm270_vm1, %v490_v45  ;;  %1205 = vmatpush.msrb.mxu0 %v3373_v46  ;;  %v413_v17 = vpop.permute.xlu1 %412  ;;  %1185 = vmatpush.msrb.mxu3 %v3313_v23 }
 0x15d   :  { %432 = vst.msk [vmem:[#allocation2 + $0x74] sm:$0xf] %vm270_vm1, %v413_v17  ;;  %1110 = vmatpush.msrb.mxu2 %v3350_v37 }
 0x15e   :  { %v2780_v12 = vpop.eup %2779  ;;  %1206 = vmatpush.msrb.mxu0 %v3381_v48  ;;  %1186 = vmatpush.msrb.mxu3 %v3311_v22 }
 0x15f   :  { %v764_v11 = vadd.f32 1.0, %v2780_v12  ;;  %v2782_v47 = vpop.eup %2781 }
 0x160   :  { %v786_v23 = vmul.f32 %v2782_v47, %v3586_v43  ;;  %vm791_vm15 = vweird.f32 %v2782_v47 }
 0x161   :  { %2783 = vrcp.f32 %v764_v11  ;;  %v776_v63 = vand.u32 2147483648, %v764_v11  ;;  %v774_v4 = vand.u32 2147483647, %v764_v11  ;;  %vm770_vm12 = vweird.f32 %v764_v11  ;;  %vm792_vm2 = vmor %vm790_vm0, %vm791_vm15 }
 0x162   :  { %v415_v49 = vpop.permute.xlu0 %414  ;;  %v787_v55 = vsub.f32 1.0, %v786_v23 }
 0x163   :  { %433 = vst.msk [vmem:[#allocation2 + $0x78] sm:$0xf] %vm270_vm1, %v415_v49  ;;  %v353_v51 = vpop.permute.xlu2 %352  ;;  %v777_v10 = vor.u32 1.1754944e-38, %v776_v63  ;;  %vm775_vm14 = vcmp.eq.f32.partialorder %v774_v4, 8.507059e+37  ;;  %v668_v15 = vld [vmem:[#allocation2 + $0xbc] sm:$0xf] }
 0x164   :  { %376 = vst.msk [vmem:[#allocation2 + $0x44] sm:$0xf] %vm270_vm1, %v353_v51  ;;  %v788_v5 = vmul.f32 %v2782_v47, %v787_v55  ;;  %v813_v4 = vld [vmem:[#allocation2 + $0x24] sm:$0xf] }
 0x166   :  { %v789_v2 = vadd.f32 %v2782_v47, %v788_v5 }
 0x167   :  { %v2784_v52 = vpop.eup %2783 }
 0x168   :  { %v766_v58 = vmul.f32 %v2784_v52, %v764_v11  ;;  %vm771_vm11 = vweird.f32 %v2784_v52  ;;  %v793_v26 = vsel %vm792_vm2, %v2782_v47, %v789_v2 }
 0x169   :  { %vm772_vm13 = vmor %vm770_vm12, %vm771_vm11  ;;  %v798_v30 = vsel %vm795_vm3, %v797_v29, %v793_v26 }
 0x16a   :  { %v767_v22 = vsub.f32 1.0, %v766_v58  ;;  %v803_v36 = vsub.f32 1.0, %v798_v30  ;;  %v805_v17 = vmul.f32 0.0, %v798_v30 }
 0x16b   :  { %v303_v62 = vpop.permute.xlu2 %302 }
 0x16c   :  { %325 = vst.msk [vmem:[#allocation2 + $0x28] sm:$0xf] %vm270_vm1, %v303_v62  ;;  %v486_v60 = vpop.permute.xlu1 %485  ;;  %v768_v59 = vmul.f32 %v2784_v52, %v767_v22 }
 0x16d   :  { %505 = vst.msk [vmem:[#allocation2 + $0xb4] sm:$0xf] %vm270_vm1, %v486_v60  ;;  %v811_v60 = vld [vmem:[#allocation2 + $0x4] sm:$0xf] }
 0x16e   :  { %v769_v9 = vadd.f32 %v2784_v52, %v768_v59 }
 0x170   :  { %v773_v14 = vsel %vm772_vm13, %v2784_v52, %v769_v9 }
 0x171   :  { %v778_v18 = vsel %vm775_vm14, %v777_v10, %v773_v14 }
 0x172   :  { %v800_v13 = vmul.f32 %v778_v18, %v758_v6  ;;  %v488_v16 = vpop.permute.xlu0 %487 }
 0x173   :  { %506 = vst.msk [vmem:[#allocation2 + $0xb8] sm:$0xf] %vm270_vm1, %v488_v16  ;;  %v411_v21 = vpop.permute.xlu2 %410 }
 0x174   :  { %v801_v24 = vadd.f32 %v800_v13, %v668_v15  ;;  %431 = vst.msk [vmem:[#allocation2 + $0x70] sm:$0xf] %vm270_vm1, %v411_v21  ;;  %v357_v25 = vpop.permute.xlu1 %356 }
 0x175   :  { %378 = vst.msk [vmem:[#allocation2 + $0x4c] sm:$0xf] %vm270_vm1, %v357_v25 }
 0x176   :  { %2785 = vtanh.f32 %v801_v24 }
 0x17a   :  { %v355_v53 = vpop.permute.xlu0 %354 }
 0x17b   :  { %377 = vst.msk [vmem:[#allocation2 + $0x48] sm:$0xf] %vm270_vm1, %v355_v53  ;;  %v484_v28 = vpop.permute.xlu2 %483 }
 0x17c   :  { %v2786_v35 = vpop.eup %2785  ;;  %504 = vst.msk [vmem:[#allocation2 + $0xb0] sm:$0xf] %vm270_vm1, %v484_v28  ;;  %v307_v43 = vpop.permute.xlu1 %306 }
 0x17d   :  { %v804_v45 = vmul.f32 %v2786_v35, %v803_v36  ;;  %327 = vst.msk [vmem:[#allocation2 + $0x30] sm:$0xf] %vm270_vm1, %v307_v43 }
 0x17f   :  { %v3622_v12 = vadd.f32 %v805_v17, %v804_v45 }
 0x181   :  { %809 = vst.msk [vmem:[#allocation4 + $0x1c] sm:$0xf] %vm270_vm1, %v3622_v12  ;;  %2639 = vmatmul.msk.f32.vlgmr.msrb.gmra.mxu1 %vm521_vm10, %v3622_v12  ;;  %2640 = vmatmul.msk.f32.vlgmr.msra.gmra.mxu2 %vm521_vm10, %v3622_v12 }
 0x182   :  { %1223 = vmatpush.msrb.mxu1 %v3385_v50  ;;  %v305_v11 = vpop.permute.xlu0 %304  ;;  %2641 = vmatmul.msk.f32.vlgmr.msra.gmra.mxu3 %vm521_vm10, %v3622_v12 }
 0x183   :  { %326 = vst.msk [vmem:[#allocation2 + $0x2c] sm:$0xf] %vm270_vm1, %v305_v11  ;;  %1323 = vmatpush.msra.mxu3 %v3340_v34  ;;  %v359_v47 = vpop.permute.xlu2 %358  ;;  %1303 = vmatpush.msra.mxu2 %v3287_v1 }
 0x184   :  { %1224 = vmatpush.msrb.mxu1 %v3393_v54  ;;  %379 = vst.msk [vmem:[#allocation2 + $0x50] sm:$0xf] %vm270_vm1, %v359_v47  ;;  %v407_v49 = vpop.permute.xlu1 %406 }
 0x185   :  { %1324 = vmatpush.msra.mxu3 %v3338_v33  ;;  %429 = vst.msk [vmem:[#allocation2 + $0x68] sm:$0xf] %vm270_vm1, %v407_v49  ;;  %1304 = vmatpush.msra.mxu2 %v3285_v0 }
 0x186   :  { %1225 = vmatpush.msrb.mxu1 %v3405_v56 }
 0x187   :  { %1325 = vmatpush.msra.mxu3 %v3356_v41  ;;  %1305 = vmatpush.msra.mxu2 %v3292_v7 }
 0x188   :  { %1226 = vmatpush.msrb.mxu1 %v3412_v57 }
 0x189   :  { %1326 = vmatpush.msra.mxu3 %v3354_v40  ;;  %1306 = vmatpush.msra.mxu2 %v3294_v8 }
 0x18a   :  { %v409_v1 = vpop.permute.xlu0 %408 }
 0x18b   :  { %430 = vst.msk [vmem:[#allocation2 + $0x6c] sm:$0xf] %vm270_vm1, %v409_v1  ;;  %v309_v51 = vpop.permute.xlu2 %308 }
 0x18c   :  { %328 = vst.msk [vmem:[#allocation2 + $0x34] sm:$0xf] %vm270_vm1, %v309_v51  ;;  %v480_v23 = vpop.permute.xlu1 %479  ;;  %v815_v51 = vld [vmem:[#allocation2 + $0x44] sm:$0xf] }
 0x18d   :  { %502 = vst.msk [vmem:[#allocation2 + $0xa8] sm:$0xf] %vm270_vm1, %v480_v23 }
 0x192   :  { %v482_v0 = vpop.permute.xlu0 %481 }
 0x193   :  { %503 = vst.msk [vmem:[#allocation2 + $0xac] sm:$0xf] %vm270_vm1, %v482_v0  ;;  %v405_v52 = vpop.permute.xlu2 %404 }
 0x194   :  { %428 = vst.msk [vmem:[#allocation2 + $0x64] sm:$0xf] %vm270_vm1, %v405_v52  ;;  %v363_v7 = vpop.permute.xlu1 %362 }
 0x195   :  { %381 = vst.msk [vmem:[#allocation2 + $0x58] sm:$0xf] %vm270_vm1, %v363_v7  ;;  %v927_v7 = vld [vmem:[#allocation2 + $0x78] sm:$0xf] }
 0x19a   :  { %v361_v58 = vpop.permute.xlu0 %360 }
 0x19b   :  { %380 = vst.msk [vmem:[#allocation2 + $0x54] sm:$0xf] %vm270_vm1, %v361_v58  ;;  %v478_v8 = vpop.permute.xlu2 %477 }
 0x19c   :  { %501 = vst.msk [vmem:[#allocation2 + $0xa4] sm:$0xf] %vm270_vm1, %v478_v8  ;;  %v313_v55 = vpop.permute.xlu1 %312 }
 0x19d   :  { %330 = vst.msk [vmem:[#allocation2 + $0x3c] sm:$0xf] %vm270_vm1, %v313_v55 }
 0x1a2   :  { %v311_v22 = vpop.permute.xlu0 %310 }
 0x1a3   :  { %329 = vst.msk [vmem:[#allocation2 + $0x38] sm:$0xf] %vm270_vm1, %v311_v22  ;;  %v365_v62 = vpop.permute.xlu2 %364 }
 0x1a4   :  { %382 = vst.msk [vmem:[#allocation2 + $0x5c] sm:$0xf] %vm270_vm1, %v365_v62 }
 0x1aa   :  { %v403_v3 = vpop.permute.xlu0 %402 }
 0x1ab   :  { %427 = vst.msk [vmem:[#allocation2 + $0x60] sm:$0xf] %vm270_vm1, %v403_v3 }
 0x1b2   :  { %v476_v63 = vpop.permute.xlu0 %475 }
 0x1b3   :  { %500 = vst.msk [vmem:[#allocation2 + $0xa0] sm:$0xf] %vm270_vm1, %v476_v63 }
 0x1d4   :  { %v876_v53 = vpop.f32.mrf.mxu0 }
 0x1d5   :  { %v877_v43 = vadd.f32 %v3563_v27, %v876_v53 }
 0x1d9   :  { %v836_v59 = vpop.f32.mrf.mxu2  ;;  %v856_v5 = vpop.f32.mrf.mxu3 }
 0x1da   :  { %v879_v6 = vadd.f32 %v836_v59, %v811_v60  ;;  %v899_v9 = vadd.f32 %v856_v5, %v813_v4  ;;  %v929_v59 = vld [vmem:[#allocation2 + $0x98] sm:$0xf] }
 0x1dc   :  { %v2637_v10 = vmul.f32 -1.442695, %v879_v6  ;;  %v2638_v14 = vmul.f32 -1.442695, %v899_v9 }
 0x1de   :  { %2787 = vpow2.f32 %v2637_v10  ;;  %v3674_v10 = vld [vmem:[#allocation13 + $0x18] sm:$0xff] }
 0x1df   :  { %2789 = vpow2.f32 %v2638_v14 }
 0x1e4   :  { %v2788_v2 = vpop.eup %2787 }
 0x1e5   :  { %v2790_v15 = vpop.eup %2789  ;;  %v883_v18 = vadd.f32 1.0, %v2788_v2  ;;  %v3679_v2 = vld [vmem:[#allocation13 + $0x10] sm:$0xff] }
 0x1e6   :  { %v903_v20 = vadd.f32 1.0, %v2790_v15  ;;  %v3684_v15 = vld [vmem:[#allocation13 + $0x8] sm:$0xff] }
 0x1e7   :  { %2791 = vrcp.f32 %v883_v18  ;;  %v895_v25 = vand.u32 2147483648, %v883_v18  ;;  %v893_v30 = vand.u32 2147483647, %v883_v18  ;;  %vm889_vm5 = vweird.f32 %v883_v18 }
 0x1e8   :  { %2793 = vrcp.f32 %v903_v20  ;;  %v915_v49 = vand.u32 2147483648, %v903_v20  ;;  %vm909_vm9 = vweird.f32 %v903_v20  ;;  %v913_v1 = vand.u32 2147483647, %v903_v20 }
 0x1e9   :  { %v896_v35 = vor.u32 1.1754944e-38, %v895_v25  ;;  %vm894_vm7 = vcmp.eq.f32.partialorder %v893_v30, 8.507059e+37 }
 0x1ea   :  { %v916_v52 = vor.u32 1.1754944e-38, %v915_v49  ;;  %vm914_vm12 = vcmp.eq.f32.partialorder %v913_v1, 8.507059e+37 }
 0x1ed   :  { %v2792_v13 = vpop.eup %2791 }
 0x1ee   :  { %v2794_v16 = vpop.eup %2793  ;;  %v885_v19 = vmul.f32 %v2792_v13, %v883_v18  ;;  %vm890_vm4 = vweird.f32 %v2792_v13 }
 0x1ef   :  { %v905_v21 = vmul.f32 %v2794_v16, %v903_v20  ;;  %vm891_vm6 = vmor %vm889_vm5, %vm890_vm4  ;;  %vm910_vm8 = vweird.f32 %v2794_v16  ;;  %v3689_v20 = vld [vmem:[#allocation13] sm:$0xff] }
 0x1f0   :  { %v886_v24 = vsub.f32 1.0, %v885_v19  ;;  %vm911_vm11 = vmor %vm909_vm9, %vm910_vm8 }
 0x1f1   :  { %v906_v26 = vsub.f32 1.0, %v905_v21 }
 0x1f2   :  { %v887_v29 = vmul.f32 %v2792_v13, %v886_v24 }
 0x1f3   :  { %v907_v36 = vmul.f32 %v2794_v16, %v906_v26 }
 0x1f4   :  { %v888_v28 = vadd.f32 %v2792_v13, %v887_v29 }
 0x1f5   :  { %v908_v11 = vadd.f32 %v2794_v16, %v907_v36 }
 0x1f6   :  { %v892_v45 = vsel %vm891_vm6, %v2792_v13, %v888_v28 }
 0x1f7   :  { %v897_v17 = vsel %vm894_vm7, %v896_v35, %v892_v45  ;;  %v912_v0 = vsel %vm911_vm11, %v2794_v16, %v908_v11 }
 0x1f8   :  { %v919_v47 = vmul.f32 %v897_v17, %v877_v43  ;;  %v917_v8 = vsel %vm914_vm12, %v916_v52, %v912_v0 }
 0x1f9   :  { %v922_v62 = vsub.f32 1.0, %v917_v8  ;;  %v924_v60 = vmul.f32 %v917_v8, %v3575_v39 }
 0x1fa   :  { %v920_v23 = vadd.f32 %v919_v47, %v815_v51  ;;  %v931_v51 = vld [vmem:[#allocation2 + $0xb8] sm:$0xf] }
 0x1fc   :  { %2795 = vtanh.f32 %v920_v23 }
 0x1fe   :  { %v952_v58 = vpop.f32.mrf.mxu1 }
 0x1ff   :  { %v995_v55 = vadd.f32 %v952_v58, %v927_v7 }
 0x201   :  { %v2642_v22 = vmul.f32 -1.442695, %v995_v55 }
 0x202   :  { %v2796_v3 = vpop.eup %2795 }
 0x203   :  { %2797 = vpow2.f32 %v2642_v22  ;;  %v923_v63 = vmul.f32 %v2796_v3, %v922_v62 }
 0x204   :  { %v972_v4 = vpop.f32.mrf.mxu2 }
 0x205   :  { %v1015_v5 = vadd.f32 %v972_v4, %v929_v59  ;;  %v3662_v6 = vadd.f32 %v924_v60, %v923_v63  ;;  %v992_v30 = vpop.f32.mrf.mxu3  ;;  %v3706_v63 = vld [vmem:[#allocation11 + $0x18] sm:$0xff]  ;;  %v3716_v60 = vld [vmem:[#allocation11 + $0x8] sm:$0xff]  ;;  %v3721_v59 = vld [vmem:[#allocation11] sm:$0xff] }
 0x206   :  { %v993_v43 = vadd.f32 %v3608_v61, %v992_v30  ;;  %v1047_v4 = vld [vmem:[#allocation2 + $0x8] sm:$0xf] }
 0x207   :  { %v2643_v9 = vmul.f32 -1.442695, %v1015_v5  ;;  %1043 = vst.msk [vmem:[#allocation3 + $0x4] sm:$0xf] %vm270_vm1, %v3662_v6  ;;  %2644 = vmatmul.msk.f32.vlgmr.msra.gmra.mxu0 %vm521_vm10, %v3662_v6  ;;  %2645 = vmatmul.msk.f32.vlgmr.msra.gmra.mxu1 %vm521_vm10, %v3662_v6 }
 0x208   :  { %2646 = vmatmul.msk.f32.vlgmr.msrb.gmra.mxu2 %vm521_vm10, %v3662_v6  ;;  %1343 = vmatpush.msra.mxu0 %v3336_v32 }
 0x209   :  { %v2798_v39 = vpop.eup %2797  ;;  %2799 = vpow2.f32 %v2643_v9  ;;  %1439 = vmatpush.msrb.mxu2 %v3358_v42  ;;  %1419 = vmatpush.msra.mxu1 %v3674_v10  ;;  %v1049_v9 = vld [vmem:[#allocation2 + $0x28] sm:$0xf] }
 0x20a   :  { %v999_v14 = vadd.f32 1.0, %v2798_v39  ;;  %1344 = vmatpush.msra.mxu0 %v3334_v31 }
 0x20b   :  { %1440 = vmatpush.msrb.mxu2 %v3364_v44  ;;  %1420 = vmatpush.msra.mxu1 %v3679_v2 }
 0x20c   :  { %2801 = vrcp.f32 %v999_v14  ;;  %1345 = vmatpush.msra.mxu0 %v3352_v38  ;;  %v1011_v24 = vand.u32 2147483648, %v999_v14  ;;  %v1009_v26 = vand.u32 2147483647, %v999_v14  ;;  %vm1005_vm14 = vweird.f32 %v999_v14 }
 0x20d   :  { %1441 = vmatpush.msrb.mxu2 %v3373_v46  ;;  %1421 = vmatpush.msra.mxu1 %v3684_v15 }
 0x20e   :  { %1346 = vmatpush.msra.mxu0 %v3350_v37  ;;  %v1012_v28 = vor.u32 1.1754944e-38, %v1011_v24  ;;  %vm1010_vm0 = vcmp.eq.f32.partialorder %v1009_v26, 8.507059e+37 }
 0x20f   :  { %v2800_v18 = vpop.eup %2799  ;;  %1442 = vmatpush.msrb.mxu2 %v3381_v48  ;;  %1422 = vmatpush.msra.mxu1 %v3689_v20 }
 0x210   :  { %v1019_v13 = vadd.f32 1.0, %v2800_v18 }
 0x212   :  { %v2802_v16 = vpop.eup %2801  ;;  %2803 = vrcp.f32 %v1019_v13  ;;  %v1031_v47 = vand.u32 2147483648, %v1019_v13  ;;  %v1029_v1 = vand.u32 2147483647, %v1019_v13  ;;  %vm1025_vm3 = vweird.f32 %v1019_v13 }
 0x213   :  { %v1001_v19 = vmul.f32 %v2802_v16, %v999_v14  ;;  %vm1006_vm13 = vweird.f32 %v2802_v16 }
 0x214   :  { %vm1007_vm15 = vmor %vm1005_vm14, %vm1006_vm13  ;;  %v1032_v52 = vor.u32 1.1754944e-38, %v1031_v47  ;;  %vm1030_vm5 = vcmp.eq.f32.partialorder %v1029_v1, 8.507059e+37 }
 0x215   :  { %v1002_v21 = vsub.f32 1.0, %v1001_v19 }
 0x217   :  { %v1003_v25 = vmul.f32 %v2802_v16, %v1002_v21 }
 0x218   :  { %v2804_v29 = vpop.eup %2803 }
 0x219   :  { %v1021_v53 = vmul.f32 %v2804_v29, %v1019_v13  ;;  %v1004_v36 = vadd.f32 %v2802_v16, %v1003_v25  ;;  %vm1026_vm2 = vweird.f32 %v2804_v29 }
 0x21a   :  { %vm1027_vm4 = vmor %vm1025_vm3, %vm1026_vm2 }
 0x21b   :  { %v1022_v35 = vsub.f32 1.0, %v1021_v53  ;;  %v1008_v45 = vsel %vm1007_vm15, %v2802_v16, %v1004_v36 }
 0x21c   :  { %v1013_v17 = vsel %vm1010_vm0, %v1012_v28, %v1008_v45 }
 0x21d   :  { %v1023_v11 = vmul.f32 %v2804_v29, %v1022_v35  ;;  %v1035_v49 = vmul.f32 %v1013_v17, %v993_v43 }
 0x21f   :  { %v1024_v23 = vadd.f32 %v2804_v29, %v1023_v11  ;;  %v1036_v0 = vadd.f32 %v1035_v49, %v931_v51 }
 0x221   :  { %v1028_v7 = vsel %vm1027_vm4, %v2804_v29, %v1024_v23  ;;  %2805 = vtanh.f32 %v1036_v0 }
 0x222   :  { %v1033_v58 = vsel %vm1030_vm5, %v1032_v52, %v1028_v7 }
 0x223   :  { %v1038_v8 = vsub.f32 1.0, %v1033_v58  ;;  %v1040_v62 = vmul.f32 %v1033_v58, %v3622_v12  ;;  %v3711_v12 = vld [vmem:[#allocation11 + $0x10] sm:$0xff] }
 0x227   :  { %v2806_v55 = vpop.eup %2805 }
 0x228   :  { %v1039_v22 = vmul.f32 %v2806_v55, %v1038_v8  ;;  %v1051_v8 = vld [vmem:[#allocation2 + $0x48] sm:$0xf] }
 0x22a   :  { %v3694_v3 = vadd.f32 %v1040_v62, %v1039_v22 }
 0x22c   :  { %1045 = vst.msk [vmem:[#allocation4 + $0x18] sm:$0xf] %vm270_vm1, %v3694_v3  ;;  %2649 = vmatmul.msk.f32.vlgmr.msrb.gmra.mxu3 %vm521_vm10, %v3694_v3  ;;  %2650 = vmatmul.msk.f32.vlgmr.msrb.gmra.mxu0 %vm521_vm10, %v3694_v3 }
 0x22d   :  { %2651 = vmatmul.msk.f32.vlgmr.msrb.gmra.mxu1 %vm521_vm10, %v3694_v3  ;;  %1459 = vmatpush.msrb.mxu3 %v3385_v50 }
 0x22e   :  { %1559 = vmatpush.msrb.mxu1 %v3340_v34  ;;  %1539 = vmatpush.msrb.mxu0 %v3706_v63 }
 0x22f   :  { %1460 = vmatpush.msrb.mxu3 %v3393_v54 }
 0x230   :  { %1560 = vmatpush.msrb.mxu1 %v3338_v33  ;;  %1540 = vmatpush.msrb.mxu0 %v3711_v12 }
 0x231   :  { %1461 = vmatpush.msrb.mxu3 %v3405_v56 }
 0x232   :  { %1561 = vmatpush.msrb.mxu1 %v3356_v41  ;;  %1541 = vmatpush.msrb.mxu0 %v3716_v60 }
 0x233   :  { %1462 = vmatpush.msrb.mxu3 %v3412_v57 }
 0x234   :  { %1562 = vmatpush.msrb.mxu1 %v3354_v40  ;;  %1542 = vmatpush.msrb.mxu0 %v3721_v59 }
 0x284   :  { %v1072_v5 = vpop.f32.mrf.mxu0  ;;  %v1092_v39 = vpop.f32.mrf.mxu1 }
 0x285   :  { %v1115_v14 = vadd.f32 %v1072_v5, %v1047_v4  ;;  %v1135_v18 = vadd.f32 %v1092_v39, %v1049_v9  ;;  %v1165_v5 = vld [vmem:[#allocation2 + $0x94] sm:$0xf] }
 0x287   :  { %v2647_v13 = vmul.f32 -1.442695, %v1115_v14  ;;  %v2648_v16 = vmul.f32 -1.442695, %v1135_v18 }
 0x289   :  { %2807 = vpow2.f32 %v2647_v13 }
 0x28a   :  { %2809 = vpow2.f32 %v2648_v16 }
 0x28b   :  { %v1112_v11 = vpop.f32.mrf.mxu2 }
 0x28c   :  { %v1113_v1 = vadd.f32 %v3563_v27, %v1112_v11 }
 0x28f   :  { %v2808_v19 = vpop.eup %2807 }
 0x290   :  { %v2810_v21 = vpop.eup %2809  ;;  %v1119_v24 = vadd.f32 1.0, %v2808_v19 }
 0x291   :  { %v1139_v25 = vadd.f32 1.0, %v2810_v21  ;;  %v1163_v21 = vld [vmem:[#allocation2 + $0x74] sm:$0xf] }
 0x292   :  { %2811 = vrcp.f32 %v1119_v24  ;;  %v1131_v35 = vand.u32 2147483648, %v1119_v24  ;;  %v1129_v45 = vand.u32 2147483647, %v1119_v24  ;;  %vm1125_vm7 = vweird.f32 %v1119_v24 }
 0x293   :  { %2813 = vrcp.f32 %v1139_v25  ;;  %v1151_v52 = vand.u32 2147483648, %v1139_v25  ;;  %vm1145_vm12 = vweird.f32 %v1139_v25  ;;  %v1149_v58 = vand.u32 2147483647, %v1139_v25 }
 0x294   :  { %v1132_v49 = vor.u32 1.1754944e-38, %v1131_v35  ;;  %vm1130_vm9 = vcmp.eq.f32.partialorder %v1129_v45, 8.507059e+37 }
 0x295   :  { %v1152_v62 = vor.u32 1.1754944e-38, %v1151_v52  ;;  %vm1150_vm14 = vcmp.eq.f32.partialorder %v1149_v58, 8.507059e+37 }
 0x298   :  { %v2812_v26 = vpop.eup %2811 }
 0x299   :  { %v2814_v29 = vpop.eup %2813  ;;  %v1121_v30 = vmul.f32 %v2812_v26, %v1119_v24  ;;  %vm1126_vm6 = vweird.f32 %v2812_v26 }
 0x29a   :  { %v1141_v53 = vmul.f32 %v2814_v29, %v1139_v25  ;;  %vm1127_vm8 = vmor %vm1125_vm7, %vm1126_vm6  ;;  %vm1146_vm11 = vweird.f32 %v2814_v29 }
 0x29b   :  { %v1122_v36 = vsub.f32 1.0, %v1121_v30  ;;  %vm1147_vm13 = vmor %vm1145_vm12, %vm1146_vm11 }
 0x29c   :  { %v1142_v28 = vsub.f32 1.0, %v1141_v53 }
 0x29d   :  { %v1123_v43 = vmul.f32 %v2812_v26, %v1122_v36 }
 0x29e   :  { %v1143_v17 = vmul.f32 %v2814_v29, %v1142_v28 }
 0x29f   :  { %v1124_v47 = vadd.f32 %v2812_v26, %v1123_v43 }
 0x2a0   :  { %v1144_v23 = vadd.f32 %v2814_v29, %v1143_v17 }
 0x2a1   :  { %v1128_v51 = vsel %vm1127_vm8, %v2812_v26, %v1124_v47 }
 0x2a2   :  { %v1133_v0 = vsel %vm1130_vm9, %v1132_v49, %v1128_v51  ;;  %v1148_v22 = vsel %vm1147_vm13, %v2814_v29, %v1144_v23 }
 0x2a3   :  { %v1155_v7 = vmul.f32 %v1133_v0, %v1113_v1  ;;  %v1153_v4 = vsel %vm1150_vm14, %v1152_v62, %v1148_v22 }
 0x2a4   :  { %v1158_v14 = vsub.f32 1.0, %v1153_v4  ;;  %v1160_v19 = vmul.f32 %v1153_v4, %v3662_v6 }
 0x2a5   :  { %v1156_v55 = vadd.f32 %v1155_v7, %v1051_v8 }
 0x2a7   :  { %2815 = vtanh.f32 %v1156_v55 }
 0x2a9   :  { %v1208_v9 = vpop.f32.mrf.mxu0 }
 0x2aa   :  { %v1251_v39 = vadd.f32 %v1208_v9, %v1165_v5  ;;  %v1228_v23 = vpop.f32.mrf.mxu1  ;;  %v1167_v5 = vld [vmem:[#allocation2 + $0xb4] sm:$0xf] }
 0x2ab   :  { %v1229_v7 = vadd.f32 %v3608_v61, %v1228_v23 }
 0x2ac   :  { %v2653_v18 = vmul.f32 -1.442695, %v1251_v39 }
 0x2ad   :  { %v2816_v13 = vpop.eup %2815 }
 0x2ae   :  { %v1159_v16 = vmul.f32 %v2816_v13, %v1158_v14  ;;  %2817 = vpow2.f32 %v2653_v18 }
 0x2af   :  { %v1188_v24 = vpop.f32.mrf.mxu3 }
 0x2b0   :  { %v1231_v25 = vadd.f32 %v1188_v24, %v1163_v21  ;;  %v3726_v26 = vadd.f32 %v1160_v19, %v1159_v16 }
 0x2b2   :  { %v2652_v29 = vmul.f32 -1.442695, %v1231_v25  ;;  %1279 = vst.msk [vmem:[#allocation3 + $0x8] sm:$0xf] %vm270_vm1, %v3726_v26  ;;  %2654 = vmatmul.msk.f32.vlgmr.msra.gmra.mxu2 %vm521_vm10, %v3726_v26  ;;  %2655 = vmatmul.msk.f32.vlgmr.msra.gmra.mxu3 %vm521_vm10, %v3726_v26 }
 0x2b3   :  { %2656 = vmatmul.msk.f32.vlgmr.msra.gmra.mxu0 %vm521_vm10, %v3726_v26  ;;  %1579 = vmatpush.msra.mxu2 %v3336_v32 }
 0x2b4   :  { %v2818_v6 = vpop.eup %2817  ;;  %2819 = vpow2.f32 %v2652_v29  ;;  %1675 = vmatpush.msra.mxu0 %v3358_v42  ;;  %1655 = vmatpush.msra.mxu3 %v3674_v10  ;;  %v1285_v29 = vld [vmem:[#allocation2 + $0x2c] sm:$0xf] }
 0x2b5   :  { %v1255_v30 = vadd.f32 1.0, %v2818_v6  ;;  %1580 = vmatpush.msra.mxu2 %v3334_v31 }
 0x2b6   :  { %1676 = vmatpush.msra.mxu0 %v3364_v44  ;;  %1656 = vmatpush.msra.mxu3 %v3679_v2 }
 0x2b7   :  { %1581 = vmatpush.msra.mxu2 %v3352_v38  ;;  %2821 = vrcp.f32 %v1255_v30  ;;  %v1267_v22 = vand.u32 2147483648, %v1255_v30  ;;  %vm1261_vm5 = vweird.f32 %v1255_v30  ;;  %v1265_v4 = vand.u32 2147483647, %v1255_v30 }
 0x2b8   :  { %1677 = vmatpush.msra.mxu0 %v3373_v46  ;;  %1657 = vmatpush.msra.mxu3 %v3684_v15 }
 0x2b9   :  { %1582 = vmatpush.msra.mxu2 %v3350_v37  ;;  %v1268_v14 = vor.u32 1.1754944e-38, %v1267_v22  ;;  %vm1266_vm7 = vcmp.eq.f32.partialorder %v1265_v4, 8.507059e+37 }
 0x2ba   :  { %v2820_v53 = vpop.eup %2819  ;;  %1678 = vmatpush.msra.mxu0 %v3381_v48  ;;  %1658 = vmatpush.msra.mxu3 %v3689_v20 }
 0x2bb   :  { %v1235_v36 = vadd.f32 1.0, %v2820_v53 }
 0x2bd   :  { %2823 = vrcp.f32 %v1235_v36  ;;  %v2822_v28 = vpop.eup %2821  ;;  %v1247_v47 = vand.u32 2147483648, %v1235_v36  ;;  %v1245_v1 = vand.u32 2147483647, %v1235_v36  ;;  %vm1241_vm0 = vweird.f32 %v1235_v36 }
 0x2be   :  { %v1257_v35 = vmul.f32 %v2822_v28, %v1255_v30  ;;  %vm1262_vm4 = vweird.f32 %v2822_v28 }
 0x2bf   :  { %v1248_v52 = vor.u32 1.1754944e-38, %v1247_v47  ;;  %vm1246_vm3 = vcmp.eq.f32.partialorder %v1245_v1, 8.507059e+37  ;;  %vm1263_vm6 = vmor %vm1261_vm5, %vm1262_vm4 }
 0x2c0   :  { %v1258_v17 = vsub.f32 1.0, %v1257_v35 }
 0x2c2   :  { %v1259_v51 = vmul.f32 %v2822_v28, %v1258_v17 }
 0x2c3   :  { %v2824_v43 = vpop.eup %2823 }
 0x2c4   :  { %v1237_v45 = vmul.f32 %v2824_v43, %v1235_v36  ;;  %vm1242_vm15 = vweird.f32 %v2824_v43  ;;  %v1260_v8 = vadd.f32 %v2822_v28, %v1259_v51 }
 0x2c5   :  { %vm1243_vm2 = vmor %vm1241_vm0, %vm1242_vm15 }
 0x2c6   :  { %v1238_v11 = vsub.f32 1.0, %v1237_v45  ;;  %v1264_v39 = vsel %vm1263_vm6, %v2822_v28, %v1260_v8 }
 0x2c7   :  { %v1269_v18 = vsel %vm1266_vm7, %v1268_v14, %v1264_v39 }
 0x2c8   :  { %v1239_v49 = vmul.f32 %v2824_v43, %v1238_v11  ;;  %v1274_v13 = vsub.f32 1.0, %v1269_v18  ;;  %v1276_v21 = vmul.f32 %v1269_v18, %v3694_v3  ;;  %v1283_v3 = vld [vmem:[#allocation2 + $0xc] sm:$0xf] }
 0x2ca   :  { %v1240_v0 = vadd.f32 %v2824_v43, %v1239_v49 }
 0x2cc   :  { %v1244_v58 = vsel %vm1243_vm2, %v2824_v43, %v1240_v0 }
 0x2cd   :  { %v1249_v55 = vsel %vm1246_vm3, %v1248_v52, %v1244_v58 }
 0x2ce   :  { %v1271_v62 = vmul.f32 %v1249_v55, %v1229_v7 }
 0x2d0   :  { %v1272_v9 = vadd.f32 %v1271_v62, %v1167_v5 }
 0x2d2   :  { %2825 = vtanh.f32 %v1272_v9 }
 0x2d8   :  { %v2826_v16 = vpop.eup %2825 }
 0x2d9   :  { %v1275_v19 = vmul.f32 %v2826_v16, %v1274_v13  ;;  %v1287_v13 = vld [vmem:[#allocation2 + $0x4c] sm:$0xf] }
 0x2db   :  { %v3750_v24 = vadd.f32 %v1276_v21, %v1275_v19 }
 0x2dd   :  { %1281 = vst.msk [vmem:[#allocation4 + $0x14] sm:$0xf] %vm270_vm1, %v3750_v24  ;;  %2659 = vmatmul.msk.f32.vlgmr.msra.gmra.mxu1 %vm521_vm10, %v3750_v24  ;;  %2660 = vmatmul.msk.f32.vlgmr.msrb.gmra.mxu2 %vm521_vm10, %v3750_v24 }
 0x2de   :  { %2661 = vmatmul.msk.f32.vlgmr.msrb.gmra.mxu3 %vm521_vm10, %v3750_v24  ;;  %1695 = vmatpush.msra.mxu1 %v3385_v50 }
 0x2df   :  { %1795 = vmatpush.msrb.mxu3 %v3340_v34  ;;  %1775 = vmatpush.msrb.mxu2 %v3706_v63 }
 0x2e0   :  { %1696 = vmatpush.msra.mxu1 %v3393_v54 }
 0x2e1   :  { %1796 = vmatpush.msrb.mxu3 %v3338_v33  ;;  %1776 = vmatpush.msrb.mxu2 %v3711_v12 }
 0x2e2   :  { %1697 = vmatpush.msra.mxu1 %v3405_v56 }
 0x2e3   :  { %1797 = vmatpush.msrb.mxu3 %v3356_v41  ;;  %1777 = vmatpush.msrb.mxu2 %v3716_v60 }
 0x2e4   :  { %1698 = vmatpush.msra.mxu1 %v3412_v57 }
 0x2e5   :  { %1798 = vmatpush.msrb.mxu3 %v3354_v40  ;;  %1778 = vmatpush.msrb.mxu2 %v3721_v59 }
 0x330   :  { %v1348_v58 = vpop.f32.mrf.mxu0 }
 0x331   :  { %v1349_v62 = vadd.f32 %v3563_v27, %v1348_v58 }
 0x335   :  { %v1308_v25 = vpop.f32.mrf.mxu2  ;;  %v1328_v6 = vpop.f32.mrf.mxu3 }
 0x336   :  { %v1351_v30 = vadd.f32 %v1308_v25, %v1283_v3  ;;  %v1371_v53 = vadd.f32 %v1328_v6, %v1285_v29  ;;  %v1399_v3 = vld [vmem:[#allocation2 + $0x70] sm:$0xf] }
 0x338   :  { %v2657_v36 = vmul.f32 -1.442695, %v1351_v30  ;;  %v2658_v28 = vmul.f32 -1.442695, %v1371_v53 }
 0x33a   :  { %2827 = vpow2.f32 %v2657_v36 }
 0x33b   :  { %2829 = vpow2.f32 %v2658_v28 }
 0x340   :  { %v2828_v35 = vpop.eup %2827 }
 0x341   :  { %v2830_v43 = vpop.eup %2829  ;;  %v1355_v45 = vadd.f32 1.0, %v2828_v35  ;;  %v1401_v35 = vld [vmem:[#allocation2 + $0x90] sm:$0xf] }
 0x342   :  { %v1375_v17 = vadd.f32 1.0, %v2830_v43 }
 0x343   :  { %2831 = vrcp.f32 %v1355_v45  ;;  %v1367_v23 = vand.u32 2147483648, %v1355_v45  ;;  %v1365_v7 = vand.u32 2147483647, %v1355_v45  ;;  %vm1361_vm9 = vweird.f32 %v1355_v45 }
 0x344   :  { %2833 = vrcp.f32 %v1375_v17  ;;  %v1387_v14 = vand.u32 2147483648, %v1375_v17  ;;  %vm1381_vm14 = vweird.f32 %v1375_v17  ;;  %v1385_v18 = vand.u32 2147483647, %v1375_v17 }
 0x345   :  { %v1368_v22 = vor.u32 1.1754944e-38, %v1367_v23  ;;  %vm1366_vm12 = vcmp.eq.f32.partialorder %v1365_v7, 8.507059e+37 }
 0x346   :  { %v1388_v21 = vor.u32 1.1754944e-38, %v1387_v14  ;;  %vm1386_vm0 = vcmp.eq.f32.partialorder %v1385_v18, 8.507059e+37 }
 0x349   :  { %v2832_v11 = vpop.eup %2831 }
 0x34a   :  { %v2834_v47 = vpop.eup %2833  ;;  %v1357_v49 = vmul.f32 %v2832_v11, %v1355_v45  ;;  %vm1362_vm8 = vweird.f32 %v2832_v11 }
 0x34b   :  { %v1377_v1 = vmul.f32 %v2834_v47, %v1375_v17  ;;  %vm1363_vm11 = vmor %vm1361_vm9, %vm1362_vm8  ;;  %vm1382_vm13 = vweird.f32 %v2834_v47 }
 0x34c   :  { %v1358_v51 = vsub.f32 1.0, %v1357_v49  ;;  %vm1383_vm15 = vmor %vm1381_vm14, %vm1382_vm13 }
 0x34d   :  { %v1378_v0 = vsub.f32 1.0, %v1377_v1 }
 0x34e   :  { %v1359_v52 = vmul.f32 %v2832_v11, %v1358_v51 }
 0x34f   :  { %v1379_v8 = vmul.f32 %v2834_v47, %v1378_v0 }
 0x350   :  { %v1360_v55 = vadd.f32 %v2832_v11, %v1359_v52 }
 0x351   :  { %v1380_v9 = vadd.f32 %v2834_v47, %v1379_v8 }
 0x352   :  { %v1364_v4 = vsel %vm1363_vm11, %v2832_v11, %v1360_v55 }
 0x353   :  { %v1369_v5 = vsel %vm1366_vm12, %v1368_v22, %v1364_v4  ;;  %v1384_v19 = vsel %vm1383_vm15, %v2834_v47, %v1380_v9 }
 0x354   :  { %v1391_v39 = vmul.f32 %v1369_v5, %v1349_v62  ;;  %v1389_v29 = vsel %vm1386_vm0, %v1388_v21, %v1384_v19  ;;  %v1403_v21 = vld [vmem:[#allocation2 + $0xb0] sm:$0xf] }
 0x355   :  { %v1394_v30 = vsub.f32 1.0, %v1389_v29  ;;  %v1396_v28 = vmul.f32 %v1389_v29, %v3726_v26 }
 0x356   :  { %v1392_v16 = vadd.f32 %v1391_v39, %v1287_v13 }
 0x358   :  { %2835 = vtanh.f32 %v1392_v16 }
 0x35a   :  { %v1424_v25 = vpop.f32.mrf.mxu1 }
 0x35b   :  { %v1467_v27 = vadd.f32 %v1424_v25, %v1399_v3 }
 0x35d   :  { %v2662_v6 = vmul.f32 -1.442695, %v1467_v27 }
 0x35e   :  { %v2836_v53 = vpop.eup %2835 }
 0x35f   :  { %2837 = vpow2.f32 %v2662_v6  ;;  %v1395_v36 = vmul.f32 %v2836_v53, %v1394_v30 }
 0x360   :  { %v1444_v43 = vpop.f32.mrf.mxu2 }
 0x361   :  { %v1487_v45 = vadd.f32 %v1444_v43, %v1401_v35  ;;  %v3774_v17 = vadd.f32 %v1396_v28, %v1395_v36  ;;  %v1464_v55 = vpop.f32.mrf.mxu3  ;;  %v1519_v35 = vld [vmem:[#allocation2 + $0x10] sm:$0xf] }
 0x362   :  { %v1465_v9 = vadd.f32 %v3608_v61, %v1464_v55 }
 0x363   :  { %v2663_v11 = vmul.f32 -1.442695, %v1487_v45  ;;  %1515 = vst.msk [vmem:[#allocation3 + $0xc] sm:$0xf] %vm270_vm1, %v3774_v17  ;;  %2664 = vmatmul.msk.f32.vlgmr.msrb.gmra.mxu0 %vm521_vm10, %v3774_v17  ;;  %2665 = vmatmul.msk.f32.vlgmr.msrb.gmra.mxu1 %vm521_vm10, %v3774_v17  ;;  %v1521_v45 = vld [vmem:[#allocation2 + $0x30] sm:$0xf] }
 0x364   :  { %2666 = vmatmul.msk.f32.vlgmr.msra.gmra.mxu2 %vm521_vm10, %v3774_v17  ;;  %1815 = vmatpush.msrb.mxu0 %v3336_v32 }
 0x365   :  { %v2838_v26 = vpop.eup %2837  ;;  %2839 = vpow2.f32 %v2663_v11  ;;  %1911 = vmatpush.msra.mxu2 %v3358_v42  ;;  %1891 = vmatpush.msrb.mxu1 %v3674_v10 }
 0x366   :  { %v1471_v47 = vadd.f32 1.0, %v2838_v26  ;;  %1816 = vmatpush.msrb.mxu0 %v3334_v31 }
 0x367   :  { %1912 = vmatpush.msra.mxu2 %v3364_v44  ;;  %1892 = vmatpush.msrb.mxu1 %v3679_v2 }
 0x368   :  { %2841 = vrcp.f32 %v1471_v47  ;;  %1817 = vmatpush.msrb.mxu0 %v3352_v38  ;;  %v1483_v52 = vand.u32 2147483648, %v1471_v47  ;;  %v1481_v58 = vand.u32 2147483647, %v1471_v47  ;;  %vm1477_vm3 = vweird.f32 %v1471_v47 }
 0x369   :  { %1913 = vmatpush.msra.mxu2 %v3373_v46  ;;  %1893 = vmatpush.msrb.mxu1 %v3684_v15 }
 0x36a   :  { %1818 = vmatpush.msrb.mxu0 %v3350_v37  ;;  %v1484_v4 = vor.u32 1.1754944e-38, %v1483_v52  ;;  %vm1482_vm5 = vcmp.eq.f32.partialorder %v1481_v58, 8.507059e+37 }
 0x36b   :  { %v2840_v49 = vpop.eup %2839  ;;  %1914 = vmatpush.msra.mxu2 %v3381_v48  ;;  %1894 = vmatpush.msrb.mxu1 %v3689_v20 }
 0x36c   :  { %v1491_v1 = vadd.f32 1.0, %v2840_v49 }
 0x36e   :  { %v2842_v51 = vpop.eup %2841  ;;  %2843 = vrcp.f32 %v1491_v1  ;;  %v1503_v13 = vand.u32 2147483648, %v1491_v1  ;;  %v1501_v19 = vand.u32 2147483647, %v1491_v1  ;;  %vm1497_vm7 = vweird.f32 %v1491_v1 }
 0x36f   :  { %v1473_v23 = vmul.f32 %v2842_v51, %v1471_v47  ;;  %vm1478_vm2 = vweird.f32 %v2842_v51 }
 0x370   :  { %vm1479_vm4 = vmor %vm1477_vm3, %vm1478_vm2  ;;  %v1504_v29 = vor.u32 1.1754944e-38, %v1503_v13  ;;  %vm1502_vm9 = vcmp.eq.f32.partialorder %v1501_v19, 8.507059e+37 }
 0x371   :  { %v1474_v0 = vsub.f32 1.0, %v1473_v23 }
 0x373   :  { %v1475_v7 = vmul.f32 %v2842_v51, %v1474_v0 }
 0x374   :  { %v2844_v8 = vpop.eup %2843 }
 0x375   :  { %v1493_v22 = vmul.f32 %v2844_v8, %v1491_v1  ;;  %v1476_v62 = vadd.f32 %v2842_v51, %v1475_v7  ;;  %vm1498_vm6 = vweird.f32 %v2844_v8 }
 0x376   :  { %vm1499_vm8 = vmor %vm1497_vm7, %vm1498_vm6 }
 0x377   :  { %v1494_v5 = vsub.f32 1.0, %v1493_v22  ;;  %v1480_v39 = vsel %vm1479_vm4, %v2842_v51, %v1476_v62  ;;  %vm2514_vm4 = vcmask 519168  }
 0x378   :  { %v1485_v14 = vsel %vm1482_vm5, %v1484_v4, %v1480_v39 }
 0x379   :  { %v1495_v18 = vmul.f32 %v2844_v8, %v1494_v5  ;;  %v1507_v16 = vmul.f32 %v1485_v14, %v1465_v9 }
 0x37b   :  { %v1496_v3 = vadd.f32 %v2844_v8, %v1495_v18  ;;  %v1508_v25 = vadd.f32 %v1507_v16, %v1403_v21  ;;  %v3824_v16 = vld [vmem:[%s3987_s4] ss:$0 sm:$0xff] }
 0x37d   :  { %v1500_v27 = vsel %vm1499_vm8, %v2844_v8, %v1496_v3  ;;  %2845 = vtanh.f32 %v1508_v25 }
 0x37e   :  { %v1505_v6 = vsel %vm1502_vm9, %v1504_v29, %v1500_v27 }
 0x37f   :  { %v1510_v30 = vsub.f32 1.0, %v1505_v6  ;;  %v1512_v36 = vmul.f32 %v1505_v6, %v3750_v24 }
 0x383   :  { %v2846_v61 = vpop.eup %2845 }
 0x384   :  { %v1511_v53 = vmul.f32 %v2846_v61, %v1510_v30  ;;  %v1523_v30 = vld [vmem:[#allocation2 + $0x50] sm:$0xf] }
 0x386   :  { %v3798_v28 = vadd.f32 %v1512_v36, %v1511_v53 }
 0x388   :  { %1517 = vst.msk [vmem:[#allocation4 + $0x10] sm:$0xf] %vm270_vm1, %v3798_v28  ;;  %2669 = vmatmul.msk.f32.vlgmr.msra.gmra.mxu3 %vm521_vm10, %v3798_v28  ;;  %2670 = vmatmul.msk.f32.vlgmr.msra.gmra.mxu0 %vm521_vm10, %v3798_v28 }
 0x389   :  { %2671 = vmatmul.msk.f32.vlgmr.msra.gmra.mxu1 %vm521_vm10, %v3798_v28  ;;  %1931 = vmatpush.msra.mxu3 %v3385_v50 }
 0x38a   :  { %2031 = vmatpush.msra.mxu1 %v3340_v34  ;;  %2011 = vmatpush.msra.mxu0 %v3706_v63 }
 0x38b   :  { %1932 = vmatpush.msra.mxu3 %v3393_v54 }
 0x38c   :  { %2032 = vmatpush.msra.mxu1 %v3338_v33  ;;  %2012 = vmatpush.msra.mxu0 %v3711_v12 }
 0x38d   :  { %1933 = vmatpush.msra.mxu3 %v3405_v56 }
 0x38e   :  { %2033 = vmatpush.msra.mxu1 %v3356_v41  ;;  %2013 = vmatpush.msra.mxu0 %v3716_v60 }
 0x38f   :  { %1934 = vmatpush.msra.mxu3 %v3412_v57  ;;  %v2470_v24 = vld [vmem:[#allocation4 + $0x10] sm:$0xf] }
 0x390   :  { %2034 = vmatpush.msra.mxu1 %v3354_v40  ;;  %2490 = vrot.lane.b32.xlu2 %v2470_v24, %s3186_s8 }
 0x391   :  { %2014 = vmatpush.msra.mxu0 %v3721_v59 }
 0x3e0   :  { %v1544_v43 = vpop.f32.mrf.mxu0  ;;  %v1564_v11 = vpop.f32.mrf.mxu1 }
 0x3e1   :  { %v1587_v26 = vadd.f32 %v1544_v43, %v1519_v35  ;;  %v1607_v47 = vadd.f32 %v1564_v11, %v1521_v45  ;;  %v1637_v35 = vld [vmem:[#allocation2 + $0x8c] sm:$0xf] }
 0x3e3   :  { %v2667_v49 = vmul.f32 -1.442695, %v1587_v26  ;;  %v2668_v1 = vmul.f32 -1.442695, %v1607_v47 }
 0x3e5   :  { %2847 = vpow2.f32 %v2667_v49 }
 0x3e6   :  { %2849 = vpow2.f32 %v2668_v1 }
 0x3e7   :  { %v1584_v14 = vpop.f32.mrf.mxu2 }
 0x3e8   :  { %v1585_v19 = vadd.f32 %v3824_v16, %v1584_v14 }
 0x3eb   :  { %v2848_v51 = vpop.eup %2847 }
 0x3ec   :  { %v2850_v23 = vpop.eup %2849  ;;  %v1591_v0 = vadd.f32 1.0, %v2848_v51  ;;  %v1635_v51 = vld [vmem:[#allocation2 + $0x6c] sm:$0xf] }
 0x3ed   :  { %v1611_v52 = vadd.f32 1.0, %v2850_v23 }
 0x3ee   :  { %2851 = vrcp.f32 %v1591_v0  ;;  %v1603_v4 = vand.u32 2147483648, %v1591_v0  ;;  %v1601_v9 = vand.u32 2147483647, %v1591_v0  ;;  %vm1597_vm12 = vweird.f32 %v1591_v0 }
 0x3ef   :  { %2853 = vrcp.f32 %v1611_v52  ;;  %v1623_v29 = vand.u32 2147483648, %v1611_v52  ;;  %vm1617_vm0 = vweird.f32 %v1611_v52  ;;  %v1621_v6 = vand.u32 2147483647, %v1611_v52 }
 0x3f0   :  { %v1604_v13 = vor.u32 1.1754944e-38, %v1603_v4  ;;  %vm1602_vm14 = vcmp.eq.f32.partialorder %v1601_v9, 8.507059e+37 }
 0x3f1   :  { %v1624_v36 = vor.u32 1.1754944e-38, %v1623_v29  ;;  %vm1622_vm3 = vcmp.eq.f32.partialorder %v1621_v6, 8.507059e+37 }
 0x3f4   :  { %v2852_v7 = vpop.eup %2851 }
 0x3f5   :  { %v2854_v58 = vpop.eup %2853  ;;  %v1593_v8 = vmul.f32 %v2852_v7, %v1591_v0  ;;  %vm1598_vm11 = vweird.f32 %v2852_v7 }
 0x3f6   :  { %v1613_v55 = vmul.f32 %v2854_v58, %v1611_v52  ;;  %vm1599_vm13 = vmor %vm1597_vm12, %vm1598_vm11  ;;  %vm1618_vm15 = vweird.f32 %v2854_v58 }
 0x3f7   :  { %v1594_v22 = vsub.f32 1.0, %v1593_v8  ;;  %vm1619_vm2 = vmor %vm1617_vm0, %vm1618_vm15  ;;  %v2491_v8 = vpop.permute.xlu2 %2490 }
 0x3f8   :  { %v1614_v62 = vsub.f32 1.0, %v1613_v55 }
 0x3f9   :  { %v1595_v5 = vmul.f32 %v2852_v7, %v1594_v22 }
 0x3fa   :  { %v1615_v39 = vmul.f32 %v2854_v58, %v1614_v62 }
 0x3fb   :  { %v1596_v18 = vadd.f32 %v2852_v7, %v1595_v5 }
 0x3fc   :  { %v1616_v3 = vadd.f32 %v2854_v58, %v1615_v39 }
 0x3fd   :  { %v1600_v21 = vsel %vm1599_vm13, %v2852_v7, %v1596_v18 }
 0x3fe   :  { %v1605_v25 = vsel %vm1602_vm14, %v1604_v13, %v1600_v21  ;;  %v1620_v53 = vsel %vm1619_vm2, %v2854_v58, %v1616_v3 }
 0x3ff   :  { %v1627_v27 = vmul.f32 %v1605_v25, %v1585_v19  ;;  %v1625_v24 = vsel %vm1622_vm3, %v1624_v36, %v1620_v53  ;;  %v3855_v25 = vld [vmem:[%s3989_s6] ss:$0 sm:$0xff] }
 0x400   :  { %v1630_v11 = vsub.f32 1.0, %v1625_v24  ;;  %v1632_v1 = vmul.f32 %v1625_v24, %v3774_v17  ;;  %v1639_v24 = vld [vmem:[#allocation2 + $0xac] sm:$0xf] }
 0x401   :  { %v1628_v61 = vadd.f32 %v1627_v27, %v1523_v30 }
 0x403   :  { %2855 = vtanh.f32 %v1628_v61 }
 0x405   :  { %v1680_v43 = vpop.f32.mrf.mxu0 }
 0x406   :  { %v1723_v45 = vadd.f32 %v1680_v43, %v1637_v35  ;;  %v1700_v21 = vpop.f32.mrf.mxu1 }
 0x407   :  { %v1701_v29 = vadd.f32 %v3855_v25, %v1700_v21 }
 0x408   :  { %v2673_v26 = vmul.f32 -1.442695, %v1723_v45 }
 0x409   :  { %v2856_v47 = vpop.eup %2855 }
 0x40a   :  { %v1631_v49 = vmul.f32 %v2856_v47, %v1630_v11  ;;  %2857 = vpow2.f32 %v2673_v26 }
 0x40b   :  { %v1660_v23 = vpop.f32.mrf.mxu3 }
 0x40c   :  { %v3828_v0 = vadd.f32 %v1632_v1, %v1631_v49  ;;  %v1703_v52 = vadd.f32 %v1660_v23, %v1635_v51 }
 0x40e   :  { %1751 = vst.msk [vmem:[#allocation3 + $0x10] sm:$0xf] %vm270_vm1, %v3828_v0  ;;  %v2672_v7 = vmul.f32 -1.442695, %v1703_v52  ;;  %2674 = vmatmul.msk.f32.vlgmr.msrb.gmra.mxu2 %vm521_vm10, %v3828_v0  ;;  %2675 = vmatmul.msk.f32.vlgmr.msrb.gmra.mxu3 %vm521_vm10, %v3828_v0 }
 0x40f   :  { %2676 = vmatmul.msk.f32.vlgmr.msrb.gmra.mxu0 %vm521_vm10, %v3828_v0  ;;  %2051 = vmatpush.msrb.mxu2 %v3336_v32 }
 0x410   :  { %v2858_v17 = vpop.eup %2857  ;;  %2859 = vpow2.f32 %v2672_v7  ;;  %2147 = vmatpush.msrb.mxu0 %v3358_v42  ;;  %2127 = vmatpush.msrb.mxu3 %v3674_v10 }
 0x411   :  { %v1727_v58 = vadd.f32 1.0, %v2858_v17  ;;  %2052 = vmatpush.msrb.mxu2 %v3334_v31 }
 0x412   :  { %2148 = vmatpush.msrb.mxu0 %v3364_v44  ;;  %2128 = vmatpush.msrb.mxu3 %v3679_v2 }
 0x413   :  { %2053 = vmatpush.msrb.mxu2 %v3352_v38  ;;  %2861 = vrcp.f32 %v1727_v58  ;;  %v1739_v61 = vand.u32 2147483648, %v1727_v58  ;;  %vm1733_vm11 = vweird.f32 %v1727_v58  ;;  %v1737_v36 = vand.u32 2147483647, %v1727_v58 }
 0x414   :  { %2149 = vmatpush.msrb.mxu0 %v3373_v46  ;;  %2129 = vmatpush.msrb.mxu3 %v3684_v15 }
 0x415   :  { %v2462_v55 = vld [vmem:[#allocation3 + $0x10] sm:$0xf]  ;;  %2054 = vmatpush.msrb.mxu2 %v3350_v37  ;;  %v1740_v45 = vor.u32 1.1754944e-38, %v1739_v61  ;;  %vm1738_vm13 = vcmp.eq.f32.partialorder %v1737_v36, 8.507059e+37  ;;  %v2461_v61 = vld [vmem:[#allocation3 + $0xc] sm:$0xf] }
 0x416   :  { %v2860_v10 = vpop.eup %2859  ;;  %v2510_v22 = vsel %vm521_vm10, %v2462_v55, %v2491_v8  ;;  %2150 = vmatpush.msrb.mxu0 %v3381_v48  ;;  %2130 = vmatpush.msrb.mxu3 %v3689_v20 }
 0x417   :  { %2519 = vst.msk [vmem:[#allocation17 + $0x10] sm:$0xf] %vm2514_vm4, %v2510_v22  ;;  %v1707_v2 = vadd.f32 1.0, %v2860_v10 }
 0x419   :  { %2863 = vrcp.f32 %v1707_v2  ;;  %v2862_v62 = vpop.eup %2861  ;;  %v1719_v14 = vand.u32 2147483648, %v1707_v2  ;;  %v1717_v13 = vand.u32 2147483647, %v1707_v2  ;;  %vm1713_vm6 = vweird.f32 %v1707_v2 }
 0x41a   :  { %v1729_v4 = vmul.f32 %v2862_v62, %v1727_v58  ;;  %vm1734_vm9 = vweird.f32 %v2862_v62 }
 0x41b   :  { %v1720_v20 = vor.u32 1.1754944e-38, %v1719_v14  ;;  %vm1718_vm8 = vcmp.eq.f32.partialorder %v1717_v13, 8.507059e+37  ;;  %vm1735_vm12 = vmor %vm1733_vm11, %vm1734_vm9 }
 0x41c   :  { %v1730_v15 = vsub.f32 1.0, %v1729_v4 }
 0x41e   :  { %v1731_v19 = vmul.f32 %v2862_v62, %v1730_v15 }
 0x41f   :  { %v2864_v5 = vpop.eup %2863 }
 0x420   :  { %v1709_v9 = vmul.f32 %v2864_v5, %v1707_v2  ;;  %vm1714_vm5 = vweird.f32 %v2864_v5  ;;  %v1732_v6 = vadd.f32 %v2862_v62, %v1731_v19 }
 0x421   :  { %vm1715_vm7 = vmor %vm1713_vm6, %vm1714_vm5 }
 0x422   :  { %v1710_v39 = vsub.f32 1.0, %v1709_v9  ;;  %v1736_v43 = vsel %vm1735_vm12, %v2862_v62, %v1732_v6 }
 0x423   :  { %v1741_v11 = vsel %vm1738_vm13, %v1740_v45, %v1736_v43 }
 0x424   :  { %v1711_v18 = vmul.f32 %v2864_v5, %v1710_v39  ;;  %v1746_v26 = vsub.f32 1.0, %v1741_v11  ;;  %v1748_v1 = vmul.f32 %v1741_v11, %v3798_v28 }
 0x426   :  { %v1712_v3 = vadd.f32 %v2864_v5, %v1711_v18 }
 0x428   :  { %v1716_v27 = vsel %vm1715_vm7, %v2864_v5, %v1712_v3 }
 0x429   :  { %v1721_v30 = vsel %vm1718_vm8, %v1720_v20, %v1716_v27  ;;  %v1759_v27 = vld [vmem:[#allocation2 + $0x54] sm:$0xf] }
 0x42a   :  { %v1743_v53 = vmul.f32 %v1721_v30, %v1701_v29 }
 0x42c   :  { %v1744_v35 = vadd.f32 %v1743_v53, %v1639_v24 }
 0x42e   :  { %2865 = vtanh.f32 %v1744_v35  ;;  %v1871_v35 = vld [vmem:[#allocation2 + $0x68] sm:$0xf] }
 0x434   :  { %v2866_v47 = vpop.eup %2865 }
 0x435   :  { %v1747_v49 = vmul.f32 %v2866_v47, %v1746_v26 }
 0x437   :  { %v3859_v51 = vadd.f32 %v1748_v1, %v1747_v49 }
 0x439   :  { %1753 = vst.msk [vmem:[#allocation4 + $0xc] sm:$0xf] %vm270_vm1, %v3859_v51  ;;  %2679 = vmatmul.msk.f32.vlgmr.msrb.gmra.mxu1 %vm521_vm10, %v3859_v51  ;;  %2680 = vmatmul.msk.f32.vlgmr.msra.gmra.mxu2 %vm521_vm10, %v3859_v51 }
 0x43a   :  { %2681 = vmatmul.msk.f32.vlgmr.msra.gmra.mxu3 %vm521_vm10, %v3859_v51  ;;  %2167 = vmatpush.msrb.mxu1 %v3385_v50 }
 0x43b   :  { %2267 = vmatpush.msra.mxu3 %v3340_v34  ;;  %2247 = vmatpush.msra.mxu2 %v3706_v63  ;;  %v1755_v34 = vld [vmem:[#allocation2 + $0x14] sm:$0xf] }
 0x43c   :  { %2168 = vmatpush.msrb.mxu1 %v3393_v54 }
 0x43d   :  { %2268 = vmatpush.msra.mxu3 %v3338_v33  ;;  %2248 = vmatpush.msra.mxu2 %v3711_v12  ;;  %v1757_v33 = vld [vmem:[#allocation2 + $0x34] sm:$0xf] }
 0x43e   :  { %2169 = vmatpush.msrb.mxu1 %v3405_v56 }
 0x43f   :  { %2269 = vmatpush.msra.mxu3 %v3356_v41  ;;  %2249 = vmatpush.msra.mxu2 %v3716_v60 }
 0x440   :  { %2170 = vmatpush.msrb.mxu1 %v3412_v57  ;;  %v2469_v28 = vld [vmem:[#allocation4 + $0xc] sm:$0xf] }
 0x441   :  { %2270 = vmatpush.msra.mxu3 %v3354_v40  ;;  %2488 = vrot.lane.b32.xlu1 %v2469_v28, %s3186_s8 }
 0x442   :  { %2250 = vmatpush.msra.mxu2 %v3721_v59 }
 0x48c   :  { %v1820_v9 = vpop.f32.mrf.mxu0 }
 0x48d   :  { %v1821_v18 = vadd.f32 %v3824_v16, %v1820_v9 }
 0x491   :  { %v1780_v63 = vpop.f32.mrf.mxu2  ;;  %v1800_v23 = vpop.f32.mrf.mxu3 }
 0x492   :  { %v1823_v12 = vadd.f32 %v1780_v63, %v1755_v34  ;;  %v1843_v52 = vadd.f32 %v1800_v23, %v1757_v33  ;;  %v1873_v34 = vld [vmem:[#allocation2 + $0x88] sm:$0xf] }
 0x494   :  { %v2677_v7 = vmul.f32 -1.442695, %v1823_v12  ;;  %v2678_v17 = vmul.f32 -1.442695, %v1843_v52  ;;  %v2939_v52 = vld [vmem:[#allocation13 + $0x18] sm:$0xff] }
 0x496   :  { %2867 = vpow2.f32 %v2677_v7 }
 0x497   :  { %2869 = vpow2.f32 %v2678_v17  ;;  %v2940_v17 = vld [vmem:[#allocation13 + $0x10] sm:$0xff] }
 0x49c   :  { %v2868_v41 = vpop.eup %2867 }
 0x49d   :  { %v2870_v60 = vpop.eup %2869  ;;  %v1827_v58 = vadd.f32 1.0, %v2868_v41  ;;  %v2941_v41 = vld [vmem:[#allocation13 + $0x8] sm:$0xff] }
 0x49e   :  { %v1847_v8 = vadd.f32 1.0, %v2870_v60 }
 0x49f   :  { %2871 = vrcp.f32 %v1827_v58  ;;  %v1839_v2 = vand.u32 2147483648, %v1827_v58  ;;  %v1837_v5 = vand.u32 2147483647, %v1827_v58  ;;  %vm1833_vm15 = vweird.f32 %v1827_v58 }
 0x4a0   :  { %2873 = vrcp.f32 %v1847_v8  ;;  %v1859_v20 = vand.u32 2147483648, %v1847_v8  ;;  %vm1853_vm5 = vweird.f32 %v1847_v8  ;;  %v1857_v29 = vand.u32 2147483647, %v1847_v8 }
 0x4a1   :  { %v1840_v14 = vor.u32 1.1754944e-38, %v1839_v2  ;;  %vm1838_vm2 = vcmp.eq.f32.partialorder %v1837_v5, 8.507059e+37 }
 0x4a2   :  { %v1860_v36 = vor.u32 1.1754944e-38, %v1859_v20  ;;  %vm1858_vm7 = vcmp.eq.f32.partialorder %v1857_v29, 8.507059e+37 }
 0x4a5   :  { %v2872_v40 = vpop.eup %2871 }
 0x4a6   :  { %v2874_v55 = vpop.eup %2873  ;;  %v1829_v10 = vmul.f32 %v2872_v40, %v1827_v58  ;;  %vm1834_vm14 = vweird.f32 %v2872_v40 }
 0x4a7   :  { %v1849_v59 = vmul.f32 %v2874_v55, %v1847_v8  ;;  %vm1835_vm0 = vmor %vm1833_vm15, %vm1834_vm14  ;;  %vm1854_vm3 = vweird.f32 %v2874_v55 }
 0x4a8   :  { %v1830_v22 = vsub.f32 1.0, %v1829_v10  ;;  %vm1855_vm6 = vmor %vm1853_vm5, %vm1854_vm3 }
 0x4a9   :  { %v1850_v62 = vsub.f32 1.0, %v1849_v59 }
 0x4aa   :  { %v1831_v4 = vmul.f32 %v2872_v40, %v1830_v22 }
 0x4ab   :  { %v1851_v15 = vmul.f32 %v2874_v55, %v1850_v62 }
 0x4ac   :  { %v1832_v39 = vadd.f32 %v2872_v40, %v1831_v4 }
 0x4ad   :  { %v1852_v21 = vadd.f32 %v2874_v55, %v1851_v15 }
 0x4ae   :  { %v1836_v13 = vsel %vm1835_vm0, %v2872_v40, %v1832_v39  ;;  %v1875_v39 = vld [vmem:[#allocation2 + $0xa8] sm:$0xf] }
 0x4af   :  { %v1841_v19 = vsel %vm1838_vm2, %v1840_v14, %v1836_v13  ;;  %v1856_v53 = vsel %vm1855_vm6, %v2874_v55, %v1852_v21 }
 0x4b0   :  { %v1863_v3 = vmul.f32 %v1841_v19, %v1821_v18  ;;  %v1861_v45 = vsel %vm1858_vm7, %v1860_v36, %v1856_v53  ;;  %v1993_v36 = vld [vmem:[#allocation2 + $0x38] sm:$0xf] }
 0x4b1   :  { %v1866_v47 = vsub.f32 1.0, %v1861_v45  ;;  %v1868_v28 = vmul.f32 %v1861_v45, %v3828_v0 }
 0x4b2   :  { %v1864_v6 = vadd.f32 %v1863_v3, %v1759_v27 }
 0x4b3   :  { %v2489_v30 = vpop.permute.xlu1 %2488 }
 0x4b4   :  { %v2509_v24 = vsel %vm521_vm10, %v2461_v61, %v2489_v30  ;;  %2875 = vtanh.f32 %v1864_v6  ;;  %v2471_v30 = vld [vmem:[#allocation4 + $0x14] sm:$0xf]  ;;  %v1991_v61 = vld [vmem:[#allocation2 + $0x18] sm:$0xf] }
 0x4b5   :  { %2518 = vst.msk [vmem:[#allocation17 + $0xc] sm:$0xf] %vm2514_vm4, %v2509_v24 }
 0x4b6   :  { %v1896_v43 = vpop.f32.mrf.mxu1 }
 0x4b7   :  { %v1939_v11 = vadd.f32 %v1896_v43, %v1871_v35 }
 0x4b9   :  { %v2682_v26 = vmul.f32 -1.442695, %v1939_v11 }
 0x4ba   :  { %v2876_v49 = vpop.eup %2875 }
 0x4bb   :  { %2877 = vpow2.f32 %v2682_v26  ;;  %v1867_v1 = vmul.f32 %v2876_v49, %v1866_v47 }
 0x4bc   :  { %v1916_v63 = vpop.f32.mrf.mxu2 }
 0x4bd   :  { %v1959_v33 = vadd.f32 %v1916_v63, %v1873_v34  ;;  %v3886_v23 = vadd.f32 %v1868_v28, %v1867_v1 }
 0x4bf   :  { %v2683_v12 = vmul.f32 -1.442695, %v1959_v33  ;;  %1987 = vst.msk [vmem:[#allocation3 + $0x14] sm:$0xf] %vm270_vm1, %v3886_v23  ;;  %2684 = vmatmul.msk.f32.vlgmr.msra.gmra.mxu0 %vm521_vm10, %v3886_v23  ;;  %2685 = vmatmul.msk.f32.vlgmr.msra.gmra.mxu1 %vm521_vm10, %v3886_v23 }
 0x4c0   :  { %2686 = vmatmul.msk.f32.vlgmr.msrb.gmra.mxu2 %vm521_vm10, %v3886_v23  ;;  %2287 = vmatpush.msra.mxu0 %v3336_v32 }
 0x4c1   :  { %v2878_v0 = vpop.eup %2877  ;;  %2879 = vpow2.f32 %v2683_v12  ;;  %2380 = vmatpush.msrb.mxu2 %v3358_v42  ;;  %2360 = vmatpush.msra.mxu1 %v2939_v52  ;;  %v2942_v42 = vld [vmem:[#allocation13] sm:$0xff] }
 0x4c2   :  { %v1943_v7 = vadd.f32 1.0, %v2878_v0  ;;  %2288 = vmatpush.msra.mxu0 %v3334_v31 }
 0x4c3   :  { %2381 = vmatpush.msrb.mxu2 %v3364_v44  ;;  %2361 = vmatpush.msra.mxu1 %v2940_v17 }
 0x4c4   :  { %2881 = vrcp.f32 %v1943_v7  ;;  %2289 = vmatpush.msra.mxu0 %v3352_v38  ;;  %v1955_v8 = vand.u32 2147483648, %v1943_v7  ;;  %v1953_v38 = vand.u32 2147483647, %v1943_v7  ;;  %vm1949_vm9 = vweird.f32 %v1943_v7 }
 0x4c5   :  { %2382 = vmatpush.msrb.mxu2 %v3373_v46  ;;  %2362 = vmatpush.msra.mxu1 %v2941_v41  ;;  %v1936_v46 = vpop.f32.mrf.mxu3 }
 0x4c6   :  { %2290 = vmatpush.msra.mxu0 %v3350_v37  ;;  %v1956_v37 = vor.u32 1.1754944e-38, %v1955_v8  ;;  %vm1954_vm12 = vcmp.eq.f32.partialorder %v1953_v38, 8.507059e+37  ;;  %v1995_v8 = vld [vmem:[#allocation2 + $0x58] sm:$0xf] }
 0x4c7   :  { %v2880_v32 = vpop.eup %2879  ;;  %2383 = vmatpush.msrb.mxu2 %v3381_v48  ;;  %2363 = vmatpush.msra.mxu1 %v2942_v42  ;;  %v1937_v48 = vadd.f32 %v3855_v25, %v1936_v46  ;;  %v2460_v46 = vld [vmem:[#allocation3 + $0x8] sm:$0xf] }
 0x4c8   :  { %v1963_v60 = vadd.f32 1.0, %v2880_v32 }
 0x4ca   :  { %v2882_v31 = vpop.eup %2881  ;;  %2883 = vrcp.f32 %v1963_v60  ;;  %v1975_v5 = vand.u32 2147483648, %v1963_v60  ;;  %v1973_v15 = vand.u32 2147483647, %v1963_v60  ;;  %vm1969_vm14 = vweird.f32 %v1963_v60 }
 0x4cb   :  { %v1945_v44 = vmul.f32 %v2882_v31, %v1943_v7  ;;  %vm1950_vm8 = vweird.f32 %v2882_v31 }
 0x4cc   :  { %vm1951_vm11 = vmor %vm1949_vm9, %vm1950_vm8  ;;  %v1976_v13 = vor.u32 1.1754944e-38, %v1975_v5  ;;  %vm1974_vm0 = vcmp.eq.f32.partialorder %v1973_v15, 8.507059e+37 }
 0x4cd   :  { %v1946_v58 = vsub.f32 1.0, %v1945_v44 }
 0x4cf   :  { %v1947_v40 = vmul.f32 %v2882_v31, %v1946_v58 }
 0x4d0   :  { %v2884_v55 = vpop.eup %2883 }
 0x4d1   :  { %v1965_v10 = vmul.f32 %v2884_v55, %v1963_v60  ;;  %v1948_v59 = vadd.f32 %v2882_v31, %v1947_v40  ;;  %vm1970_vm13 = vweird.f32 %v2884_v55 }
 0x4d2   :  { %vm1971_vm15 = vmor %vm1969_vm14, %vm1970_vm13 }
 0x4d3   :  { %v1966_v22 = vsub.f32 1.0, %v1965_v10  ;;  %v1952_v2 = vsel %vm1951_vm11, %v2882_v31, %v1948_v59 }
 0x4d4   :  { %v1957_v62 = vsel %vm1954_vm12, %v1956_v37, %v1952_v2 }
 0x4d5   :  { %v1967_v4 = vmul.f32 %v2884_v55, %v1966_v22  ;;  %v1979_v9 = vmul.f32 %v1957_v62, %v1937_v48  ;;  %v2109_v22 = vld [vmem:[#allocation2 + $0x84] sm:$0xf] }
 0x4d7   :  { %v1968_v14 = vadd.f32 %v2884_v55, %v1967_v4  ;;  %v1980_v18 = vadd.f32 %v1979_v9, %v1875_v39  ;;  %v2463_v39 = vld [vmem:[#allocation3 + $0x14] sm:$0xf] }
 0x4d9   :  { %v1972_v19 = vsel %vm1971_vm15, %v2884_v55, %v1968_v14  ;;  %2885 = vtanh.f32 %v1980_v18 }
 0x4da   :  { %v1977_v21 = vsel %vm1974_vm0, %v1976_v13, %v1972_v19  ;;  %v2107_v13 = vld [vmem:[#allocation2 + $0x64] sm:$0xf] }
 0x4db   :  { %v1982_v3 = vsub.f32 1.0, %v1977_v21  ;;  %v1984_v27 = vmul.f32 %v1977_v21, %v3859_v51 }
 0x4df   :  { %v2886_v20 = vpop.eup %2885 }
 0x4e0   :  { %v1983_v29 = vmul.f32 %v2886_v20, %v1982_v3 }
 0x4e2   :  { %v3906_v6 = vadd.f32 %v1984_v27, %v1983_v29 }
 0x4e4   :  { %1989 = vst.msk [vmem:[#allocation4 + $0x8] sm:$0xf] %vm270_vm1, %v3906_v6  ;;  %2689 = vmatmul.msk.f32.vlgmr.msrb.gmra.mxu3 %vm521_vm10, %v3906_v6  ;;  %2690 = vmatmul.msk.f32.vlgmr.msrb.gmra.mxu0 %vm521_vm10, %v3906_v6 }
 0x4e5   :  { %2691 = vmatmul.msk.f32.vlgmr.msrb.gmra.mxu1 %vm521_vm10, %v3906_v6  ;;  %2400 = vmatpush.msrb.mxu3 %v3385_v50 }
 0x4e7   :  { %2401 = vmatpush.msrb.mxu3 %v3393_v54 }
 0x4e9   :  { %2402 = vmatpush.msrb.mxu3 %v3405_v56 }
 0x4eb   :  { %2403 = vmatpush.msrb.mxu3 %v3412_v57  ;;  %v2468_v51 = vld [vmem:[#allocation4 + $0x8] sm:$0xf] }
 0x4ec   :  { %2486 = vrot.lane.b32.xlu0 %v2468_v51, %s3186_s8 }
 0x4f4   :  { %2492 = vrot.lane.b32.xlu0 %v2471_v30, %s3186_s8 }
 0x53c   :  { %v2016_v53 = vpop.f32.mrf.mxu0  ;;  %v2036_v24 = vpop.f32.mrf.mxu1 }
 0x53d   :  { %v2059_v35 = vadd.f32 %v2016_v53, %v1991_v61  ;;  %v2079_v43 = vadd.f32 %v2036_v24, %v1993_v36 }
 0x53f   :  { %v2687_v45 = vmul.f32 -1.442695, %v2059_v35  ;;  %v2688_v50 = vmul.f32 -1.442695, %v2079_v43 }
 0x541   :  { %2887 = vpow2.f32 %v2687_v45 }
 0x542   :  { %2889 = vpow2.f32 %v2688_v50 }
 0x543   :  { %v2056_v52 = vpop.f32.mrf.mxu2 }
 0x544   :  { %v2057_v41 = vadd.f32 %v3824_v16, %v2056_v52 }
 0x547   :  { %v2888_v54 = vpop.eup %2887 }
 0x548   :  { %v2890_v56 = vpop.eup %2889  ;;  %v2063_v11 = vadd.f32 1.0, %v2888_v54 }
 0x549   :  { %v2083_v57 = vadd.f32 1.0, %v2890_v56 }
 0x54a   :  { %2891 = vrcp.f32 %v2063_v11  ;;  %v2075_v63 = vand.u32 2147483648, %v2063_v11  ;;  %v2073_v12 = vand.u32 2147483647, %v2063_v11  ;;  %vm2069_vm3 = vweird.f32 %v2063_v11 }
 0x54b   :  { %2893 = vrcp.f32 %v2083_v57  ;;  %v2095_v31 = vand.u32 2147483648, %v2083_v57  ;;  %vm2089_vm8 = vweird.f32 %v2083_v57  ;;  %v2093_v58 = vand.u32 2147483647, %v2083_v57 }
 0x54c   :  { %v2076_v17 = vor.u32 1.1754944e-38, %v2075_v63  ;;  %vm2074_vm6 = vcmp.eq.f32.partialorder %v2073_v12, 8.507059e+37 }
 0x54d   :  { %v2096_v10 = vor.u32 1.1754944e-38, %v2095_v31  ;;  %vm2094_vm11 = vcmp.eq.f32.partialorder %v2093_v58, 8.507059e+37 }
 0x550   :  { %v2892_v26 = vpop.eup %2891 }
 0x551   :  { %v2894_v47 = vpop.eup %2893  ;;  %v2065_v49 = vmul.f32 %v2892_v26, %v2063_v11  ;;  %vm2070_vm2 = vweird.f32 %v2892_v26 }
 0x552   :  { %v2085_v1 = vmul.f32 %v2894_v47, %v2083_v57  ;;  %vm2071_vm5 = vmor %vm2069_vm3, %vm2070_vm2  ;;  %vm2090_vm7 = vweird.f32 %v2894_v47 }
 0x553   :  { %v2066_v28 = vsub.f32 1.0, %v2065_v49  ;;  %vm2091_vm9 = vmor %vm2089_vm8, %vm2090_vm7 }
 0x554   :  { %v2086_v34 = vsub.f32 1.0, %v2085_v1 }
 0x555   :  { %v2067_v33 = vmul.f32 %v2892_v26, %v2066_v28 }
 0x556   :  { %v2087_v0 = vmul.f32 %v2894_v47, %v2086_v34 }
 0x557   :  { %v2068_v7 = vadd.f32 %v2892_v26, %v2067_v33  ;;  %v2111_v33 = vld [vmem:[#allocation2 + $0xa4] sm:$0xf] }
 0x558   :  { %v2088_v42 = vadd.f32 %v2894_v47, %v2087_v0 }
 0x559   :  { %v2072_v32 = vsel %vm2071_vm5, %v2892_v26, %v2068_v7 }
 0x55a   :  { %v2077_v60 = vsel %vm2074_vm6, %v2076_v17, %v2072_v32  ;;  %v2092_v38 = vsel %vm2091_vm9, %v2894_v47, %v2088_v42 }
 0x55b   :  { %v2099_v44 = vmul.f32 %v2077_v60, %v2057_v41  ;;  %v2097_v37 = vsel %vm2094_vm11, %v2096_v10, %v2092_v38 }
 0x55c   :  { %v2102_v62 = vsub.f32 1.0, %v2097_v37  ;;  %v2104_v14 = vmul.f32 %v2097_v37, %v3886_v23 }
 0x55d   :  { %v2100_v40 = vadd.f32 %v2099_v44, %v1995_v8  ;;  %v2473_v44 = vld [vmem:[#allocation4 + $0x1c] sm:$0xf] }
 0x55e   :  { %v2487_v55 = vpop.permute.xlu0 %2486  ;;  %v2229_v8 = vld [vmem:[#allocation2 + $0x3c] sm:$0xf] }
 0x55f   :  { %2895 = vtanh.f32 %v2100_v40  ;;  %v2508_v59 = vsel %vm521_vm10, %v2460_v46, %v2487_v55 }
 0x560   :  { %2517 = vst.msk [vmem:[#allocation17 + $0x8] sm:$0xf] %vm2514_vm4, %v2508_v59  ;;  %v2526_v59 = vld [vmem:[#allocation14 + $0x18] sm:$0xff] }
 0x561   :  { %v2152_v48 = vpop.f32.mrf.mxu0  ;;  %2569 = vmatpush.msrb.mxu1 %v2526_v59 }
 0x562   :  { %v2195_v2 = vadd.f32 %v2152_v48, %v2109_v22  ;;  %v2172_v56 = vpop.f32.mrf.mxu1  ;;  %v2459_v22 = vld [vmem:[#allocation3 + $0x4] sm:$0xf] }
 0x563   :  { %v2173_v26 = vadd.f32 %v3855_v25, %v2172_v56 }
 0x564   :  { %v2693_v4 = vmul.f32 -1.442695, %v2195_v2 }
 0x565   :  { %v2896_v5 = vpop.eup %2895 }
 0x566   :  { %v2103_v9 = vmul.f32 %v2896_v5, %v2102_v62  ;;  %2897 = vpow2.f32 %v2693_v4  ;;  %v2493_v15 = vpop.permute.xlu0 %2492  ;;  %v2525_v62 = vld [vmem:[#allocation14 + $0x10] sm:$0xff] }
 0x567   :  { %v2511_v18 = vsel %vm521_vm10, %v2463_v39, %v2493_v15  ;;  %v2132_v19 = vpop.f32.mrf.mxu3  ;;  %2570 = vmatpush.msrb.mxu1 %v2525_v62  ;;  %v2524_v15 = vld [vmem:[#allocation14 + $0x8] sm:$0xff]  ;;  %v2523_v39 = vld [vmem:[#allocation14] sm:$0xff] }
 0x568   :  { %2520 = vst.msk [vmem:[#allocation17 + $0x14] sm:$0xf] %vm2514_vm4, %v2511_v18  ;;  %v2175_v21 = vadd.f32 %v2132_v19, %v2107_v13  ;;  %v3928_v3 = vadd.f32 %v2104_v14, %v2103_v9 }
 0x569   :  { %2571 = vmatpush.msrb.mxu1 %v2524_v15 }
 0x56a   :  { %v2692_v20 = vmul.f32 -1.442695, %v2175_v21  ;;  %2223 = vst.msk [vmem:[#allocation3 + $0x18] sm:$0xf] %vm270_vm1, %v3928_v3  ;;  %2694 = vmatmul.msk.f32.vlgmr.msra.gmra.mxu2 %vm521_vm10, %v3928_v3  ;;  %2695 = vmatmul.msk.f32.vlgmr.msra.gmra.mxu3 %vm521_vm10, %v3928_v3 }
 0x56b   :  { %2696 = vmatmul.msk.f32.vlgmr.msra.gmra.mxu0 %vm521_vm10, %v3928_v3  ;;  %2572 = vmatpush.msrb.mxu1 %v2523_v39 }
 0x56c   :  { %v2898_v23 = vpop.eup %2897  ;;  %2899 = vpow2.f32 %v2692_v20 }
 0x56d   :  { %v2199_v29 = vadd.f32 1.0, %v2898_v23 }
 0x56f   :  { %2901 = vrcp.f32 %v2199_v29  ;;  %v2211_v28 = vand.u32 2147483648, %v2199_v29  ;;  %vm2205_vm2 = vweird.f32 %v2199_v29  ;;  %v2209_v63 = vand.u32 2147483647, %v2199_v29 }
 0x571   :  { %v2212_v52 = vor.u32 1.1754944e-38, %v2211_v28  ;;  %vm2210_vm5 = vcmp.eq.f32.partialorder %v2209_v63, 8.507059e+37 }
 0x572   :  { %v2900_v27 = vpop.eup %2899 }
 0x573   :  { %v2179_v51 = vadd.f32 1.0, %v2900_v27 }
 0x575   :  { %2903 = vrcp.f32 %v2179_v51  ;;  %v2902_v30 = vpop.eup %2901  ;;  %v2191_v43 = vand.u32 2147483648, %v2179_v51  ;;  %v2189_v50 = vand.u32 2147483647, %v2179_v51  ;;  %vm2185_vm13 = vweird.f32 %v2179_v51 }
 0x576   :  { %v2201_v61 = vmul.f32 %v2902_v30, %v2199_v29  ;;  %vm2206_vm0 = vweird.f32 %v2902_v30 }
 0x577   :  { %v2192_v57 = vor.u32 1.1754944e-38, %v2191_v43  ;;  %vm2190_vm15 = vcmp.eq.f32.partialorder %v2189_v50, 8.507059e+37  ;;  %vm2207_vm3 = vmor %vm2205_vm2, %vm2206_vm0 }
 0x578   :  { %v2202_v24 = vsub.f32 1.0, %v2201_v61 }
 0x57a   :  { %v2203_v54 = vmul.f32 %v2902_v30, %v2202_v24 }
 0x57b   :  { %v2904_v53 = vpop.eup %2903 }
 0x57c   :  { %v2181_v36 = vmul.f32 %v2904_v53, %v2179_v51  ;;  %vm2186_vm12 = vweird.f32 %v2904_v53  ;;  %v2204_v49 = vadd.f32 %v2902_v30, %v2203_v54  ;;  %v2231_v54 = vld [vmem:[#allocation2 + $0x5c] sm:$0xf] }
 0x57d   :  { %vm2187_vm14 = vmor %vm2185_vm13, %vm2186_vm12 }
 0x57e   :  { %v2182_v35 = vsub.f32 1.0, %v2181_v36  ;;  %v2208_v0 = vsel %vm2207_vm3, %v2902_v30, %v2204_v49  ;;  %v2342_v49 = vld [vmem:[#allocation2 + $0x60] sm:$0xf] }
 0x57f   :  { %v2213_v7 = vsel %vm2210_vm5, %v2212_v52, %v2208_v0  ;;  %v2343_v0 = vld [vmem:[#allocation2 + $0x80] sm:$0xf] }
 0x580   :  { %v2183_v45 = vmul.f32 %v2904_v53, %v2182_v35  ;;  %v2218_v17 = vsub.f32 1.0, %v2213_v7  ;;  %v2220_v42 = vmul.f32 %v2213_v7, %v3906_v6  ;;  %v2227_v6 = vld [vmem:[#allocation2 + $0x1c] sm:$0xf] }
 0x582   :  { %v2184_v11 = vadd.f32 %v2904_v53, %v2183_v45 }
 0x584   :  { %v2188_v47 = vsel %vm2187_vm14, %v2904_v53, %v2184_v11 }
 0x585   :  { %v2193_v1 = vsel %vm2190_vm15, %v2192_v57, %v2188_v47 }
 0x586   :  { %v2215_v34 = vmul.f32 %v2193_v1, %v2173_v26 }
 0x588   :  { %v2216_v12 = vadd.f32 %v2215_v34, %v2111_v33 }
 0x58a   :  { %2905 = vtanh.f32 %v2216_v12 }
 0x590   :  { %v2906_v41 = vpop.eup %2905 }
 0x591   :  { %v2219_v32 = vmul.f32 %v2906_v41, %v2218_v17  ;;  %v2530_v41 = vld [vmem:[#allocation16 + $0x18] sm:$0xff] }
 0x592   :  { %2546 = vmatpush.msrb.mxu0 %v2530_v41 }
 0x593   :  { %v3940_v60 = vadd.f32 %v2220_v42, %v2219_v32  ;;  %v2529_v42 = vld [vmem:[#allocation16 + $0x10] sm:$0xff] }
 0x594   :  { %2547 = vmatpush.msrb.mxu0 %v2529_v42 }
 0x595   :  { %2225 = vst.msk [vmem:[#allocation4 + $0x4] sm:$0xf] %vm270_vm1, %v3940_v60  ;;  %2699 = vmatmul.msk.f32.vlgmr.msra.gmra.mxu1 %vm521_vm10, %v3940_v60  ;;  %2700 = vmatmul.msk.f32.vlgmr.msrb.gmra.mxu2 %vm521_vm10, %v3940_v60 }
 0x596   :  { %2701 = vmatmul.msk.f32.vlgmr.msrb.gmra.mxu3 %vm521_vm10, %v3940_v60 }
 0x59c   :  { %v2467_v31 = vld [vmem:[#allocation4 + $0x4] sm:$0xf] }
 0x59d   :  { %2484 = vrot.lane.b32.xlu2 %v2467_v31, %s3186_s8  ;;  %v2528_v31 = vld [vmem:[#allocation16 + $0x8] sm:$0xff] }
 0x59e   :  { %2548 = vmatpush.msrb.mxu0 %v2528_v31 }
 0x5a5   :  { %2496 = vrot.lane.b32.xlu2 %v2473_v44, %s3186_s8 }
 0x5e8   :  { %v2292_v51 = vpop.f32.mrf.mxu0 }
 0x5e9   :  { %v2293_v36 = vadd.f32 %v3824_v16, %v2292_v51 }
 0x5ed   :  { %v2252_v58 = vpop.f32.mrf.mxu2  ;;  %v2272_v40 = vpop.f32.mrf.mxu3 }
 0x5ee   :  { %v2295_v38 = vadd.f32 %v2252_v58, %v2227_v6  ;;  %v2315_v55 = vadd.f32 %v2272_v40, %v2229_v8  ;;  %v2527_v58 = vld [vmem:[#allocation16] sm:$0xff] }
 0x5ef   :  { %2549 = vmatpush.msrb.mxu0 %v2527_v58 }
 0x5f0   :  { %v2697_v46 = vmul.f32 -1.442695, %v2295_v38  ;;  %v2698_v10 = vmul.f32 -1.442695, %v2315_v55 }
 0x5f2   :  { %2907 = vpow2.f32 %v2697_v46 }
 0x5f3   :  { %2909 = vpow2.f32 %v2698_v10 }
 0x5f7   :  { %v2485_v37 = vpop.permute.xlu2 %2484 }
 0x5f8   :  { %v2908_v48 = vpop.eup %2907  ;;  %v2507_v2 = vsel %vm521_vm10, %v2459_v22, %v2485_v37 }
 0x5f9   :  { %v2910_v4 = vpop.eup %2909  ;;  %v2299_v5 = vadd.f32 1.0, %v2908_v48  ;;  %2516 = vst.msk [vmem:[#allocation17 + $0x4] sm:$0xf] %vm2514_vm4, %v2507_v2 }
 0x5fa   :  { %v2319_v9 = vadd.f32 1.0, %v2910_v4 }
 0x5fb   :  { %2911 = vrcp.f32 %v2299_v5  ;;  %v2311_v20 = vand.u32 2147483648, %v2299_v5  ;;  %v2309_v27 = vand.u32 2147483647, %v2299_v5  ;;  %vm2305_vm7 = vweird.f32 %v2299_v5 }
 0x5fc   :  { %2913 = vrcp.f32 %v2319_v9  ;;  %v2331_v50 = vand.u32 2147483648, %v2319_v9  ;;  %vm2325_vm12 = vweird.f32 %v2319_v9  ;;  %v2329_v56 = vand.u32 2147483647, %v2319_v9 }
 0x5fd   :  { %v2312_v53 = vor.u32 1.1754944e-38, %v2311_v20  ;;  %vm2310_vm9 = vcmp.eq.f32.partialorder %v2309_v27, 8.507059e+37 }
 0x5fe   :  { %v2332_v26 = vor.u32 1.1754944e-38, %v2331_v50  ;;  %vm2330_vm14 = vcmp.eq.f32.partialorder %v2329_v56, 8.507059e+37  ;;  %v2458_v50 = vld [vmem:[#allocation3] sm:$0xf] }
 0x601   :  { %v2912_v14 = vpop.eup %2911 }
 0x602   :  { %v2914_v18 = vpop.eup %2913  ;;  %v2301_v13 = vmul.f32 %v2912_v14, %v2299_v5  ;;  %vm2306_vm6 = vweird.f32 %v2912_v14 }
 0x603   :  { %v2321_v19 = vmul.f32 %v2914_v18, %v2319_v9  ;;  %vm2307_vm8 = vmor %vm2305_vm7, %vm2306_vm6  ;;  %vm2326_vm11 = vweird.f32 %v2914_v18 }
 0x604   :  { %v2302_v21 = vsub.f32 1.0, %v2301_v13  ;;  %vm2327_vm13 = vmor %vm2325_vm12, %vm2326_vm11 }
 0x605   :  { %v2322_v23 = vsub.f32 1.0, %v2321_v19 }
 0x606   :  { %v2303_v29 = vmul.f32 %v2912_v14, %v2302_v21 }
 0x607   :  { %v2323_v30 = vmul.f32 %v2914_v18, %v2322_v23  ;;  %v2344_v23 = vld [vmem:[#allocation2 + $0xa0] sm:$0xf] }
 0x608   :  { %v2304_v61 = vadd.f32 %v2912_v14, %v2303_v29 }
 0x609   :  { %v2324_v43 = vadd.f32 %v2914_v18, %v2323_v30 }
 0x60a   :  { %v2308_v24 = vsel %vm2307_vm8, %v2912_v14, %v2304_v61 }
 0x60b   :  { %v2313_v35 = vsel %vm2310_vm9, %v2312_v53, %v2308_v24  ;;  %v2328_v57 = vsel %vm2327_vm13, %v2914_v18, %v2324_v43 }
 0x60c   :  { %v2335_v45 = vmul.f32 %v2313_v35, %v2293_v36  ;;  %v2333_v47 = vsel %vm2330_vm14, %v2332_v26, %v2328_v57 }
 0x60d   :  { %v2338_v28 = vsub.f32 1.0, %v2333_v47  ;;  %v2340_v12 = vmul.f32 %v2333_v47, %v3928_v3  ;;  %v2497_v3 = vpop.permute.xlu2 %2496 }
 0x60e   :  { %v2336_v11 = vadd.f32 %v2335_v45, %v2231_v54  ;;  %v2472_v45 = vld [vmem:[#allocation4 + $0x18] sm:$0xf] }
 0x610   :  { %2915 = vtanh.f32 %v2336_v11 }
 0x612   :  { %v2365_v1 = vpop.f32.mrf.mxu1 }
 0x613   :  { %v2408_v16 = vadd.f32 %v2365_v1, %v2342_v49  ;;  %v2464_v1 = vld [vmem:[#allocation3 + $0x18] sm:$0xf] }
 0x615   :  { %v2702_v34 = vmul.f32 -1.442695, %v2408_v16 }
 0x616   :  { %v2916_v63 = vpop.eup %2915 }
 0x617   :  { %v2339_v33 = vmul.f32 %v2916_v63, %v2338_v28  ;;  %2917 = vpow2.f32 %v2702_v34 }
 0x618   :  { %v2385_v52 = vpop.f32.mrf.mxu2 }
 0x619   :  { %v2341_v7 = vadd.f32 %v2340_v12, %v2339_v33  ;;  %v2428_v17 = vadd.f32 %v2385_v52, %v2343_v0  ;;  %v2405_v62 = vpop.f32.mrf.mxu3 }
 0x61a   :  { %v2406_v39 = vadd.f32 %v3855_v25, %v2405_v62 }
 0x61b   :  { %2456 = vst.msk [vmem:[#allocation3 + $0x1c] sm:$0xf] %vm270_vm1, %v2341_v7  ;;  %v2703_v32 = vmul.f32 -1.442695, %v2428_v17  ;;  %2705 = vmatmul.msk.f32.vlgmr.msrb.gmra.mxu1 %vm521_vm10, %v2341_v7 }
 0x61d   :  { %v2918_v44 = vpop.eup %2917  ;;  %2919 = vpow2.f32 %v2703_v32 }
 0x61e   :  { %v2412_v6 = vadd.f32 1.0, %v2918_v44 }
 0x620   :  { %2921 = vrcp.f32 %v2412_v6  ;;  %v2424_v37 = vand.u32 2147483648, %v2412_v6  ;;  %v2422_v48 = vand.u32 2147483647, %v2412_v6  ;;  %vm2418_vm0 = vweird.f32 %v2412_v6 }
 0x622   :  { %v2465_v8 = vld [vmem:[#allocation3 + $0x1c] sm:$0xf]  ;;  %v2425_v9 = vor.u32 1.1754944e-38, %v2424_v37  ;;  %vm2423_vm3 = vcmp.eq.f32.partialorder %v2422_v48, 8.507059e+37 }
 0x623   :  { %v2920_v40 = vpop.eup %2919  ;;  %v2513_v38 = vsel %vm521_vm10, %v2465_v8, %v2497_v3 }
 0x624   :  { %2522 = vst.msk [vmem:[#allocation17 + $0x1c] sm:$0xf] %vm2514_vm4, %v2513_v38  ;;  %v2432_v55 = vadd.f32 1.0, %v2920_v40 }
 0x626   :  { %v2922_v46 = vpop.eup %2921  ;;  %2923 = vrcp.f32 %v2432_v55  ;;  %v2444_v19 = vand.u32 2147483648, %v2432_v55  ;;  %v2442_v20 = vand.u32 2147483647, %v2432_v55  ;;  %vm2438_vm6 = vweird.f32 %v2432_v55 }
 0x627   :  { %v2414_v10 = vmul.f32 %v2922_v46, %v2412_v6  ;;  %vm2419_vm15 = vweird.f32 %v2922_v46 }
 0x628   :  { %vm2420_vm2 = vmor %vm2418_vm0, %vm2419_vm15  ;;  %v2445_v51 = vor.u32 1.1754944e-38, %v2444_v19  ;;  %vm2443_vm8 = vcmp.eq.f32.partialorder %v2442_v20, 8.507059e+37 }
 0x629   :  { %v2415_v59 = vsub.f32 1.0, %v2414_v10 }
 0x62b   :  { %v2416_v22 = vmul.f32 %v2922_v46, %v2415_v59 }
 0x62c   :  { %v2924_v2 = vpop.eup %2923 }
 0x62d   :  { %v2434_v4 = vmul.f32 %v2924_v2, %v2432_v55  ;;  %v2417_v5 = vadd.f32 %v2922_v46, %v2416_v22  ;;  %vm2439_vm5 = vweird.f32 %v2924_v2 }
 0x62e   :  { %vm2440_vm7 = vmor %vm2438_vm6, %vm2439_vm5 }
 0x62f   :  { %v2435_v15 = vsub.f32 1.0, %v2434_v4  ;;  %v2421_v14 = vsel %vm2420_vm2, %v2922_v46, %v2417_v5 }
 0x630   :  { %v2426_v18 = vsel %vm2423_vm3, %v2425_v9, %v2421_v14 }
 0x631   :  { %v2436_v13 = vmul.f32 %v2924_v2, %v2435_v15  ;;  %v2448_v21 = vmul.f32 %v2426_v18, %v2406_v39 }
 0x633   :  { %v2437_v29 = vadd.f32 %v2924_v2, %v2436_v13  ;;  %v2449_v27 = vadd.f32 %v2448_v21, %v2344_v23 }
 0x635   :  { %v2441_v30 = vsel %vm2440_vm7, %v2924_v2, %v2437_v29  ;;  %2925 = vtanh.f32 %v2449_v27 }
 0x636   :  { %v2446_v61 = vsel %vm2443_vm8, %v2445_v51, %v2441_v30 }
 0x637   :  { %v2451_v53 = vsub.f32 1.0, %v2446_v61  ;;  %v2453_v24 = vmul.f32 %v2446_v61, %v3940_v60  ;;  %v2766_v60 = vld [vmem:[%s3992_s9] ss:$0 sm:$0xff]  ;;  %s3188_s9 = smov [#allocation18]  }
 0x638   :  { %s2602_s26 = sshll.u32 %s3188_s9, 4  ;;  %s2603_s26 = int_to_ptr.vmem [resolvable:$true] %s2602_s26 }
 0x63b   :  { %v2926_v25 = vpop.eup %2925 }
 0x63c   :  { %v2452_v36 = vmul.f32 %v2926_v25, %v2451_v53 }
 0x63e   :  { %v2454_v35 = vadd.f32 %v2453_v24, %v2452_v36 }
 0x640   :  { %2457 = vst.msk [vmem:[#allocation4] sm:$0xf] %vm270_vm1, %v2454_v35  ;;  %2704 = vmatmul.msk.f32.vlgmr.msrb.gmra.mxu0 %vm521_vm10, %v2454_v35 }
 0x647   :  { %v2466_v43 = vld [vmem:[#allocation4] sm:$0xf] }
 0x648   :  { %2482 = vrot.lane.b32.xlu1 %v2466_v43, %s3186_s8 }
 0x650   :  { %2494 = vrot.lane.b32.xlu1 %v2472_v45, %s3186_s8 }
 0x698   :  { %v2574_v11 = vpop.f32.mrf.mxu1 }
 0x6ba   :  { %v2483_v54 = vpop.permute.xlu1 %2482 }
 0x6bb   :  { %v2506_v56 = vsel %vm521_vm10, %v2458_v50, %v2483_v54 }
 0x6bc   :  { %2515 = vst.msk [vmem:[#allocation17] sm:$0xf] %vm2514_vm4, %v2506_v56 }
 0x6bd   :  { %v2551_v57 = vpop.f32.mrf.mxu0 }
 0x6be   :  { %v2575_v26 = vadd.f32 %v2574_v11, %v2551_v57 }
 0x6c0   :  { %v2581_v47 = vadd.f32 %v2766_v60, %v2575_v26 }
 0x6c2   :  { %2927 = vtanh.f32 %v2581_v47  ;;  %v2495_v49 = vpop.permute.xlu1 %2494 }
 0x6c3   :  { %v2512_v16 = vsel %vm521_vm10, %v2464_v1, %v2495_v49 }
 0x6c4   :  { %2521 = vst.msk [vmem:[#allocation17 + $0x18] sm:$0xf] %vm2514_vm4, %v2512_v16 }
 0x6c5   :  { %2596 = dma.vmem_to_hbm [thread:$0]  %s2589_s23, 512, %s2591_s25, [#allocation7], %s3179_s20, %s3179_s20, %s3180_s21  }
 0x6c8   :  { %v2928_v28 = vpop.eup %2927 }
 0x6c9   :  { %2583 = vst.msk [vmem:[#allocation18] sm:$0xf] %vm270_vm1, %v2928_v28 }
 0x6ca   :  { %2607 = dma.vmem_to_hbm [thread:$0]  %s2603_s26, 64, %s2605_s1, [#allocation19]  }
 0x6cb   :  { %3167 = dma.done.wait [#allocation7], 512  }
 0x6cc   :  { %3168 = vsyncadd [#allocation7], 4294966784 }
 0x6cd   :  { %3169 = dma.done.wait [#allocation19], 64  }
 0x6ce   :  { %3170 = vsyncadd [#allocation19], 4294967232 }
 0x6cf   :  { %2616 = vsyncpa [#allocation6], 1 }
 0x6d0   :  { %2617 = vsyncpa [#allocation9], 1 }
 0x6d1   :  { %2618 = vsyncpa [#allocation12], 1 }
 0x6d2   :  { %2619 = vsyncpa [#allocation15], 1 }
 0x6d3   :  { %2620 = vsyncpa [#allocation7], 1 }
 0x6d4   :  { %2621 = vsyncpa [#allocation19], 1 }

</bundles_post_ra>
